<compile_context>
chip_gen: v7x
topology: tpu7x:2x2x1
jax: 0.10.0
libtpu: 0.0.40
codegen_flags: <defaults>
</compile_context>

<pallas_src>
import numpy as np

import jax
import jax.numpy as jnp
from jax import lax
from jax.experimental import pallas as pl
from jax.experimental.pallas import tpu as pltpu

_EPS = 1e-5


def dense_layer_kernel(x_ref, s1_ref, b1_ref, w1_ref, b2_ref, w2_ref, mask_ref,
                       o_ref, col_ref):
  """One batch image per grid step.

  x_ref   : (1, H, W, Cin)    f32   input image (NHWC)
  s1/b1   : (1, Cin)          f32   folded BN1 scale / bias
  w1_ref  : (Cin, Cmid)       bf16  1x1 conv weight (BN2 scale pre-folded)
  b2_ref  : (1, Cmid)         f32   folded BN2 bias
  w2_ref  : (9*Cmid, G)       bf16  3x3 conv weight, tap-major im2col layout
  mask_ref: (9, H*W, 1)       f32   0/1 "tap source is inside image" masks
  o_ref   : (1, H, W, Cin+G)  f32   fused concat([x, new_features], channels)
  col_ref : (H*W, 9*Cmid)     bf16  VMEM scratch: im2col buffer
  """
  _, H, W, Cin = x_ref.shape
  Cmid = w1_ref.shape[1]
  G = w2_ref.shape[1]
  HW = H * W

  xv = x_ref[0]                                    # (H, W, Cin) f32
  o_ref[0, :, :, :Cin] = xv                        # fused concat: pass-through

  # BN1 + ReLU in f32 on the VPU, bf16 operands into the MXU.
  h = jnp.maximum(xv.reshape(HW, Cin) * s1_ref[...] + b1_ref[...], 0.0)
  m = jnp.dot(h.astype(jnp.bfloat16), w1_ref[...],
              preferred_element_type=jnp.float32)  # (HW, Cmid) f32
  # BN2 (scale already folded into w1) + ReLU.
  m = jnp.maximum(m + b2_ref[...], 0.0)

  # im2col for the 3x3 / pad=1 conv: tap t = (dh, dw) is a sublane roll of m
  # by dh*W + dw rows; rows whose source lies outside the image are zeroed by
  # the precomputed mask.  Rolls hit the XLU; masking is a cheap VPU multiply.
  for t in range(9):
    dh, dw = t // 3 - 1, t % 3 - 1
    s = dh * W + dw
    shifted = m if s == 0 else pltpu.roll(m, (-s) % HW, axis=0)
    col_ref[:, t * Cmid:(t + 1) * Cmid] = (
        shifted * mask_ref[t]).astype(col_ref.dtype)

  # Single K = 9*Cmid matmul for the 3x3 conv.
  out = jnp.dot(col_ref[...], w2_ref[...],
                preferred_element_type=jnp.float32)  # (HW, G) f32
  o_ref[0, :, :, Cin:] = out.reshape(H, W, G).astype(o_ref.dtype)


def _border_masks(H, W):
  """(9, H*W, 1) float32 masks: 1.0 where tap (dh,dw) source is in-image."""
  m = np.zeros((9, H * W, 1), np.float32)
  for t in range(9):
    dh, dw = t // 3 - 1, t % 3 - 1
    for h in range(H):
      for w in range(W):
        if 0 <= h + dh < H and 0 <= w + dw < W:
          m[t, h * W + w, 0] = 1.0
  return jnp.asarray(m)


def _dense_layer_nhwc(x_nhwc, params):
  """One DenseLayer in NHWC: (N,H,W,Cin) -> (N,H,W,Cin+G)."""
  (g1, b1, rm1, rv1, w1, g2, b2, rm2, rv2, w2) = params
  N, H, W, Cin = x_nhwc.shape
  Cmid = w1.shape[0]
  G = w2.shape[0]
  HW = H * W

  # Fold BatchNorms (inference) into per-channel scale/bias; fold BN2's scale
  # into the 1x1 conv weight columns (exact, done once host-side).
  scale1 = g1 / jnp.sqrt(rv1 + _EPS)
  bias1 = b1 - rm1 * scale1
  scale2 = g2 / jnp.sqrt(rv2 + _EPS)
  bias2 = b2 - rm2 * scale2

  w1_mat = jnp.transpose(w1[:, :, 0, 0], (1, 0)) * scale2[None, :]  # (Cin,Cmid)
  # (G, Cmid, 3, 3) -> (kh, kw, Cmid, G) -> (9*Cmid, G); row index = t*Cmid + c.
  w2_mat = jnp.transpose(w2, (2, 3, 1, 0)).reshape(9 * Cmid, G)

  return pl.pallas_call(
      dense_layer_kernel,
      out_shape=jax.ShapeDtypeStruct((N, H, W, Cin + G), jnp.float32),
      grid_spec=pltpu.PrefetchScalarGridSpec(
          num_scalar_prefetch=0,
          grid=(N,),
          in_specs=[
              pl.BlockSpec((1, H, W, Cin), lambda n: (n, 0, 0, 0)),
              pl.BlockSpec((1, Cin), lambda n: (0, 0)),
              pl.BlockSpec((1, Cin), lambda n: (0, 0)),
              pl.BlockSpec((Cin, Cmid), lambda n: (0, 0)),
              pl.BlockSpec((1, Cmid), lambda n: (0, 0)),
              pl.BlockSpec((9 * Cmid, G), lambda n: (0, 0)),
              pl.BlockSpec((9, HW, 1), lambda n: (0, 0, 0)),
          ],
          out_specs=pl.BlockSpec((1, H, W, Cin + G), lambda n: (n, 0, 0, 0)),
          scratch_shapes=[pltpu.VMEM((HW, 9 * Cmid), jnp.bfloat16)],
      ),
      compiler_params=pltpu.CompilerParams(
          dimension_semantics=("parallel",)),
  )(x_nhwc,
    scale1.reshape(1, Cin).astype(jnp.float32),
    bias1.reshape(1, Cin).astype(jnp.float32),
    w1_mat.astype(jnp.bfloat16),
    bias2.reshape(1, Cmid).astype(jnp.float32),
    w2_mat.astype(jnp.bfloat16),
    _border_masks(H, W))


@jax.jit
def dense_block_forward(x_nchw, layer_params):
  """DenseBlock: x (N, Cin, H, W) f32 -> (N, Cin + n_layers*G, H, W) f32."""
  x = jnp.transpose(x_nchw, (0, 2, 3, 1))          # NCHW -> NHWC, once
  for params in layer_params:
    x = _dense_layer_nhwc(x, params)
  return jnp.transpose(x, (0, 3, 1, 2))            # back to NCHW, once


# ----------------------------- references -----------------------------------


def _reference_layer(x, params, match_kernel_precision):
  (g1, b1, rm1, rv1, w1, g2, b2, rm2, rv2, w2) = params

  if not match_kernel_precision:
    # Module-faithful eval-mode math, all f32.
    def bn(v, g, b, m, var):
      g, b, m, var = (a[None, :, None, None] for a in (g, b, m, var))
      return (v - m) / jnp.sqrt(var + _EPS) * g + b

    h = jax.nn.relu(bn(x, g1, b1, rm1, rv1))
    h = lax.conv_general_dilated(h, w1, (1, 1), "VALID",
                                 dimension_numbers=("NCHW", "OIHW", "NCHW"))
    h = jax.nn.relu(bn(h, g2, b2, rm2, rv2))
    out = lax.conv_general_dilated(h, w2, (1, 1), ((1, 1), (1, 1)),
                                   dimension_numbers=("NCHW", "OIHW", "NCHW"))
  else:
    # Same math, but with the BN folding and bf16 MXU-operand casts arranged
    # exactly like the Pallas kernel, so this comparison isolates kernel bugs
    # from the (intentional) bf16 operand precision choice.
    s1 = g1 / jnp.sqrt(rv1 + _EPS)
    bb1 = b1 - rm1 * s1
    s2 = g2 / jnp.sqrt(rv2 + _EPS)
    bb2 = b2 - rm2 * s2
    h = jax.nn.relu(x * s1[None, :, None, None] + bb1[None, :, None, None])
    w1_eff = (w1 * s2[:, None, None, None]).astype(jnp.bfloat16)
    m = lax.conv_general_dilated(h.astype(jnp.bfloat16), w1_eff, (1, 1),
                                 "VALID",
                                 dimension_numbers=("NCHW", "OIHW", "NCHW"),
                                 preferred_element_type=jnp.float32)
    m = jax.nn.relu(m + bb2[None, :, None, None])
    out = lax.conv_general_dilated(m.astype(jnp.bfloat16),
                                   w2.astype(jnp.bfloat16), (1, 1),
                                   ((1, 1), (1, 1)),
                                   dimension_numbers=("NCHW", "OIHW", "NCHW"),
                                   preferred_element_type=jnp.float32)
  return jnp.concatenate([x, out.astype(x.dtype)], axis=1)


def reference_block(x, layer_params, match_kernel_precision=False):
  for params in layer_params:
    x = _reference_layer(x, params, match_kernel_precision)
  return x


# ----------------------------- test harness ---------------------------------


def init_layer_params(key, in_channels, growth_rate, bn_size):
  cmid = bn_size * growth_rate
  ks = jax.random.split(key, 10)
  g1 = jax.random.uniform(ks[0], (in_channels,), jnp.float32, 0.5, 1.5)
  b1 = jax.random.normal(ks[1], (in_channels,), jnp.float32) * 0.1
  rm1 = jax.random.normal(ks[2], (in_channels,), jnp.float32) * 0.1
  rv1 = jax.random.uniform(ks[3], (in_channels,), jnp.float32, 0.5, 1.5)
  w1 = jax.random.normal(ks[4], (cmid, in_channels, 1, 1), jnp.float32) * 0.2
  g2 = jax.random.uniform(ks[5], (cmid,), jnp.float32, 0.5, 1.5)
  b2 = jax.random.normal(ks[6], (cmid,), jnp.float32) * 0.1
  rm2 = jax.random.normal(ks[7], (cmid,), jnp.float32) * 0.1
  rv2 = jax.random.uniform(ks[8], (cmid,), jnp.float32, 0.5, 1.5)
  w2 = jax.random.normal(ks[9], (growth_rate, cmid, 3, 3), jnp.float32) * 0.1
  return (g1, b1, rm1, rv1, w1, g2, b2, rm2, rv2, w2)


if __name__ == "__main__":
  in_channels, growth_rate, bn_size, drop_rate, n_layers = 16, 8, 4, 0.0, 3
  N, H, W = 2, 8, 8

  key = jax.random.PRNGKey(0)
  kx, kp = jax.random.split(key)
  x = jax.random.normal(kx, (N, in_channels, H, W), jnp.float32)

  layer_keys = jax.random.split(kp, n_layers)
  layer_params = tuple(
      init_layer_params(layer_keys[i], in_channels + i * growth_rate,
                        growth_rate, bn_size) for i in range(n_layers))

  out = jax.block_until_ready(dense_block_forward(x, layer_params))
  ref_matched = jax.block_until_ready(
      reference_block(x, layer_params, match_kernel_precision=True))
  ref_f32 = jax.block_until_ready(
      reference_block(x, layer_params, match_kernel_precision=False))

  assert out.shape == (N, in_channels + n_layers * growth_rate, H, W), out.shape
  err_matched = float(jnp.max(jnp.abs(out - ref_matched)))
  err_f32 = float(jnp.max(jnp.abs(out - ref_f32)))
  # Tight check against a reference with identical bf16-operand numerics.
  assert err_matched < 2e-2, f"mismatch vs precision-matched ref: {err_matched}"
  # Loose sanity check vs the pure-f32 module semantics (bounds bf16 noise).
  assert err_f32 < 0.25, f"mismatch vs f32 reference: {err_f32}"
  print("KERNEL_OK")
</pallas_src>

<mosaic_0001>
module attributes {stable_mosaic.version = 11 : i64} {
  func.func @dense_layer_kernel(%arg0: i32, %arg1: memref<1x8x8x16xf32, #tpu.memory_space<vmem>>, %arg2: memref<1x16xf32, #tpu.memory_space<vmem>>, %arg3: memref<1x16xf32, #tpu.memory_space<vmem>>, %arg4: memref<16x32xbf16, #tpu.memory_space<vmem>>, %arg5: memref<1x32xf32, #tpu.memory_space<vmem>>, %arg6: memref<288x8xbf16, #tpu.memory_space<vmem>>, %arg7: memref<9x64x1xf32, #tpu.memory_space<vmem>>, %arg8: memref<1x8x8x24xf32, #tpu.memory_space<vmem>>, %arg9: memref<64x288xbf16, #tpu.memory_space<vmem>>) attributes {dimension_semantics = [#tpu.dimension_semantics<parallel>], iteration_bounds = array<i64: 2>, scalar_prefetch = 0 : i64, scratch_operands = 1 : i64, tpu.core_type = #tpu.core_type<tc>, window_params = [{transform_indices = @transform_0, window_bounds = array<i64: 1, 8, 8, 16>}, {pipeline_mode = #tpu.pipeline_mode<synchronous>, transform_indices = @transform_1, window_bounds = array<i64: 1, 16>}, {pipeline_mode = #tpu.pipeline_mode<synchronous>, transform_indices = @transform_2, window_bounds = array<i64: 1, 16>}, {pipeline_mode = #tpu.pipeline_mode<synchronous>, transform_indices = @transform_3, window_bounds = array<i64: 16, 32>}, {pipeline_mode = #tpu.pipeline_mode<synchronous>, transform_indices = @transform_4, window_bounds = array<i64: 1, 32>}, {pipeline_mode = #tpu.pipeline_mode<synchronous>, transform_indices = @transform_5, window_bounds = array<i64: 288, 8>}, {pipeline_mode = #tpu.pipeline_mode<synchronous>, transform_indices = @transform_6, window_bounds = array<i64: 9, 64, 1>}, {transform_indices = @transform_7, window_bounds = array<i64: 1, 8, 8, 24>}]} {
    %c0 = arith.constant 0 : index
    %c0_0 = arith.constant 0 : index
    %c0_1 = arith.constant 0 : index
    %c0_2 = arith.constant 0 : index
    %0 = vector.load %arg1[%c0, %c0_0, %c0_1, %c0_2] : memref<1x8x8x16xf32, #tpu.memory_space<vmem>>, vector<1x8x8x16xf32>
    %1 = vector.shape_cast %0 : vector<1x8x8x16xf32> to vector<8x8x16xf32>
    %c0_3 = arith.constant 0 : index
    %c0_4 = arith.constant 0 : index
    %c0_5 = arith.constant 0 : index
    %c0_6 = arith.constant 0 : index
    %2 = vector.load %arg8[%c0_3, %c0_4, %c0_5, %c0_6] : memref<1x8x8x24xf32, #tpu.memory_space<vmem>>, vector<1x8x8x16xf32>
    %3 = vector.shape_cast %2 : vector<1x8x8x16xf32> to vector<8x8x16xf32>
    %4 = vector.shape_cast %1 : vector<8x8x16xf32> to vector<1x8x8x16xf32>
    tpu.vector_store %arg8[%c0_3, %c0_4, %c0_5, %c0_6], %4 {strides = array<i32>} : memref<1x8x8x24xf32, #tpu.memory_space<vmem>>, vector<1x8x8x16xf32>,
    %5 = vector.shape_cast %1 : vector<8x8x16xf32> to vector<64x16xf32>
    %c0_7 = arith.constant 0 : index
    %c0_8 = arith.constant 0 : index
    %6 = vector.load %arg2[%c0_7, %c0_8] : memref<1x16xf32, #tpu.memory_space<vmem>>, vector<1x16xf32>
    %7 = vector.broadcast %6 : vector<1x16xf32> to vector<64x16xf32>
    %8 = arith.mulf %5, %7 : vector<64x16xf32>
    %c0_9 = arith.constant 0 : index
    %c0_10 = arith.constant 0 : index
    %9 = vector.load %arg3[%c0_9, %c0_10] : memref<1x16xf32, #tpu.memory_space<vmem>>, vector<1x16xf32>
    %10 = vector.broadcast %9 : vector<1x16xf32> to vector<64x16xf32>
    %11 = arith.addf %8, %10 : vector<64x16xf32>
    %cst = arith.constant 0.000000e+00 : f32
    %12 = vector.broadcast %cst : f32 to vector<64x16xf32>
    %13 = arith.maximumf %11, %12 : vector<64x16xf32>
    %14 = arith.truncf %13 : vector<64x16xf32> to vector<64x16xbf16>
    %c0_11 = arith.constant 0 : index
    %c0_12 = arith.constant 0 : index
    %15 = vector.load %arg4[%c0_11, %c0_12] : memref<16x32xbf16, #tpu.memory_space<vmem>>, vector<16x32xbf16>
    %cst_13 = arith.constant dense<0.000000e+00> : vector<64x32xf32>
    %16 = tpu.matmul %14, %15, %cst_13 {dimension_numbers = #tpu.dot_dimension_numbers<[1], [0], [0], [1], [0, 0, 1, 1], [], []>} : vector<64x16xbf16>, vector<16x32xbf16>, vector<64x32xf32> -> vector<64x32xf32>
    %c0_14 = arith.constant 0 : index
    %c0_15 = arith.constant 0 : index
    %17 = vector.load %arg5[%c0_14, %c0_15] : memref<1x32xf32, #tpu.memory_space<vmem>>, vector<1x32xf32>
    %18 = vector.broadcast %17 : vector<1x32xf32> to vector<64x32xf32>
    %19 = arith.addf %16, %18 : vector<64x32xf32>
    %cst_16 = arith.constant 0.000000e+00 : f32
    %20 = vector.broadcast %cst_16 : f32 to vector<64x32xf32>
    %21 = arith.maximumf %19, %20 : vector<64x32xf32>
    %c9_i32 = arith.constant 9 : i32
    %22 = tpu.dynamic_rotate %21 by %c9_i32 dim 0 : vector<64x32xf32>, i32 -> vector<64x32xf32>
    %c0_17 = arith.constant 0 : index
    %c0_18 = arith.constant 0 : index
    %c0_19 = arith.constant 0 : index
    %23 = vector.load %arg7[%c0_17, %c0_18, %c0_19] : memref<9x64x1xf32, #tpu.memory_space<vmem>>, vector<1x64x1xf32>
    %24 = vector.shape_cast %23 : vector<1x64x1xf32> to vector<64x1xf32>
    %25 = vector.broadcast %24 : vector<64x1xf32> to vector<64x32xf32>
    %26 = arith.mulf %22, %25 : vector<64x32xf32>
    %27 = arith.truncf %26 : vector<64x32xf32> to vector<64x32xbf16>
    %c0_20 = arith.constant 0 : index
    %c0_21 = arith.constant 0 : index
    %28 = vector.load %arg9[%c0_20, %c0_21] : memref<64x288xbf16, #tpu.memory_space<vmem>>, vector<64x32xbf16>
    tpu.vector_store %arg9[%c0_20, %c0_21], %27 {strides = array<i32>} : memref<64x288xbf16, #tpu.memory_space<vmem>>, vector<64x32xbf16>,
    %c8_i32 = arith.constant 8 : i32
    %29 = tpu.dynamic_rotate %21 by %c8_i32 dim 0 : vector<64x32xf32>, i32 -> vector<64x32xf32>
    %c1 = arith.constant 1 : index
    %c0_22 = arith.constant 0 : index
    %c0_23 = arith.constant 0 : index
    %30 = vector.load %arg7[%c1, %c0_22, %c0_23] : memref<9x64x1xf32, #tpu.memory_space<vmem>>, vector<1x64x1xf32>
    %31 = vector.shape_cast %30 : vector<1x64x1xf32> to vector<64x1xf32>
    %32 = vector.broadcast %31 : vector<64x1xf32> to vector<64x32xf32>
    %33 = arith.mulf %29, %32 : vector<64x32xf32>
    %34 = arith.truncf %33 : vector<64x32xf32> to vector<64x32xbf16>
    %c0_24 = arith.constant 0 : index
    %c32 = arith.constant 32 : index
    %35 = vector.load %arg9[%c0_24, %c32] : memref<64x288xbf16, #tpu.memory_space<vmem>>, vector<64x32xbf16>
    tpu.vector_store %arg9[%c0_24, %c32], %34 {strides = array<i32>} : memref<64x288xbf16, #tpu.memory_space<vmem>>, vector<64x32xbf16>,
    %c7_i32 = arith.constant 7 : i32
    %36 = tpu.dynamic_rotate %21 by %c7_i32 dim 0 : vector<64x32xf32>, i32 -> vector<64x32xf32>
    %c2 = arith.constant 2 : index
    %c0_25 = arith.constant 0 : index
    %c0_26 = arith.constant 0 : index
    %37 = vector.load %arg7[%c2, %c0_25, %c0_26] : memref<9x64x1xf32, #tpu.memory_space<vmem>>, vector<1x64x1xf32>
    %38 = vector.shape_cast %37 : vector<1x64x1xf32> to vector<64x1xf32>
    %39 = vector.broadcast %38 : vector<64x1xf32> to vector<64x32xf32>
    %40 = arith.mulf %36, %39 : vector<64x32xf32>
    %41 = arith.truncf %40 : vector<64x32xf32> to vector<64x32xbf16>
    %c0_27 = arith.constant 0 : index
    %c64 = arith.constant 64 : index
    %42 = vector.load %arg9[%c0_27, %c64] : memref<64x288xbf16, #tpu.memory_space<vmem>>, vector<64x32xbf16>
    tpu.vector_store %arg9[%c0_27, %c64], %41 {strides = array<i32>} : memref<64x288xbf16, #tpu.memory_space<vmem>>, vector<64x32xbf16>,
    %c1_i32 = arith.constant 1 : i32
    %43 = tpu.dynamic_rotate %21 by %c1_i32 dim 0 : vector<64x32xf32>, i32 -> vector<64x32xf32>
    %c3 = arith.constant 3 : index
    %c0_28 = arith.constant 0 : index
    %c0_29 = arith.constant 0 : index
    %44 = vector.load %arg7[%c3, %c0_28, %c0_29] : memref<9x64x1xf32, #tpu.memory_space<vmem>>, vector<1x64x1xf32>
    %45 = vector.shape_cast %44 : vector<1x64x1xf32> to vector<64x1xf32>
    %46 = vector.broadcast %45 : vector<64x1xf32> to vector<64x32xf32>
    %47 = arith.mulf %43, %46 : vector<64x32xf32>
    %48 = arith.truncf %47 : vector<64x32xf32> to vector<64x32xbf16>
    %c0_30 = arith.constant 0 : index
    %c96 = arith.constant 96 : index
    %49 = vector.load %arg9[%c0_30, %c96] : memref<64x288xbf16, #tpu.memory_space<vmem>>, vector<64x32xbf16>
    tpu.vector_store %arg9[%c0_30, %c96], %48 {strides = array<i32>} : memref<64x288xbf16, #tpu.memory_space<vmem>>, vector<64x32xbf16>,
    %c4 = arith.constant 4 : index
    %c0_31 = arith.constant 0 : index
    %c0_32 = arith.constant 0 : index
    %50 = vector.load %arg7[%c4, %c0_31, %c0_32] : memref<9x64x1xf32, #tpu.memory_space<vmem>>, vector<1x64x1xf32>
    %51 = vector.shape_cast %50 : vector<1x64x1xf32> to vector<64x1xf32>
    %52 = vector.broadcast %51 : vector<64x1xf32> to vector<64x32xf32>
    %53 = arith.mulf %21, %52 : vector<64x32xf32>
    %54 = arith.truncf %53 : vector<64x32xf32> to vector<64x32xbf16>
    %c0_33 = arith.constant 0 : index
    %c128 = arith.constant 128 : index
    %55 = vector.load %arg9[%c0_33, %c128] : memref<64x288xbf16, #tpu.memory_space<vmem>>, vector<64x32xbf16>
    tpu.vector_store %arg9[%c0_33, %c128], %54 {strides = array<i32>} : memref<64x288xbf16, #tpu.memory_space<vmem>>, vector<64x32xbf16>,
    %c63_i32 = arith.constant 63 : i32
    %56 = tpu.dynamic_rotate %21 by %c63_i32 dim 0 : vector<64x32xf32>, i32 -> vector<64x32xf32>
    %c5 = arith.constant 5 : index
    %c0_34 = arith.constant 0 : index
    %c0_35 = arith.constant 0 : index
    %57 = vector.load %arg7[%c5, %c0_34, %c0_35] : memref<9x64x1xf32, #tpu.memory_space<vmem>>, vector<1x64x1xf32>
    %58 = vector.shape_cast %57 : vector<1x64x1xf32> to vector<64x1xf32>
    %59 = vector.broadcast %58 : vector<64x1xf32> to vector<64x32xf32>
    %60 = arith.mulf %56, %59 : vector<64x32xf32>
    %61 = arith.truncf %60 : vector<64x32xf32> to vector<64x32xbf16>
    %c0_36 = arith.constant 0 : index
    %c160 = arith.constant 160 : index
    %62 = vector.load %arg9[%c0_36, %c160] : memref<64x288xbf16, #tpu.memory_space<vmem>>, vector<64x32xbf16>
    tpu.vector_store %arg9[%c0_36, %c160], %61 {strides = array<i32>} : memref<64x288xbf16, #tpu.memory_space<vmem>>, vector<64x32xbf16>,
    %c57_i32 = arith.constant 57 : i32
    %63 = tpu.dynamic_rotate %21 by %c57_i32 dim 0 : vector<64x32xf32>, i32 -> vector<64x32xf32>
    %c6 = arith.constant 6 : index
    %c0_37 = arith.constant 0 : index
    %c0_38 = arith.constant 0 : index
    %64 = vector.load %arg7[%c6, %c0_37, %c0_38] : memref<9x64x1xf32, #tpu.memory_space<vmem>>, vector<1x64x1xf32>
    %65 = vector.shape_cast %64 : vector<1x64x1xf32> to vector<64x1xf32>
    %66 = vector.broadcast %65 : vector<64x1xf32> to vector<64x32xf32>
    %67 = arith.mulf %63, %66 : vector<64x32xf32>
    %68 = arith.truncf %67 : vector<64x32xf32> to vector<64x32xbf16>
    %c0_39 = arith.constant 0 : index
    %c192 = arith.constant 192 : index
    %69 = vector.load %arg9[%c0_39, %c192] : memref<64x288xbf16, #tpu.memory_space<vmem>>, vector<64x32xbf16>
    tpu.vector_store %arg9[%c0_39, %c192], %68 {strides = array<i32>} : memref<64x288xbf16, #tpu.memory_space<vmem>>, vector<64x32xbf16>,
    %c56_i32 = arith.constant 56 : i32
    %70 = tpu.dynamic_rotate %21 by %c56_i32 dim 0 : vector<64x32xf32>, i32 -> vector<64x32xf32>
    %c7 = arith.constant 7 : index
    %c0_40 = arith.constant 0 : index
    %c0_41 = arith.constant 0 : index
    %71 = vector.load %arg7[%c7, %c0_40, %c0_41] : memref<9x64x1xf32, #tpu.memory_space<vmem>>, vector<1x64x1xf32>
    %72 = vector.shape_cast %71 : vector<1x64x1xf32> to vector<64x1xf32>
    %73 = vector.broadcast %72 : vector<64x1xf32> to vector<64x32xf32>
    %74 = arith.mulf %70, %73 : vector<64x32xf32>
    %75 = arith.truncf %74 : vector<64x32xf32> to vector<64x32xbf16>
    %c0_42 = arith.constant 0 : index
    %c224 = arith.constant 224 : index
    %76 = vector.load %arg9[%c0_42, %c224] : memref<64x288xbf16, #tpu.memory_space<vmem>>, vector<64x32xbf16>
    tpu.vector_store %arg9[%c0_42, %c224], %75 {strides = array<i32>} : memref<64x288xbf16, #tpu.memory_space<vmem>>, vector<64x32xbf16>,
    %c55_i32 = arith.constant 55 : i32
    %77 = tpu.dynamic_rotate %21 by %c55_i32 dim 0 : vector<64x32xf32>, i32 -> vector<64x32xf32>
    %c8 = arith.constant 8 : index
    %c0_43 = arith.constant 0 : index
    %c0_44 = arith.constant 0 : index
    %78 = vector.load %arg7[%c8, %c0_43, %c0_44] : memref<9x64x1xf32, #tpu.memory_space<vmem>>, vector<1x64x1xf32>
    %79 = vector.shape_cast %78 : vector<1x64x1xf32> to vector<64x1xf32>
    %80 = vector.broadcast %79 : vector<64x1xf32> to vector<64x32xf32>
    %81 = arith.mulf %77, %80 : vector<64x32xf32>
    %82 = arith.truncf %81 : vector<64x32xf32> to vector<64x32xbf16>
    %c0_45 = arith.constant 0 : index
    %c256 = arith.constant 256 : index
    %83 = vector.load %arg9[%c0_45, %c256] : memref<64x288xbf16, #tpu.memory_space<vmem>>, vector<64x32xbf16>
    tpu.vector_store %arg9[%c0_45, %c256], %82 {strides = array<i32>} : memref<64x288xbf16, #tpu.memory_space<vmem>>, vector<64x32xbf16>,
    %c0_46 = arith.constant 0 : index
    %c0_47 = arith.constant 0 : index
    %84 = vector.load %arg9[%c0_46, %c0_47] : memref<64x288xbf16, #tpu.memory_space<vmem>>, vector<64x288xbf16>
    %c0_48 = arith.constant 0 : index
    %c0_49 = arith.constant 0 : index
    %85 = vector.load %arg6[%c0_48, %c0_49] : memref<288x8xbf16, #tpu.memory_space<vmem>>, vector<288x8xbf16>
    %cst_50 = arith.constant dense<0.000000e+00> : vector<64x8xf32>
    %86 = tpu.matmul %84, %85, %cst_50 {dimension_numbers = #tpu.dot_dimension_numbers<[1], [0], [0], [1], [0, 0, 1, 1], [], []>} : vector<64x288xbf16>, vector<288x8xbf16>, vector<64x8xf32> -> vector<64x8xf32>
    %87 = vector.shape_cast %86 : vector<64x8xf32> to vector<8x8x8xf32>
    %c0_51 = arith.constant 0 : index
    %c0_52 = arith.constant 0 : index
    %c0_53 = arith.constant 0 : index
    %c16 = arith.constant 16 : index
    %88 = vector.load %arg8[%c0_51, %c0_52, %c0_53, %c16] : memref<1x8x8x24xf32, #tpu.memory_space<vmem>>, vector<1x8x8x8xf32>
    %89 = vector.shape_cast %88 : vector<1x8x8x8xf32> to vector<8x8x8xf32>
    %90 = vector.shape_cast %87 : vector<8x8x8xf32> to vector<1x8x8x8xf32>
    tpu.vector_store %arg8[%c0_51, %c0_52, %c0_53, %c16], %90 {strides = array<i32>} : memref<1x8x8x24xf32, #tpu.memory_space<vmem>>, vector<1x8x8x8xf32>,
    return
  }
  func.func @transform_0(%arg0: i32) -> (i32, i32, i32, i32) {
    %c0_i32 = arith.constant 0 : i32
    %c0_i32_0 = arith.constant 0 : i32
    %c0_i32_1 = arith.constant 0 : i32
    %c0_i32_2 = arith.constant 0 : i32
    return %arg0, %c0_i32, %c0_i32_0, %c0_i32_1 : i32, i32, i32, i32
  }
  func.func @transform_1(%arg0: i32) -> (i32, i32) {
    %c0_i32 = arith.constant 0 : i32
    %c0_i32_0 = arith.constant 0 : i32
    %c0_i32_1 = arith.constant 0 : i32
    return %c0_i32, %c0_i32_0 : i32, i32
  }
  func.func @transform_2(%arg0: i32) -> (i32, i32) {
    %c0_i32 = arith.constant 0 : i32
    %c0_i32_0 = arith.constant 0 : i32
    %c0_i32_1 = arith.constant 0 : i32
    return %c0_i32, %c0_i32_0 : i32, i32
  }
  func.func @transform_3(%arg0: i32) -> (i32, i32) {
    %c0_i32 = arith.constant 0 : i32
    %c0_i32_0 = arith.constant 0 : i32
    %c0_i32_1 = arith.constant 0 : i32
    return %c0_i32, %c0_i32_0 : i32, i32
  }
  func.func @transform_4(%arg0: i32) -> (i32, i32) {
    %c0_i32 = arith.constant 0 : i32
    %c0_i32_0 = arith.constant 0 : i32
    %c0_i32_1 = arith.constant 0 : i32
    return %c0_i32, %c0_i32_0 : i32, i32
  }
  func.func @transform_5(%arg0: i32) -> (i32, i32) {
    %c0_i32 = arith.constant 0 : i32
    %c0_i32_0 = arith.constant 0 : i32
    %c0_i32_1 = arith.constant 0 : i32
    return %c0_i32, %c0_i32_0 : i32, i32
  }
  func.func @transform_6(%arg0: i32) -> (i32, i32, i32) {
    %c0_i32 = arith.constant 0 : i32
    %c0_i32_0 = arith.constant 0 : i32
    %c0_i32_1 = arith.constant 0 : i32
    %c0_i32_2 = arith.constant 0 : i32
    return %c0_i32, %c0_i32_0, %c0_i32_1 : i32, i32, i32
  }
  func.func @transform_7(%arg0: i32) -> (i32, i32, i32, i32) {
    %c0_i32 = arith.constant 0 : i32
    %c0_i32_0 = arith.constant 0 : i32
    %c0_i32_1 = arith.constant 0 : i32
    %c0_i32_2 = arith.constant 0 : i32
    return %arg0, %c0_i32, %c0_i32_0, %c0_i32_1 : i32, i32, i32, i32
  }
}

module attributes {stable_mosaic.version = 11 : i64} {
  func.func @dense_layer_kernel(%arg0: i32, %arg1: memref<1x8x8x24xf32, #tpu.memory_space<vmem>>, %arg2: memref<1x24xf32, #tpu.memory_space<vmem>>, %arg3: memref<1x24xf32, #tpu.memory_space<vmem>>, %arg4: memref<24x32xbf16, #tpu.memory_space<vmem>>, %arg5: memref<1x32xf32, #tpu.memory_space<vmem>>, %arg6: memref<288x8xbf16, #tpu.memory_space<vmem>>, %arg7: memref<9x64x1xf32, #tpu.memory_space<vmem>>, %arg8: memref<1x8x8x32xf32, #tpu.memory_space<vmem>>, %arg9: memref<64x288xbf16, #tpu.memory_space<vmem>>) attributes {dimension_semantics = [#tpu.dimension_semantics<parallel>], iteration_bounds = array<i64: 2>, scalar_prefetch = 0 : i64, scratch_operands = 1 : i64, tpu.core_type = #tpu.core_type<tc>, window_params = [{transform_indices = @transform_0, window_bounds = array<i64: 1, 8, 8, 24>}, {pipeline_mode = #tpu.pipeline_mode<synchronous>, transform_indices = @transform_1, window_bounds = array<i64: 1, 24>}, {pipeline_mode = #tpu.pipeline_mode<synchronous>, transform_indices = @transform_2, window_bounds = array<i64: 1, 24>}, {pipeline_mode = #tpu.pipeline_mode<synchronous>, transform_indices = @transform_3, window_bounds = array<i64: 24, 32>}, {pipeline_mode = #tpu.pipeline_mode<synchronous>, transform_indices = @transform_4, window_bounds = array<i64: 1, 32>}, {pipeline_mode = #tpu.pipeline_mode<synchronous>, transform_indices = @transform_5, window_bounds = array<i64: 288, 8>}, {pipeline_mode = #tpu.pipeline_mode<synchronous>, transform_indices = @transform_6, window_bounds = array<i64: 9, 64, 1>}, {transform_indices = @transform_7, window_bounds = array<i64: 1, 8, 8, 32>}]} {
    %c0 = arith.constant 0 : index
    %c0_0 = arith.constant 0 : index
    %c0_1 = arith.constant 0 : index
    %c0_2 = arith.constant 0 : index
    %0 = vector.load %arg1[%c0, %c0_0, %c0_1, %c0_2] : memref<1x8x8x24xf32, #tpu.memory_space<vmem>>, vector<1x8x8x24xf32>
    %1 = vector.shape_cast %0 : vector<1x8x8x24xf32> to vector<8x8x24xf32>
    %c0_3 = arith.constant 0 : index
    %c0_4 = arith.constant 0 : index
    %c0_5 = arith.constant 0 : index
    %c0_6 = arith.constant 0 : index
    %2 = vector.load %arg8[%c0_3, %c0_4, %c0_5, %c0_6] : memref<1x8x8x32xf32, #tpu.memory_space<vmem>>, vector<1x8x8x24xf32>
    %3 = vector.shape_cast %2 : vector<1x8x8x24xf32> to vector<8x8x24xf32>
    %4 = vector.shape_cast %1 : vector<8x8x24xf32> to vector<1x8x8x24xf32>
    tpu.vector_store %arg8[%c0_3, %c0_4, %c0_5, %c0_6], %4 {strides = array<i32>} : memref<1x8x8x32xf32, #tpu.memory_space<vmem>>, vector<1x8x8x24xf32>,
    %5 = vector.shape_cast %1 : vector<8x8x24xf32> to vector<64x24xf32>
    %c0_7 = arith.constant 0 : index
    %c0_8 = arith.constant 0 : index
    %6 = vector.load %arg2[%c0_7, %c0_8] : memref<1x24xf32, #tpu.memory_space<vmem>>, vector<1x24xf32>
    %7 = vector.broadcast %6 : vector<1x24xf32> to vector<64x24xf32>
    %8 = arith.mulf %5, %7 : vector<64x24xf32>
    %c0_9 = arith.constant 0 : index
    %c0_10 = arith.constant 0 : index
    %9 = vector.load %arg3[%c0_9, %c0_10] : memref<1x24xf32, #tpu.memory_space<vmem>>, vector<1x24xf32>
    %10 = vector.broadcast %9 : vector<1x24xf32> to vector<64x24xf32>
    %11 = arith.addf %8, %10 : vector<64x24xf32>
    %cst = arith.constant 0.000000e+00 : f32
    %12 = vector.broadcast %cst : f32 to vector<64x24xf32>
    %13 = arith.maximumf %11, %12 : vector<64x24xf32>
    %14 = arith.truncf %13 : vector<64x24xf32> to vector<64x24xbf16>
    %c0_11 = arith.constant 0 : index
    %c0_12 = arith.constant 0 : index
    %15 = vector.load %arg4[%c0_11, %c0_12] : memref<24x32xbf16, #tpu.memory_space<vmem>>, vector<24x32xbf16>
    %cst_13 = arith.constant dense<0.000000e+00> : vector<64x32xf32>
    %16 = tpu.matmul %14, %15, %cst_13 {dimension_numbers = #tpu.dot_dimension_numbers<[1], [0], [0], [1], [0, 0, 1, 1], [], []>} : vector<64x24xbf16>, vector<24x32xbf16>, vector<64x32xf32> -> vector<64x32xf32>
    %c0_14 = arith.constant 0 : index
    %c0_15 = arith.constant 0 : index
    %17 = vector.load %arg5[%c0_14, %c0_15] : memref<1x32xf32, #tpu.memory_space<vmem>>, vector<1x32xf32>
    %18 = vector.broadcast %17 : vector<1x32xf32> to vector<64x32xf32>
    %19 = arith.addf %16, %18 : vector<64x32xf32>
    %cst_16 = arith.constant 0.000000e+00 : f32
    %20 = vector.broadcast %cst_16 : f32 to vector<64x32xf32>
    %21 = arith.maximumf %19, %20 : vector<64x32xf32>
    %c9_i32 = arith.constant 9 : i32
    %22 = tpu.dynamic_rotate %21 by %c9_i32 dim 0 : vector<64x32xf32>, i32 -> vector<64x32xf32>
    %c0_17 = arith.constant 0 : index
    %c0_18 = arith.constant 0 : index
    %c0_19 = arith.constant 0 : index
    %23 = vector.load %arg7[%c0_17, %c0_18, %c0_19] : memref<9x64x1xf32, #tpu.memory_space<vmem>>, vector<1x64x1xf32>
    %24 = vector.shape_cast %23 : vector<1x64x1xf32> to vector<64x1xf32>
    %25 = vector.broadcast %24 : vector<64x1xf32> to vector<64x32xf32>
    %26 = arith.mulf %22, %25 : vector<64x32xf32>
    %27 = arith.truncf %26 : vector<64x32xf32> to vector<64x32xbf16>
    %c0_20 = arith.constant 0 : index
    %c0_21 = arith.constant 0 : index
    %28 = vector.load %arg9[%c0_20, %c0_21] : memref<64x288xbf16, #tpu.memory_space<vmem>>, vector<64x32xbf16>
    tpu.vector_store %arg9[%c0_20, %c0_21], %27 {strides = array<i32>} : memref<64x288xbf16, #tpu.memory_space<vmem>>, vector<64x32xbf16>,
    %c8_i32 = arith.constant 8 : i32
    %29 = tpu.dynamic_rotate %21 by %c8_i32 dim 0 : vector<64x32xf32>, i32 -> vector<64x32xf32>
    %c1 = arith.constant 1 : index
    %c0_22 = arith.constant 0 : index
    %c0_23 = arith.constant 0 : index
    %30 = vector.load %arg7[%c1, %c0_22, %c0_23] : memref<9x64x1xf32, #tpu.memory_space<vmem>>, vector<1x64x1xf32>
    %31 = vector.shape_cast %30 : vector<1x64x1xf32> to vector<64x1xf32>
    %32 = vector.broadcast %31 : vector<64x1xf32> to vector<64x32xf32>
    %33 = arith.mulf %29, %32 : vector<64x32xf32>
    %34 = arith.truncf %33 : vector<64x32xf32> to vector<64x32xbf16>
    %c0_24 = arith.constant 0 : index
    %c32 = arith.constant 32 : index
    %35 = vector.load %arg9[%c0_24, %c32] : memref<64x288xbf16, #tpu.memory_space<vmem>>, vector<64x32xbf16>
    tpu.vector_store %arg9[%c0_24, %c32], %34 {strides = array<i32>} : memref<64x288xbf16, #tpu.memory_space<vmem>>, vector<64x32xbf16>,
    %c7_i32 = arith.constant 7 : i32
    %36 = tpu.dynamic_rotate %21 by %c7_i32 dim 0 : vector<64x32xf32>, i32 -> vector<64x32xf32>
    %c2 = arith.constant 2 : index
    %c0_25 = arith.constant 0 : index
    %c0_26 = arith.constant 0 : index
    %37 = vector.load %arg7[%c2, %c0_25, %c0_26] : memref<9x64x1xf32, #tpu.memory_space<vmem>>, vector<1x64x1xf32>
    %38 = vector.shape_cast %37 : vector<1x64x1xf32> to vector<64x1xf32>
    %39 = vector.broadcast %38 : vector<64x1xf32> to vector<64x32xf32>
    %40 = arith.mulf %36, %39 : vector<64x32xf32>
    %41 = arith.truncf %40 : vector<64x32xf32> to vector<64x32xbf16>
    %c0_27 = arith.constant 0 : index
    %c64 = arith.constant 64 : index
    %42 = vector.load %arg9[%c0_27, %c64] : memref<64x288xbf16, #tpu.memory_space<vmem>>, vector<64x32xbf16>
    tpu.vector_store %arg9[%c0_27, %c64], %41 {strides = array<i32>} : memref<64x288xbf16, #tpu.memory_space<vmem>>, vector<64x32xbf16>,
    %c1_i32 = arith.constant 1 : i32
    %43 = tpu.dynamic_rotate %21 by %c1_i32 dim 0 : vector<64x32xf32>, i32 -> vector<64x32xf32>
    %c3 = arith.constant 3 : index
    %c0_28 = arith.constant 0 : index
    %c0_29 = arith.constant 0 : index
    %44 = vector.load %arg7[%c3, %c0_28, %c0_29] : memref<9x64x1xf32, #tpu.memory_space<vmem>>, vector<1x64x1xf32>
    %45 = vector.shape_cast %44 : vector<1x64x1xf32> to vector<64x1xf32>
    %46 = vector.broadcast %45 : vector<64x1xf32> to vector<64x32xf32>
    %47 = arith.mulf %43, %46 : vector<64x32xf32>
    %48 = arith.truncf %47 : vector<64x32xf32> to vector<64x32xbf16>
    %c0_30 = arith.constant 0 : index
    %c96 = arith.constant 96 : index
    %49 = vector.load %arg9[%c0_30, %c96] : memref<64x288xbf16, #tpu.memory_space<vmem>>, vector<64x32xbf16>
    tpu.vector_store %arg9[%c0_30, %c96], %48 {strides = array<i32>} : memref<64x288xbf16, #tpu.memory_space<vmem>>, vector<64x32xbf16>,
    %c4 = arith.constant 4 : index
    %c0_31 = arith.constant 0 : index
    %c0_32 = arith.constant 0 : index
    %50 = vector.load %arg7[%c4, %c0_31, %c0_32] : memref<9x64x1xf32, #tpu.memory_space<vmem>>, vector<1x64x1xf32>
    %51 = vector.shape_cast %50 : vector<1x64x1xf32> to vector<64x1xf32>
    %52 = vector.broadcast %51 : vector<64x1xf32> to vector<64x32xf32>
    %53 = arith.mulf %21, %52 : vector<64x32xf32>
    %54 = arith.truncf %53 : vector<64x32xf32> to vector<64x32xbf16>
    %c0_33 = arith.constant 0 : index
    %c128 = arith.constant 128 : index
    %55 = vector.load %arg9[%c0_33, %c128] : memref<64x288xbf16, #tpu.memory_space<vmem>>, vector<64x32xbf16>
    tpu.vector_store %arg9[%c0_33, %c128], %54 {strides = array<i32>} : memref<64x288xbf16, #tpu.memory_space<vmem>>, vector<64x32xbf16>,
    %c63_i32 = arith.constant 63 : i32
    %56 = tpu.dynamic_rotate %21 by %c63_i32 dim 0 : vector<64x32xf32>, i32 -> vector<64x32xf32>
    %c5 = arith.constant 5 : index
    %c0_34 = arith.constant 0 : index
    %c0_35 = arith.constant 0 : index
    %57 = vector.load %arg7[%c5, %c0_34, %c0_35] : memref<9x64x1xf32, #tpu.memory_space<vmem>>, vector<1x64x1xf32>
    %58 = vector.shape_cast %57 : vector<1x64x1xf32> to vector<64x1xf32>
    %59 = vector.broadcast %58 : vector<64x1xf32> to vector<64x32xf32>
    %60 = arith.mulf %56, %59 : vector<64x32xf32>
    %61 = arith.truncf %60 : vector<64x32xf32> to vector<64x32xbf16>
    %c0_36 = arith.constant 0 : index
    %c160 = arith.constant 160 : index
    %62 = vector.load %arg9[%c0_36, %c160] : memref<64x288xbf16, #tpu.memory_space<vmem>>, vector<64x32xbf16>
    tpu.vector_store %arg9[%c0_36, %c160], %61 {strides = array<i32>} : memref<64x288xbf16, #tpu.memory_space<vmem>>, vector<64x32xbf16>,
    %c57_i32 = arith.constant 57 : i32
    %63 = tpu.dynamic_rotate %21 by %c57_i32 dim 0 : vector<64x32xf32>, i32 -> vector<64x32xf32>
    %c6 = arith.constant 6 : index
    %c0_37 = arith.constant 0 : index
    %c0_38 = arith.constant 0 : index
    %64 = vector.load %arg7[%c6, %c0_37, %c0_38] : memref<9x64x1xf32, #tpu.memory_space<vmem>>, vector<1x64x1xf32>
    %65 = vector.shape_cast %64 : vector<1x64x1xf32> to vector<64x1xf32>
    %66 = vector.broadcast %65 : vector<64x1xf32> to vector<64x32xf32>
    %67 = arith.mulf %63, %66 : vector<64x32xf32>
    %68 = arith.truncf %67 : vector<64x32xf32> to vector<64x32xbf16>
    %c0_39 = arith.constant 0 : index
    %c192 = arith.constant 192 : index
    %69 = vector.load %arg9[%c0_39, %c192] : memref<64x288xbf16, #tpu.memory_space<vmem>>, vector<64x32xbf16>
    tpu.vector_store %arg9[%c0_39, %c192], %68 {strides = array<i32>} : memref<64x288xbf16, #tpu.memory_space<vmem>>, vector<64x32xbf16>,
    %c56_i32 = arith.constant 56 : i32
    %70 = tpu.dynamic_rotate %21 by %c56_i32 dim 0 : vector<64x32xf32>, i32 -> vector<64x32xf32>
    %c7 = arith.constant 7 : index
    %c0_40 = arith.constant 0 : index
    %c0_41 = arith.constant 0 : index
    %71 = vector.load %arg7[%c7, %c0_40, %c0_41] : memref<9x64x1xf32, #tpu.memory_space<vmem>>, vector<1x64x1xf32>
    %72 = vector.shape_cast %71 : vector<1x64x1xf32> to vector<64x1xf32>
    %73 = vector.broadcast %72 : vector<64x1xf32> to vector<64x32xf32>
    %74 = arith.mulf %70, %73 : vector<64x32xf32>
    %75 = arith.truncf %74 : vector<64x32xf32> to vector<64x32xbf16>
    %c0_42 = arith.constant 0 : index
    %c224 = arith.constant 224 : index
    %76 = vector.load %arg9[%c0_42, %c224] : memref<64x288xbf16, #tpu.memory_space<vmem>>, vector<64x32xbf16>
    tpu.vector_store %arg9[%c0_42, %c224], %75 {strides = array<i32>} : memref<64x288xbf16, #tpu.memory_space<vmem>>, vector<64x32xbf16>,
    %c55_i32 = arith.constant 55 : i32
    %77 = tpu.dynamic_rotate %21 by %c55_i32 dim 0 : vector<64x32xf32>, i32 -> vector<64x32xf32>
    %c8 = arith.constant 8 : index
    %c0_43 = arith.constant 0 : index
    %c0_44 = arith.constant 0 : index
    %78 = vector.load %arg7[%c8, %c0_43, %c0_44] : memref<9x64x1xf32, #tpu.memory_space<vmem>>, vector<1x64x1xf32>
    %79 = vector.shape_cast %78 : vector<1x64x1xf32> to vector<64x1xf32>
    %80 = vector.broadcast %79 : vector<64x1xf32> to vector<64x32xf32>
    %81 = arith.mulf %77, %80 : vector<64x32xf32>
    %82 = arith.truncf %81 : vector<64x32xf32> to vector<64x32xbf16>
    %c0_45 = arith.constant 0 : index
    %c256 = arith.constant 256 : index
    %83 = vector.load %arg9[%c0_45, %c256] : memref<64x288xbf16, #tpu.memory_space<vmem>>, vector<64x32xbf16>
    tpu.vector_store %arg9[%c0_45, %c256], %82 {strides = array<i32>} : memref<64x288xbf16, #tpu.memory_space<vmem>>, vector<64x32xbf16>,
    %c0_46 = arith.constant 0 : index
    %c0_47 = arith.constant 0 : index
    %84 = vector.load %arg9[%c0_46, %c0_47] : memref<64x288xbf16, #tpu.memory_space<vmem>>, vector<64x288xbf16>
    %c0_48 = arith.constant 0 : index
    %c0_49 = arith.constant 0 : index
    %85 = vector.load %arg6[%c0_48, %c0_49] : memref<288x8xbf16, #tpu.memory_space<vmem>>, vector<288x8xbf16>
    %cst_50 = arith.constant dense<0.000000e+00> : vector<64x8xf32>
    %86 = tpu.matmul %84, %85, %cst_50 {dimension_numbers = #tpu.dot_dimension_numbers<[1], [0], [0], [1], [0, 0, 1, 1], [], []>} : vector<64x288xbf16>, vector<288x8xbf16>, vector<64x8xf32> -> vector<64x8xf32>
    %87 = vector.shape_cast %86 : vector<64x8xf32> to vector<8x8x8xf32>
    %c0_51 = arith.constant 0 : index
    %c0_52 = arith.constant 0 : index
    %c0_53 = arith.constant 0 : index
    %c24 = arith.constant 24 : index
    %88 = vector.load %arg8[%c0_51, %c0_52, %c0_53, %c24] : memref<1x8x8x32xf32, #tpu.memory_space<vmem>>, vector<1x8x8x8xf32>
    %89 = vector.shape_cast %88 : vector<1x8x8x8xf32> to vector<8x8x8xf32>
    %90 = vector.shape_cast %87 : vector<8x8x8xf32> to vector<1x8x8x8xf32>
    tpu.vector_store %arg8[%c0_51, %c0_52, %c0_53, %c24], %90 {strides = array<i32>} : memref<1x8x8x32xf32, #tpu.memory_space<vmem>>, vector<1x8x8x8xf32>,
    return
  }
  func.func @transform_0(%arg0: i32) -> (i32, i32, i32, i32) {
    %c0_i32 = arith.constant 0 : i32
    %c0_i32_0 = arith.constant 0 : i32
    %c0_i32_1 = arith.constant 0 : i32
    %c0_i32_2 = arith.constant 0 : i32
    return %arg0, %c0_i32, %c0_i32_0, %c0_i32_1 : i32, i32, i32, i32
  }
  func.func @transform_1(%arg0: i32) -> (i32, i32) {
    %c0_i32 = arith.constant 0 : i32
    %c0_i32_0 = arith.constant 0 : i32
    %c0_i32_1 = arith.constant 0 : i32
    return %c0_i32, %c0_i32_0 : i32, i32
  }
  func.func @transform_2(%arg0: i32) -> (i32, i32) {
    %c0_i32 = arith.constant 0 : i32
    %c0_i32_0 = arith.constant 0 : i32
    %c0_i32_1 = arith.constant 0 : i32
    return %c0_i32, %c0_i32_0 : i32, i32
  }
  func.func @transform_3(%arg0: i32) -> (i32, i32) {
    %c0_i32 = arith.constant 0 : i32
    %c0_i32_0 = arith.constant 0 : i32
    %c0_i32_1 = arith.constant 0 : i32
    return %c0_i32, %c0_i32_0 : i32, i32
  }
  func.func @transform_4(%arg0: i32) -> (i32, i32) {
    %c0_i32 = arith.constant 0 : i32
    %c0_i32_0 = arith.constant 0 : i32
    %c0_i32_1 = arith.constant 0 : i32
    return %c0_i32, %c0_i32_0 : i32, i32
  }
  func.func @transform_5(%arg0: i32) -> (i32, i32) {
    %c0_i32 = arith.constant 0 : i32
    %c0_i32_0 = arith.constant 0 : i32
    %c0_i32_1 = arith.constant 0 : i32
    return %c0_i32, %c0_i32_0 : i32, i32
  }
  func.func @transform_6(%arg0: i32) -> (i32, i32, i32) {
    %c0_i32 = arith.constant 0 : i32
    %c0_i32_0 = arith.constant 0 : i32
    %c0_i32_1 = arith.constant 0 : i32
    %c0_i32_2 = arith.constant 0 : i32
    return %c0_i32, %c0_i32_0, %c0_i32_1 : i32, i32, i32
  }
  func.func @transform_7(%arg0: i32) -> (i32, i32, i32, i32) {
    %c0_i32 = arith.constant 0 : i32
    %c0_i32_0 = arith.constant 0 : i32
    %c0_i32_1 = arith.constant 0 : i32
    %c0_i32_2 = arith.constant 0 : i32
    return %arg0, %c0_i32, %c0_i32_0, %c0_i32_1 : i32, i32, i32, i32
  }
}

module attributes {stable_mosaic.version = 11 : i64} {
  func.func @dense_layer_kernel(%arg0: i32, %arg1: memref<1x8x8x32xf32, #tpu.memory_space<vmem>>, %arg2: memref<1x32xf32, #tpu.memory_space<vmem>>, %arg3: memref<1x32xf32, #tpu.memory_space<vmem>>, %arg4: memref<32x32xbf16, #tpu.memory_space<vmem>>, %arg5: memref<1x32xf32, #tpu.memory_space<vmem>>, %arg6: memref<288x8xbf16, #tpu.memory_space<vmem>>, %arg7: memref<9x64x1xf32, #tpu.memory_space<vmem>>, %arg8: memref<1x8x8x40xf32, #tpu.memory_space<vmem>>, %arg9: memref<64x288xbf16, #tpu.memory_space<vmem>>) attributes {dimension_semantics = [#tpu.dimension_semantics<parallel>], iteration_bounds = array<i64: 2>, scalar_prefetch = 0 : i64, scratch_operands = 1 : i64, tpu.core_type = #tpu.core_type<tc>, window_params = [{transform_indices = @transform_0, window_bounds = array<i64: 1, 8, 8, 32>}, {pipeline_mode = #tpu.pipeline_mode<synchronous>, transform_indices = @transform_1, window_bounds = array<i64: 1, 32>}, {pipeline_mode = #tpu.pipeline_mode<synchronous>, transform_indices = @transform_2, window_bounds = array<i64: 1, 32>}, {pipeline_mode = #tpu.pipeline_mode<synchronous>, transform_indices = @transform_3, window_bounds = array<i64: 32, 32>}, {pipeline_mode = #tpu.pipeline_mode<synchronous>, transform_indices = @transform_4, window_bounds = array<i64: 1, 32>}, {pipeline_mode = #tpu.pipeline_mode<synchronous>, transform_indices = @transform_5, window_bounds = array<i64: 288, 8>}, {pipeline_mode = #tpu.pipeline_mode<synchronous>, transform_indices = @transform_6, window_bounds = array<i64: 9, 64, 1>}, {transform_indices = @transform_7, window_bounds = array<i64: 1, 8, 8, 40>}]} {
    %c0 = arith.constant 0 : index
    %c0_0 = arith.constant 0 : index
    %c0_1 = arith.constant 0 : index
    %c0_2 = arith.constant 0 : index
    %0 = vector.load %arg1[%c0, %c0_0, %c0_1, %c0_2] : memref<1x8x8x32xf32, #tpu.memory_space<vmem>>, vector<1x8x8x32xf32>
    %1 = vector.shape_cast %0 : vector<1x8x8x32xf32> to vector<8x8x32xf32>
    %c0_3 = arith.constant 0 : index
    %c0_4 = arith.constant 0 : index
    %c0_5 = arith.constant 0 : index
    %c0_6 = arith.constant 0 : index
    %2 = vector.load %arg8[%c0_3, %c0_4, %c0_5, %c0_6] : memref<1x8x8x40xf32, #tpu.memory_space<vmem>>, vector<1x8x8x32xf32>
    %3 = vector.shape_cast %2 : vector<1x8x8x32xf32> to vector<8x8x32xf32>
    %4 = vector.shape_cast %1 : vector<8x8x32xf32> to vector<1x8x8x32xf32>
    tpu.vector_store %arg8[%c0_3, %c0_4, %c0_5, %c0_6], %4 {strides = array<i32>} : memref<1x8x8x40xf32, #tpu.memory_space<vmem>>, vector<1x8x8x32xf32>,
    %5 = vector.shape_cast %1 : vector<8x8x32xf32> to vector<64x32xf32>
    %c0_7 = arith.constant 0 : index
    %c0_8 = arith.constant 0 : index
    %6 = vector.load %arg2[%c0_7, %c0_8] : memref<1x32xf32, #tpu.memory_space<vmem>>, vector<1x32xf32>
    %7 = vector.broadcast %6 : vector<1x32xf32> to vector<64x32xf32>
    %8 = arith.mulf %5, %7 : vector<64x32xf32>
    %c0_9 = arith.constant 0 : index
    %c0_10 = arith.constant 0 : index
    %9 = vector.load %arg3[%c0_9, %c0_10] : memref<1x32xf32, #tpu.memory_space<vmem>>, vector<1x32xf32>
    %10 = vector.broadcast %9 : vector<1x32xf32> to vector<64x32xf32>
    %11 = arith.addf %8, %10 : vector<64x32xf32>
    %cst = arith.constant 0.000000e+00 : f32
    %12 = vector.broadcast %cst : f32 to vector<64x32xf32>
    %13 = arith.maximumf %11, %12 : vector<64x32xf32>
    %14 = arith.truncf %13 : vector<64x32xf32> to vector<64x32xbf16>
    %c0_11 = arith.constant 0 : index
    %c0_12 = arith.constant 0 : index
    %15 = vector.load %arg4[%c0_11, %c0_12] : memref<32x32xbf16, #tpu.memory_space<vmem>>, vector<32x32xbf16>
    %cst_13 = arith.constant dense<0.000000e+00> : vector<64x32xf32>
    %16 = tpu.matmul %14, %15, %cst_13 {dimension_numbers = #tpu.dot_dimension_numbers<[1], [0], [0], [1], [0, 0, 1, 1], [], []>} : vector<64x32xbf16>, vector<32x32xbf16>, vector<64x32xf32> -> vector<64x32xf32>
    %c0_14 = arith.constant 0 : index
    %c0_15 = arith.constant 0 : index
    %17 = vector.load %arg5[%c0_14, %c0_15] : memref<1x32xf32, #tpu.memory_space<vmem>>, vector<1x32xf32>
    %18 = vector.broadcast %17 : vector<1x32xf32> to vector<64x32xf32>
    %19 = arith.addf %16, %18 : vector<64x32xf32>
    %cst_16 = arith.constant 0.000000e+00 : f32
    %20 = vector.broadcast %cst_16 : f32 to vector<64x32xf32>
    %21 = arith.maximumf %19, %20 : vector<64x32xf32>
    %c9_i32 = arith.constant 9 : i32
    %22 = tpu.dynamic_rotate %21 by %c9_i32 dim 0 : vector<64x32xf32>, i32 -> vector<64x32xf32>
    %c0_17 = arith.constant 0 : index
    %c0_18 = arith.constant 0 : index
    %c0_19 = arith.constant 0 : index
    %23 = vector.load %arg7[%c0_17, %c0_18, %c0_19] : memref<9x64x1xf32, #tpu.memory_space<vmem>>, vector<1x64x1xf32>
    %24 = vector.shape_cast %23 : vector<1x64x1xf32> to vector<64x1xf32>
    %25 = vector.broadcast %24 : vector<64x1xf32> to vector<64x32xf32>
    %26 = arith.mulf %22, %25 : vector<64x32xf32>
    %27 = arith.truncf %26 : vector<64x32xf32> to vector<64x32xbf16>
    %c0_20 = arith.constant 0 : index
    %c0_21 = arith.constant 0 : index
    %28 = vector.load %arg9[%c0_20, %c0_21] : memref<64x288xbf16, #tpu.memory_space<vmem>>, vector<64x32xbf16>
    tpu.vector_store %arg9[%c0_20, %c0_21], %27 {strides = array<i32>} : memref<64x288xbf16, #tpu.memory_space<vmem>>, vector<64x32xbf16>,
    %c8_i32 = arith.constant 8 : i32
    %29 = tpu.dynamic_rotate %21 by %c8_i32 dim 0 : vector<64x32xf32>, i32 -> vector<64x32xf32>
    %c1 = arith.constant 1 : index
    %c0_22 = arith.constant 0 : index
    %c0_23 = arith.constant 0 : index
    %30 = vector.load %arg7[%c1, %c0_22, %c0_23] : memref<9x64x1xf32, #tpu.memory_space<vmem>>, vector<1x64x1xf32>
    %31 = vector.shape_cast %30 : vector<1x64x1xf32> to vector<64x1xf32>
    %32 = vector.broadcast %31 : vector<64x1xf32> to vector<64x32xf32>
    %33 = arith.mulf %29, %32 : vector<64x32xf32>
    %34 = arith.truncf %33 : vector<64x32xf32> to vector<64x32xbf16>
    %c0_24 = arith.constant 0 : index
    %c32 = arith.constant 32 : index
    %35 = vector.load %arg9[%c0_24, %c32] : memref<64x288xbf16, #tpu.memory_space<vmem>>, vector<64x32xbf16>
    tpu.vector_store %arg9[%c0_24, %c32], %34 {strides = array<i32>} : memref<64x288xbf16, #tpu.memory_space<vmem>>, vector<64x32xbf16>,
    %c7_i32 = arith.constant 7 : i32
    %36 = tpu.dynamic_rotate %21 by %c7_i32 dim 0 : vector<64x32xf32>, i32 -> vector<64x32xf32>
    %c2 = arith.constant 2 : index
    %c0_25 = arith.constant 0 : index
    %c0_26 = arith.constant 0 : index
    %37 = vector.load %arg7[%c2, %c0_25, %c0_26] : memref<9x64x1xf32, #tpu.memory_space<vmem>>, vector<1x64x1xf32>
    %38 = vector.shape_cast %37 : vector<1x64x1xf32> to vector<64x1xf32>
    %39 = vector.broadcast %38 : vector<64x1xf32> to vector<64x32xf32>
    %40 = arith.mulf %36, %39 : vector<64x32xf32>
    %41 = arith.truncf %40 : vector<64x32xf32> to vector<64x32xbf16>
    %c0_27 = arith.constant 0 : index
    %c64 = arith.constant 64 : index
    %42 = vector.load %arg9[%c0_27, %c64] : memref<64x288xbf16, #tpu.memory_space<vmem>>, vector<64x32xbf16>
    tpu.vector_store %arg9[%c0_27, %c64], %41 {strides = array<i32>} : memref<64x288xbf16, #tpu.memory_space<vmem>>, vector<64x32xbf16>,
    %c1_i32 = arith.constant 1 : i32
    %43 = tpu.dynamic_rotate %21 by %c1_i32 dim 0 : vector<64x32xf32>, i32 -> vector<64x32xf32>
    %c3 = arith.constant 3 : index
    %c0_28 = arith.constant 0 : index
    %c0_29 = arith.constant 0 : index
    %44 = vector.load %arg7[%c3, %c0_28, %c0_29] : memref<9x64x1xf32, #tpu.memory_space<vmem>>, vector<1x64x1xf32>
    %45 = vector.shape_cast %44 : vector<1x64x1xf32> to vector<64x1xf32>
    %46 = vector.broadcast %45 : vector<64x1xf32> to vector<64x32xf32>
    %47 = arith.mulf %43, %46 : vector<64x32xf32>
    %48 = arith.truncf %47 : vector<64x32xf32> to vector<64x32xbf16>
    %c0_30 = arith.constant 0 : index
    %c96 = arith.constant 96 : index
    %49 = vector.load %arg9[%c0_30, %c96] : memref<64x288xbf16, #tpu.memory_space<vmem>>, vector<64x32xbf16>
    tpu.vector_store %arg9[%c0_30, %c96], %48 {strides = array<i32>} : memref<64x288xbf16, #tpu.memory_space<vmem>>, vector<64x32xbf16>,
    %c4 = arith.constant 4 : index
    %c0_31 = arith.constant 0 : index
    %c0_32 = arith.constant 0 : index
    %50 = vector.load %arg7[%c4, %c0_31, %c0_32] : memref<9x64x1xf32, #tpu.memory_space<vmem>>, vector<1x64x1xf32>
    %51 = vector.shape_cast %50 : vector<1x64x1xf32> to vector<64x1xf32>
    %52 = vector.broadcast %51 : vector<64x1xf32> to vector<64x32xf32>
    %53 = arith.mulf %21, %52 : vector<64x32xf32>
    %54 = arith.truncf %53 : vector<64x32xf32> to vector<64x32xbf16>
    %c0_33 = arith.constant 0 : index
    %c128 = arith.constant 128 : index
    %55 = vector.load %arg9[%c0_33, %c128] : memref<64x288xbf16, #tpu.memory_space<vmem>>, vector<64x32xbf16>
    tpu.vector_store %arg9[%c0_33, %c128], %54 {strides = array<i32>} : memref<64x288xbf16, #tpu.memory_space<vmem>>, vector<64x32xbf16>,
    %c63_i32 = arith.constant 63 : i32
    %56 = tpu.dynamic_rotate %21 by %c63_i32 dim 0 : vector<64x32xf32>, i32 -> vector<64x32xf32>
    %c5 = arith.constant 5 : index
    %c0_34 = arith.constant 0 : index
    %c0_35 = arith.constant 0 : index
    %57 = vector.load %arg7[%c5, %c0_34, %c0_35] : memref<9x64x1xf32, #tpu.memory_space<vmem>>, vector<1x64x1xf32>
    %58 = vector.shape_cast %57 : vector<1x64x1xf32> to vector<64x1xf32>
    %59 = vector.broadcast %58 : vector<64x1xf32> to vector<64x32xf32>
    %60 = arith.mulf %56, %59 : vector<64x32xf32>
    %61 = arith.truncf %60 : vector<64x32xf32> to vector<64x32xbf16>
    %c0_36 = arith.constant 0 : index
    %c160 = arith.constant 160 : index
    %62 = vector.load %arg9[%c0_36, %c160] : memref<64x288xbf16, #tpu.memory_space<vmem>>, vector<64x32xbf16>
    tpu.vector_store %arg9[%c0_36, %c160], %61 {strides = array<i32>} : memref<64x288xbf16, #tpu.memory_space<vmem>>, vector<64x32xbf16>,
    %c57_i32 = arith.constant 57 : i32
    %63 = tpu.dynamic_rotate %21 by %c57_i32 dim 0 : vector<64x32xf32>, i32 -> vector<64x32xf32>
    %c6 = arith.constant 6 : index
    %c0_37 = arith.constant 0 : index
    %c0_38 = arith.constant 0 : index
    %64 = vector.load %arg7[%c6, %c0_37, %c0_38] : memref<9x64x1xf32, #tpu.memory_space<vmem>>, vector<1x64x1xf32>
    %65 = vector.shape_cast %64 : vector<1x64x1xf32> to vector<64x1xf32>
    %66 = vector.broadcast %65 : vector<64x1xf32> to vector<64x32xf32>
    %67 = arith.mulf %63, %66 : vector<64x32xf32>
    %68 = arith.truncf %67 : vector<64x32xf32> to vector<64x32xbf16>
    %c0_39 = arith.constant 0 : index
    %c192 = arith.constant 192 : index
    %69 = vector.load %arg9[%c0_39, %c192] : memref<64x288xbf16, #tpu.memory_space<vmem>>, vector<64x32xbf16>
    tpu.vector_store %arg9[%c0_39, %c192], %68 {strides = array<i32>} : memref<64x288xbf16, #tpu.memory_space<vmem>>, vector<64x32xbf16>,
    %c56_i32 = arith.constant 56 : i32
    %70 = tpu.dynamic_rotate %21 by %c56_i32 dim 0 : vector<64x32xf32>, i32 -> vector<64x32xf32>
    %c7 = arith.constant 7 : index
    %c0_40 = arith.constant 0 : index
    %c0_41 = arith.constant 0 : index
    %71 = vector.load %arg7[%c7, %c0_40, %c0_41] : memref<9x64x1xf32, #tpu.memory_space<vmem>>, vector<1x64x1xf32>
    %72 = vector.shape_cast %71 : vector<1x64x1xf32> to vector<64x1xf32>
    %73 = vector.broadcast %72 : vector<64x1xf32> to vector<64x32xf32>
    %74 = arith.mulf %70, %73 : vector<64x32xf32>
    %75 = arith.truncf %74 : vector<64x32xf32> to vector<64x32xbf16>
    %c0_42 = arith.constant 0 : index
    %c224 = arith.constant 224 : index
    %76 = vector.load %arg9[%c0_42, %c224] : memref<64x288xbf16, #tpu.memory_space<vmem>>, vector<64x32xbf16>
    tpu.vector_store %arg9[%c0_42, %c224], %75 {strides = array<i32>} : memref<64x288xbf16, #tpu.memory_space<vmem>>, vector<64x32xbf16>,
    %c55_i32 = arith.constant 55 : i32
    %77 = tpu.dynamic_rotate %21 by %c55_i32 dim 0 : vector<64x32xf32>, i32 -> vector<64x32xf32>
    %c8 = arith.constant 8 : index
    %c0_43 = arith.constant 0 : index
    %c0_44 = arith.constant 0 : index
    %78 = vector.load %arg7[%c8, %c0_43, %c0_44] : memref<9x64x1xf32, #tpu.memory_space<vmem>>, vector<1x64x1xf32>
    %79 = vector.shape_cast %78 : vector<1x64x1xf32> to vector<64x1xf32>
    %80 = vector.broadcast %79 : vector<64x1xf32> to vector<64x32xf32>
    %81 = arith.mulf %77, %80 : vector<64x32xf32>
    %82 = arith.truncf %81 : vector<64x32xf32> to vector<64x32xbf16>
    %c0_45 = arith.constant 0 : index
    %c256 = arith.constant 256 : index
    %83 = vector.load %arg9[%c0_45, %c256] : memref<64x288xbf16, #tpu.memory_space<vmem>>, vector<64x32xbf16>
    tpu.vector_store %arg9[%c0_45, %c256], %82 {strides = array<i32>} : memref<64x288xbf16, #tpu.memory_space<vmem>>, vector<64x32xbf16>,
    %c0_46 = arith.constant 0 : index
    %c0_47 = arith.constant 0 : index
    %84 = vector.load %arg9[%c0_46, %c0_47] : memref<64x288xbf16, #tpu.memory_space<vmem>>, vector<64x288xbf16>
    %c0_48 = arith.constant 0 : index
    %c0_49 = arith.constant 0 : index
    %85 = vector.load %arg6[%c0_48, %c0_49] : memref<288x8xbf16, #tpu.memory_space<vmem>>, vector<288x8xbf16>
    %cst_50 = arith.constant dense<0.000000e+00> : vector<64x8xf32>
    %86 = tpu.matmul %84, %85, %cst_50 {dimension_numbers = #tpu.dot_dimension_numbers<[1], [0], [0], [1], [0, 0, 1, 1], [], []>} : vector<64x288xbf16>, vector<288x8xbf16>, vector<64x8xf32> -> vector<64x8xf32>
    %87 = vector.shape_cast %86 : vector<64x8xf32> to vector<8x8x8xf32>
    %c0_51 = arith.constant 0 : index
    %c0_52 = arith.constant 0 : index
    %c0_53 = arith.constant 0 : index
    %c32_54 = arith.constant 32 : index
    %88 = vector.load %arg8[%c0_51, %c0_52, %c0_53, %c32_54] : memref<1x8x8x40xf32, #tpu.memory_space<vmem>>, vector<1x8x8x8xf32>
    %89 = vector.shape_cast %88 : vector<1x8x8x8xf32> to vector<8x8x8xf32>
    %90 = vector.shape_cast %87 : vector<8x8x8xf32> to vector<1x8x8x8xf32>
    tpu.vector_store %arg8[%c0_51, %c0_52, %c0_53, %c32_54], %90 {strides = array<i32>} : memref<1x8x8x40xf32, #tpu.memory_space<vmem>>, vector<1x8x8x8xf32>,
    return
  }
  func.func @transform_0(%arg0: i32) -> (i32, i32, i32, i32) {
    %c0_i32 = arith.constant 0 : i32
    %c0_i32_0 = arith.constant 0 : i32
    %c0_i32_1 = arith.constant 0 : i32
    %c0_i32_2 = arith.constant 0 : i32
    return %arg0, %c0_i32, %c0_i32_0, %c0_i32_1 : i32, i32, i32, i32
  }
  func.func @transform_1(%arg0: i32) -> (i32, i32) {
    %c0_i32 = arith.constant 0 : i32
    %c0_i32_0 = arith.constant 0 : i32
    %c0_i32_1 = arith.constant 0 : i32
    return %c0_i32, %c0_i32_0 : i32, i32
  }
  func.func @transform_2(%arg0: i32) -> (i32, i32) {
    %c0_i32 = arith.constant 0 : i32
    %c0_i32_0 = arith.constant 0 : i32
    %c0_i32_1 = arith.constant 0 : i32
    return %c0_i32, %c0_i32_0 : i32, i32
  }
  func.func @transform_3(%arg0: i32) -> (i32, i32) {
    %c0_i32 = arith.constant 0 : i32
    %c0_i32_0 = arith.constant 0 : i32
    %c0_i32_1 = arith.constant 0 : i32
    return %c0_i32, %c0_i32_0 : i32, i32
  }
  func.func @transform_4(%arg0: i32) -> (i32, i32) {
    %c0_i32 = arith.constant 0 : i32
    %c0_i32_0 = arith.constant 0 : i32
    %c0_i32_1 = arith.constant 0 : i32
    return %c0_i32, %c0_i32_0 : i32, i32
  }
  func.func @transform_5(%arg0: i32) -> (i32, i32) {
    %c0_i32 = arith.constant 0 : i32
    %c0_i32_0 = arith.constant 0 : i32
    %c0_i32_1 = arith.constant 0 : i32
    return %c0_i32, %c0_i32_0 : i32, i32
  }
  func.func @transform_6(%arg0: i32) -> (i32, i32, i32) {
    %c0_i32 = arith.constant 0 : i32
    %c0_i32_0 = arith.constant 0 : i32
    %c0_i32_1 = arith.constant 0 : i32
    %c0_i32_2 = arith.constant 0 : i32
    return %c0_i32, %c0_i32_0, %c0_i32_1 : i32, i32, i32
  }
  func.func @transform_7(%arg0: i32) -> (i32, i32, i32, i32) {
    %c0_i32 = arith.constant 0 : i32
    %c0_i32_0 = arith.constant 0 : i32
    %c0_i32_1 = arith.constant 0 : i32
    %c0_i32_2 = arith.constant 0 : i32
    return %arg0, %c0_i32, %c0_i32_0, %c0_i32_1 : i32, i32, i32, i32
  }
}

</mosaic_0001>

<bundles_post_ra>
// kernel: dense_block_forward.3
= control target key start
LH: loop header
LB: loop body
LE: loop exit
PB: predicated region body
PF: predicated region fallthrough
CT: control target
= control target key end

     0   :  { %12 = vsyncpa [#allocation4], 0  ;;  %s1833_s24 = smov 0   ;;  %s2442_s0 = inlined_call_operand.vmem [shape: f32[2,8,8,16], index: 0, kind: input, shape index: {}]   ;;  %s2443_s1 = inlined_call_operand.vmem [shape: f32[1,16], index: 1, kind: input, shape index: {}]   ;;  %s2444_s2 = inlined_call_operand.vmem [shape: f32[1,16], index: 2, kind: input, shape index: {}]   ;;  %s2445_s3 = inlined_call_operand.vmem [shape: bf16[16,32], index: 3, kind: input, shape index: {}]   ;;  %s2446_s4 = inlined_call_operand.vmem [shape: f32[1,32], index: 4, kind: input, shape index: {}]   ;;  %s2447_s5 = inlined_call_operand.vmem [shape: bf16[288,8], index: 5, kind: input, shape index: {}]   ;;  %s2448_s6 = inlined_call_operand.hbm [shape: f32[9,64,1], index: 6, kind: input, shape index: {}]   ;;  %s2449_s7 = inlined_call_operand.vmem [shape: f32[2,8,8,24], index: 7, kind: output, shape index: {}]  }
   0x1 LB: > { %s1839_s25 = sadd.s32 4294967295, %s1783_s24   ;;  %p1582_p0 = scmp.ge.s32.totalorder %s1783_s24, 1  ;;  %s1783_s24 = sphi %s1833_s24, %s18_s24  }
   0x2   : > { %p201_p1 = scmp.lt.s32.totalorder %s1783_s24, 3  ;;  %s1785_s26 = smov [#allocation3]  }
   0x3   : > { %s228_s27 = sshll.u32 %s1785_s26, 4  ;;  %p2450_p3 = scmp.eq.s32.totalorder %s1839_s25, 0  ;;  %s229_s27 = int_to_ptr.vmem [resolvable:$true] %s228_s27 }
   0x4   : > { %p1843_p2 = pnand %p1582_p0, %p201_p1  ;;  %s1745_s9 = scalar_lea.hbm %s2448_s6, 9216 }
   0x5   : > { %p1746_p6 = scmp.ne.s32.totalorder %s2448_s6, %s1745_s9  ;;  %p1752_p10 = scmp.lt.u32.totalorder %s1745_s9, %s2448_s6 }
   0x6   : > { %s2452_s28 = scalar_select %p1843_p2, 1, 0 }
   0x7   : > { %p1702_p4 = pneg %p1843_p2 }
   0x9   : > { %p1852_p5 = pnand %p2450_p3, %p1702_p4 }
   0xb   : > { %p1747_p7 = pneg %p1852_p5 }
   0xd   : > { %p1748_p8 = pnand %p1747_p7, %p1746_p6 }
   0xf   : > { %p1749_p9 = pneg %p1748_p8 }
  0x11   : > { %p1754_p11 = pnand %p1752_p10, %p1749_p9 }
  0x13   : > { %1757 = shalt.err (!%p1754_p11)
}
  0x14   : > { %s1758_s14 = scalar_lea.vmem %s229_s27, 9216  ;;  %p1766_p1 = scmp.lt.s32.totalorder %s229_s27, %s229_s27 }
  0x15   : > { %p1759_p12 = scmp.ne.s32.totalorder %s229_s27, %s1758_s14  ;;  %p1767_p4 = scmp.lt.s32.totalorder %s1758_s14, %s1758_s14 }
  0x17   : > { %p1761_p13 = pnand %p1759_p12, %p1747_p7  ;;  %p1768_p3 = por %p1767_p4, %p1766_p1 }
  0x19   : > { %p1762_p0 = pneg %p1761_p13 }
  0x1b   : > { %p1769_p2 = pnand %p1768_p3, %p1762_p0 }
  0x1d   : > { %1772 = shalt.err (!%p1769_p2)
}
  0x1e   : > { %s1786_s15 = smov 128   ;;  %s1787_s16 = smov 8  }
  0x1f   : > { %1705 = dma.hbm_to_vmem [thread:$0]  (!%p1852_p5), %s2448_s6, 9216, %s229_s27, [#allocation4], %s1786_s15, %s1786_s15, %s1787_s16  }
  0x20   : > { %p2454_p6 = scmp.ne.s32.totalorder %s2452_s28, 0 }
  0x22   : > { %252 = sbr.rel (%p2454_p6) target bundleno = 808 (0x328), region = 48 }
  0x29   : > { %p2455_p8 = scmp.eq.s32.totalorder %s1839_s25, 0 }
  0x2b   : > { %1778 = dma.done.wait (%p2455_p8), [#allocation4], 9216   ;;  %p2456_p7 = pmov %p2455_p8 }
  0x2c   : > { %p284_p2 = scmp.lt.s32.totalorder %s1839_s25, 1  ;;  %v1788_v0 = vmov 0   ;;  %v867_v1 = vld [vmem:[#allocation3 + $0x140] sm:$0xff]  ;;  %v868_v3 = vld [vmem:[#allocation3 + $0x148] sm:$0xff]  ;;  %vm303_vm0 = vcmask 130048   ;;  %v869_v52 = vld [vmem:[#allocation3 + $0x150] sm:$0xff] }
  0x2d   : > { %1780 = vsyncadd (%p2456_p7), [#allocation4], 4294958080  ;;  %1725 = vset.pattern.permute.xlu1 %v1788_v0  ;;  %1724 = vset.pattern.permute.xlu0 %v1788_v0  ;;  %v539_v2 = vld [vmem:[#allocation3 + $0x40] sm:$0xff]  ;;  %v540_v4 = vld [vmem:[#allocation3 + $0x48] sm:$0xff]  ;;  %vm533_vm3 = vcmask 261120   ;;  %s1789_s26 = smov 96  }
  0x2e   : > { %s2496_s25 = smov (!%p284_p2, %s1839_s25), 1  ;;  %877 = vperm.xlu0 %1724, %v867_v1   ;;  %549 = vperm.xlu1 %1725, %v539_v2   ;;  %v1726_v5 = vld [vmem:[%s2445_s3] sm:$0xff]   ;;  %v949_v17 = vld [vmem:[#allocation3 + $0x188] sm:$0xff]  ;;  %v870_v53 = vld [vmem:[#allocation3 + $0x158] sm:$0xff]  ;;  %s1791_s15 = smov 64   ;;  %vm615_vm4 = vcmask 523520  }
  0x2f   : > { %s1623_s19 = sshll.u32 %s2496_s25, 6  ;;  %v1591_v8 = vld [vmem:[%s2443_s1] ss:$0 sm:$0xff]  ;;  %1676 = vmatprep.subr.bf16.mxu0 %v1726_v5  ;;  %v639_v41 = vld [vmem:[#allocation3 + $0x88] sm:$0xff]  ;;  %v541_v54 = vld [vmem:[#allocation3 + $0x50] sm:$0xff]  ;;  %s1790_s25 = smov 32  }
  0x30   : > { %s1883_s22 = scalar_lea.vmem %s2442_s0, %s1623_s19  ;;  %s1888_s27 = scalar_lea.vmem %s2449_s7, %s1623_s19  ;;  %v1592_v11 = vld [vmem:[%s2444_s2] ss:$0 sm:$0xff]  ;;  %1677 = vmatpush3.bf16.msra.mxu0 %v1726_v5  ;;  %v1030_v48 = vld [vmem:[#allocation3 + $0x1c8] sm:$0xff]  ;;  %v542_v55 = vld [vmem:[#allocation3 + $0x58] sm:$0xff]  ;;  %vm714_vm5 = vcmask 785920   ;;  %vm796_vm6 = vcmask 1048320  }
  0x31   : > { %v295_v6 = vld [vmem:[%s1883_s22] sm:$0xff]  ;;  %v296_v7 = vld [vmem:[%s1883_s22 + $0x8] sm:$0xff]  ;;  %v297_v12 = vld [vmem:[%s1883_s22 + $0x10] sm:$0xff]  ;;  %vm1504_vm7 = vcmask 195712  }
  0x32   : > { %304 = vst.msk [vmem:[%s1888_s27] sm:$0xff] %vm303_vm0, %v295_v6  ;;  %305 = vst.msk [vmem:[%s1888_s27 + $0x8] sm:$0xff] %vm303_vm0, %v296_v7  ;;  %v319_v9 = vmul.f32 %v1591_v8, %v295_v6  ;;  %v320_v10 = vmul.f32 %v1591_v8, %v296_v7  ;;  %v298_v13 = vld [vmem:[%s1883_s22 + $0x18] sm:$0xff]  ;;  %882 = vperm.xlu0 %1724, %v868_v3   ;;  %554 = vperm.xlu1 %1725, %v540_v4   ;;  %v948_v14 = vld [vmem:[#allocation3 + $0x180] sm:$0xff] }
  0x33   : > { %v321_v15 = vmul.f32 %v1591_v8, %v297_v12  ;;  %v322_v16 = vmul.f32 %v1591_v8, %v298_v13  ;;  %306 = vst.msk [vmem:[%s1888_s27 + $0x10] sm:$0xff] %vm303_vm0, %v297_v12  ;;  %307 = vst.msk [vmem:[%s1888_s27 + $0x18] sm:$0xff] %vm303_vm0, %v298_v13  ;;  %v299_v20 = vld [vmem:[%s1883_s22 + $0x20] sm:$0xff]  ;;  %v300_v21 = vld [vmem:[%s1883_s22 + $0x28] sm:$0xff] }
  0x34   : > { %v334_v18 = vadd.f32 %v1592_v11, %v319_v9  ;;  %v335_v19 = vadd.f32 %v1592_v11, %v320_v10  ;;  %v323_v24 = vmul.f32 %v1591_v8, %v299_v20  ;;  %v324_v25 = vmul.f32 %v1591_v8, %v300_v21  ;;  %308 = vst.msk [vmem:[%s1888_s27 + $0x20] sm:$0xff] %vm303_vm0, %v299_v20  ;;  %v301_v26 = vld [vmem:[%s1883_s22 + $0x30] sm:$0xff]  ;;  %v302_v27 = vld [vmem:[%s1883_s22 + $0x38] sm:$0xff]  ;;  %v638_v37 = vld [vmem:[#allocation3 + $0x80] sm:$0xff] }
  0x35   : > { %v336_v22 = vadd.f32 %v1592_v11, %v321_v15  ;;  %v337_v23 = vadd.f32 %v1592_v11, %v322_v16  ;;  %309 = vst.msk [vmem:[%s1888_s27 + $0x28] sm:$0xff] %vm303_vm0, %v300_v21  ;;  %v325_v30 = vmul.f32 %v1591_v8, %v301_v26  ;;  %v326_v31 = vmul.f32 %v1591_v8, %v302_v27  ;;  %v1029_v47 = vld [vmem:[#allocation3 + $0x1c0] sm:$0xff]  ;;  %v721_v51 = vld [vmem:[#allocation3 + $0xc8] sm:$0xff]  ;;  %v950_v56 = vld [vmem:[#allocation3 + $0x190] sm:$0xff] }
  0x36   : > { %v342_v28 = vmax.f32 %v334_v18, 0.0  ;;  %v343_v29 = vmax.f32 %v335_v19, 0.0  ;;  %310 = vst.msk [vmem:[%s1888_s27 + $0x30] sm:$0xff] %vm303_vm0, %v301_v26  ;;  %311 = vst.msk [vmem:[%s1888_s27 + $0x38] sm:$0xff] %vm303_vm0, %v302_v27  ;;  %958 = vperm.xlu0 %1724, %v948_v14   ;;  %963 = vperm.xlu1 %1725, %v949_v17   ;;  %v338_v34 = vadd.f32 %v1592_v11, %v323_v24  ;;  %v720_v50 = vld [vmem:[#allocation3 + $0xc0] sm:$0xff]  ;;  %v951_v57 = vld [vmem:[#allocation3 + $0x198] sm:$0xff] }
  0x37   : > { %v344_v32 = vmax.f32 %v336_v22, 0.0  ;;  %v345_v33 = vmax.f32 %v337_v23, 0.0  ;;  %v339_v35 = vadd.f32 %v1592_v11, %v324_v25  ;;  %v340_v38 = vadd.f32 %v1592_v11, %v325_v30  ;;  %v640_v58 = vld [vmem:[#allocation3 + $0x90] sm:$0xff]  ;;  %v641_v59 = vld [vmem:[#allocation3 + $0x98] sm:$0xff]  ;;  %v871_v0 = vld [vmem:[#allocation3 + $0x160] sm:$0xff] }
  0x38   : > { %v350_v36 = vpack.c.bf16 %v343_v29, %v342_v28  ;;  %v341_v39 = vadd.f32 %v1592_v11, %v326_v31  ;;  %v346_v42 = vmax.f32 %v338_v34, 0.0  ;;  %v1031_v60 = vld [vmem:[#allocation3 + $0x1d0] sm:$0xff]  ;;  %v1032_v61 = vld [vmem:[#allocation3 + $0x1d8] sm:$0xff]  ;;  %v872_v1 = vld [vmem:[#allocation3 + $0x168] sm:$0xff] }
  0x39   : > { %v351_v40 = vpack.c.bf16 %v345_v33, %v344_v32  ;;  %v347_v43 = vmax.f32 %v339_v35, 0.0  ;;  %v348_v45 = vmax.f32 %v340_v38, 0.0  ;;  %v722_v62 = vld [vmem:[#allocation3 + $0xd0] sm:$0xff]  ;;  %v723_v63 = vld [vmem:[#allocation3 + $0xd8] sm:$0xff]  ;;  %v543_v2 = vld [vmem:[#allocation3 + $0x60] sm:$0xff] }
  0x3a   : > { %1678 = vmatprep.mubr.msk.bf16.mxu0 %vm303_vm0, %v350_v36  ;;  %648 = vperm.xlu0 %1724, %v638_v37   ;;  %v349_v46 = vmax.f32 %v341_v39, 0.0  ;;  %v544_v3 = vld [vmem:[#allocation3 + $0x68] sm:$0xff]  ;;  %v952_v4 = vld [vmem:[#allocation3 + $0x1a0] sm:$0xff]  ;;  %v873_v12 = vld [vmem:[#allocation3 + $0x170] sm:$0xff] }
  0x3b   : > { %1679 = vmatmul.mubr.msk.bf16.vlgmr.msra.gmra.mrb[0].mxu0 %vm303_vm0, %v351_v40  ;;  %v352_v44 = vpack.c.bf16 %v347_v43, %v346_v42  ;;  %653 = vperm.xlu1 %1725, %v639_v41   ;;  %v953_v5 = vld [vmem:[#allocation3 + $0x1a8] sm:$0xff]  ;;  %v642_v6 = vld [vmem:[#allocation3 + $0xa0] sm:$0xff]  ;;  %v874_v13 = vld [vmem:[#allocation3 + $0x178] sm:$0xff] }
  0x3c   : > { %v353_v49 = vpack.c.bf16 %v349_v46, %v348_v45  ;;  %v643_v7 = vld [vmem:[#allocation3 + $0xa8] sm:$0xff]  ;;  %v1033_v8 = vld [vmem:[#allocation3 + $0x1e0] sm:$0xff]  ;;  %v545_v14 = vld [vmem:[#allocation3 + $0x70] sm:$0xff] }
  0x3d   : > { %1682 = vmatprep.mubr.msk.bf16.mxu0 %vm303_vm0, %v352_v44  ;;  %v1034_v9 = vld [vmem:[#allocation3 + $0x1e8] sm:$0xff]  ;;  %v724_v10 = vld [vmem:[#allocation3 + $0xe0] sm:$0xff]  ;;  %v546_v15 = vld [vmem:[#allocation3 + $0x78] sm:$0xff] }
  0x3e   : > { %1039 = vperm.xlu0 %1724, %v1029_v47   ;;  %v725_v11 = vld [vmem:[#allocation3 + $0xe8] sm:$0xff]  ;;  %v954_v16 = vld [vmem:[#allocation3 + $0x1b0] sm:$0xff]  ;;  %v955_v17 = vld [vmem:[#allocation3 + $0x1b8] sm:$0xff] }
  0x3f   : > { %1044 = vperm.xlu1 %1725, %v1030_v48   ;;  %v644_v18 = vld [vmem:[#allocation3 + $0xb0] sm:$0xff]  ;;  %v645_v19 = vld [vmem:[#allocation3 + $0xb8] sm:$0xff]  ;;  %v802_v24 = vld [vmem:[#allocation3 + $0x100] sm:$0xff] }
  0x40   : > { %v1035_v20 = vld [vmem:[#allocation3 + $0x1f0] sm:$0xff]  ;;  %v1036_v21 = vld [vmem:[#allocation3 + $0x1f8] sm:$0xff]  ;;  %v803_v25 = vld [vmem:[#allocation3 + $0x108] sm:$0xff] }
  0x41   : > { %v726_v22 = vld [vmem:[#allocation3 + $0xf0] sm:$0xff]  ;;  %v727_v23 = vld [vmem:[#allocation3 + $0xf8] sm:$0xff]  ;;  %v473_v26 = vld [vmem:[#allocation3] sm:$0xff] }
  0x42   : > { %730 = vperm.xlu0 %1724, %v720_v50   ;;  %v474_v27 = vld [vmem:[#allocation3 + $0x8] sm:$0xff]  ;;  %v804_v28 = vld [vmem:[#allocation3 + $0x110] sm:$0xff]  ;;  %v805_v29 = vld [vmem:[#allocation3 + $0x118] sm:$0xff] }
  0x43   : > { %1683 = vmatmul.mubr.msk.bf16.gmra.mrb[4].mxu0 %vm303_vm0, %v353_v49  ;;  %735 = vperm.xlu1 %1725, %v721_v51   ;;  %v475_v30 = vld [vmem:[#allocation3 + $0x10] sm:$0xff]  ;;  %v476_v31 = vld [vmem:[#allocation3 + $0x18] sm:$0xff]  ;;  %v806_v32 = vld [vmem:[#allocation3 + $0x120] sm:$0xff] }
  0x44   : > { %v807_v33 = vld [vmem:[#allocation3 + $0x128] sm:$0xff]  ;;  %v477_v34 = vld [vmem:[#allocation3 + $0x20] sm:$0xff]  ;;  %v1113_v38 = vld [vmem:[#allocation3 + $0x218] sm:$0xff] }
  0x45   : > { %v478_v35 = vld [vmem:[#allocation3 + $0x28] sm:$0xff]  ;;  %v1110_v37 = vld [vmem:[#allocation3 + $0x200] sm:$0xff]  ;;  %v1112_v39 = vld [vmem:[#allocation3 + $0x210] sm:$0xff] }
  0x46   : > { %887 = vperm.xlu0 %1724, %v869_v52   ;;  %v1111_v36 = vld [vmem:[#allocation3 + $0x208] sm:$0xff]  ;;  %v808_v40 = vld [vmem:[#allocation3 + $0x130] sm:$0xff]  ;;  %v809_v41 = vld [vmem:[#allocation3 + $0x138] sm:$0xff] }
  0x47   : > { %892 = vperm.xlu1 %1725, %v870_v53   ;;  %v479_v44 = vld [vmem:[#allocation3 + $0x30] sm:$0xff]  ;;  %v480_v45 = vld [vmem:[#allocation3 + $0x38] sm:$0xff]  ;;  %v1115_v48 = vld [vmem:[#allocation3 + $0x228] sm:$0xff] }
  0x48   : > { %v1727_v49 = vld [vmem:[%s2447_s5 + $0x80] sm:$0xff]   ;;  %v1728_v53 = vld [vmem:[%s2447_s5 + $0x88] sm:$0xff]  }
  0x49   : > { %v1114_v50 = vld [vmem:[#allocation3 + $0x220] sm:$0xff]  ;;  %1686 = vmatprep.subr.bf16.mxu0 %v1727_v49 }
  0x4a   : > { %559 = vperm.xlu0 %1724, %v541_v54   ;;  %1687 = vmatpush3.bf16.msra.mxu0 %v1727_v49 }
  0x4b   : > { %564 = vperm.xlu1 %1725, %v542_v55   ;;  %1688 = vmatprep.subr.bf16.mxu0 %v1728_v53 }
  0x4e   : > { %968 = vperm.xlu0 %1724, %v950_v56   ;;  %1689 = vmatpush3.bf16.msra.mxu0 %v1728_v53 }
  0x4f   : > { %973 = vperm.xlu1 %1725, %v951_v57  }
  0x52   : > { %658 = vperm.xlu0 %1724, %v640_v58  }
  0x53   : > { %663 = vperm.xlu1 %1725, %v641_v59  }
  0x56   : > { %1049 = vperm.xlu0 %1724, %v1031_v60  }
  0x57   : > { %1054 = vperm.xlu1 %1725, %v1032_v61  }
  0x5a   : > { %740 = vperm.xlu0 %1724, %v722_v62  }
  0x5b   : > { %745 = vperm.xlu1 %1725, %v723_v63  }
  0x5e   : > { %897 = vperm.xlu0 %1724, %v871_v0  }
  0x5f   : > { %902 = vperm.xlu1 %1725, %v872_v1  }
  0x62   : > { %569 = vperm.xlu0 %1724, %v543_v2  }
  0x63   : > { %574 = vperm.xlu1 %1725, %v544_v3  }
  0x66   : > { %978 = vperm.xlu0 %1724, %v952_v4  }
  0x67   : > { %983 = vperm.xlu1 %1725, %v953_v5  }
  0x6a   : > { %668 = vperm.xlu0 %1724, %v642_v6  }
  0x6b   : > { %673 = vperm.xlu1 %1725, %v643_v7  }
  0x6e   : > { %1059 = vperm.xlu0 %1724, %v1033_v8  }
  0x6f   : > { %1064 = vperm.xlu1 %1725, %v1034_v9  }
  0x72   : > { %750 = vperm.xlu0 %1724, %v724_v10  }
  0x73   : > { %755 = vperm.xlu1 %1725, %v725_v11  }
  0x76   : > { %907 = vperm.xlu0 %1724, %v873_v12  }
  0x77   : > { %912 = vperm.xlu1 %1725, %v874_v13  }
  0x7a   : > { %579 = vperm.xlu0 %1724, %v545_v14  }
  0x7b   : > { %584 = vperm.xlu1 %1725, %v546_v15  }
  0x7e   : > { %988 = vperm.xlu0 %1724, %v954_v16  }
  0x7f   : > { %993 = vperm.xlu1 %1725, %v955_v17  }
  0x82   : > { %678 = vperm.xlu0 %1724, %v644_v18  }
  0x83   : > { %683 = vperm.xlu1 %1725, %v645_v19  }
  0x86   : > { %1069 = vperm.xlu0 %1724, %v1035_v20  }
  0x87   : > { %1074 = vperm.xlu1 %1725, %v1036_v21  }
  0x8a   : > { %760 = vperm.xlu0 %1724, %v726_v22  }
  0x8b   : > { %765 = vperm.xlu1 %1725, %v727_v23  }
  0x8e   : > { %812 = vperm.xlu0 %1724, %v802_v24  }
  0x8f   : > { %817 = vperm.xlu1 %1725, %v803_v25  }
  0x92   : > { %483 = vperm.xlu0 %1724, %v473_v26  }
  0x93   : > { %488 = vperm.xlu1 %1725, %v474_v27  }
  0x96   : > { %822 = vperm.xlu0 %1724, %v804_v28  }
  0x97   : > { %827 = vperm.xlu1 %1725, %v805_v29  }
  0x9a   : > { %493 = vperm.xlu0 %1724, %v475_v30  }
  0x9b   : > { %498 = vperm.xlu1 %1725, %v476_v31   ;;  %v462_v31 = vlaneseq }
  0x9e   : > { %832 = vperm.xlu0 %1724, %v806_v32  }
  0x9f   : > { %837 = vperm.xlu1 %1725, %v807_v33   ;;  %v2028_v33 = vld [vmem:[%s2446_s4] ss:$0 sm:$0xff] }
  0xa2   : > { %503 = vperm.xlu0 %1724, %v477_v34   ;;  %v1729_v34 = vld [vmem:[%s2447_s5 + $0x40] sm:$0xff]  }
  0xa3   : > { %508 = vperm.xlu1 %1725, %v478_v35   ;;  %v1730_v35 = vld [vmem:[%s2447_s5] sm:$0xff]   ;;  %1630 = vmatprep.subr.bf16.mxu1 %v1729_v34 }
  0xa4   : > { %1631 = vmatpush3.bf16.msra.mxu1 %v1730_v35 }
  0xa6   : > { %1125 = vperm.xlu0 %1724, %v1111_v36  }
  0xa7   : > { %1120 = vperm.xlu1 %1725, %v1110_v37  }
  0xaa   : > { %1135 = vperm.xlu0 %1724, %v1113_v38   ;;  %v2036_v38 = vshrl.u32 %v462_v31, 7 }
  0xab   : > { %1130 = vperm.xlu1 %1725, %v1112_v39  }
  0xac   : > { %vm464_vm1 = vcmp.lt.s32.totalorder %v2036_v38, 1  ;;  %vm628_vm2 = vcmp.lt.s32.totalorder %v2036_v38, 7 }
  0xad   : > { %v1927_v42 = vpop.permute.xlu0 %877  ;;  %v1929_v43 = vpop.permute.xlu1 %549 }
  0xae   : > { %842 = vperm.xlu0 %1724, %v808_v40  }
  0xaf   : > { %847 = vperm.xlu1 %1725, %v809_v41  }
  0xb1   : > { %v1931_v46 = vpop.permute.xlu0 %882  ;;  %v1933_v47 = vpop.permute.xlu1 %554 }
  0xb2   : > { %513 = vperm.xlu0 %1724, %v479_v44  }
  0xb3   : > { %518 = vperm.xlu1 %1725, %v480_v45  }
  0xb5   : > { %v1938_v51 = vpop.permute.xlu0 %958  ;;  %v1940_v52 = vpop.permute.xlu1 %963 }
  0xb6   : > { %1145 = vperm.xlu0 %1724, %v1115_v48  }
  0xb7   : > { %1140 = vperm.xlu1 %1725, %v1114_v50  }
  0xb9   : > { %v1945_v54 = vpop.permute.xlu0 %648 }
  0xba   : > { %v1947_v55 = vpop.permute.xlu1 %653 }
  0xbd   : > { %v1949_v56 = vpop.permute.xlu0 %1039 }
  0xbe   : > { %v1951_v57 = vpop.permute.xlu1 %1044 }
  0xc1   : > { %v1953_v58 = vpop.permute.xlu0 %730 }
  0xc2   : > { %v1955_v59 = vpop.permute.xlu1 %735 }
  0xc5   : > { %v1957_v60 = vpop.permute.xlu0 %887 }
  0xc6   : > { %v1959_v61 = vpop.permute.xlu1 %892 }
  0xc9   : > { %v1961_v62 = vpop.permute.xlu0 %559 }
  0xca   : > { %v565_v63 = vpop.permute.xlu1 %564 }
  0xcd   : > { %v1963_v0 = vpop.permute.xlu0 %968 }
  0xce   : > { %v1965_v1 = vpop.permute.xlu1 %973 }
  0xd1   : > { %v1967_v2 = vpop.permute.xlu0 %658 }
  0xd2   : > { %v1969_v3 = vpop.permute.xlu1 %663 }
  0xd5   : > { %v1971_v4 = vpop.permute.xlu0 %1049 }
  0xd6   : > { %v1973_v5 = vpop.permute.xlu1 %1054 }
  0xd9   : > { %v1975_v6 = vpop.permute.xlu0 %740 }
  0xda   : > { %v1977_v7 = vpop.permute.xlu1 %745 }
  0xdd   : > { %v1979_v8 = vpop.permute.xlu0 %897 }
  0xde   : > { %v1981_v9 = vpop.permute.xlu1 %902 }
  0xdf   : > { %2457 = vst [vmem:[#allocation6_spill] sm:$0xff] %v1981_v9 }
  0xe1   : > { %v570_v10 = vpop.permute.xlu0 %569 }
  0xe2   : > { %v1983_v11 = vpop.permute.xlu1 %574 }
  0xe5   : > { %v1985_v12 = vpop.permute.xlu0 %978 }
  0xe6   : > { %v1987_v13 = vpop.permute.xlu1 %983 }
  0xe9   : > { %v1989_v14 = vpop.permute.xlu0 %668 }
  0xea   : > { %v1991_v15 = vpop.permute.xlu1 %673 }
  0xed   : > { %v1993_v16 = vpop.permute.xlu0 %1059 }
  0xee   : > { %v1995_v17 = vpop.permute.xlu1 %1064 }
  0xf1   : > { %v1997_v18 = vpop.permute.xlu0 %750 }
  0xf2   : > { %v1999_v19 = vpop.permute.xlu1 %755 }
  0xf5   : > { %v2001_v20 = vpop.permute.xlu0 %907 }
  0xf6   : > { %2458 = vst [vmem:[#allocation7_spill] sm:$0xff] %v2001_v20  ;;  %v2003_v21 = vpop.permute.xlu1 %912 }
  0xf7   : > { %2459 = vst [vmem:[#allocation8_spill] sm:$0xff] %v2003_v21 }
  0xf9   : > { %v2005_v22 = vpop.permute.xlu0 %579 }
  0xfa   : > { %2460 = vst [vmem:[#allocation9_spill] sm:$0xff] %v2005_v22  ;;  %v2007_v23 = vpop.permute.xlu1 %584 }
  0xfb   : > { %2461 = vst [vmem:[#allocation10_spill] sm:$0xff] %v2007_v23 }
  0xfd   : > { %v2009_v24 = vpop.permute.xlu0 %988 }
  0xfe   : > { %2462 = vst [vmem:[#allocation11_spill] sm:$0xff] %v2009_v24  ;;  %v2011_v25 = vpop.permute.xlu1 %993 }
  0xff   : > { %2463 = vst [vmem:[#allocation12_spill] sm:$0xff] %v2011_v25 }
 0x101   : > { %v2013_v26 = vpop.permute.xlu0 %678 }
 0x102   : > { %v2015_v27 = vpop.permute.xlu1 %683 }
 0x103   : > { %2464 = vst [vmem:[#allocation13_spill] sm:$0xff] %v2015_v27 }
 0x105   : > { %v2017_v28 = vpop.permute.xlu0 %1069 }
 0x106   : > { %2465 = vst [vmem:[#allocation14_spill] sm:$0xff] %v2017_v28  ;;  %v2019_v29 = vpop.permute.xlu1 %1074 }
 0x107   : > { %2466 = vst [vmem:[#allocation15_spill] sm:$0xff] %v2019_v29 }
 0x109   : > { %v2021_v30 = vpop.permute.xlu0 %760 }
 0x10a   : > { %v2023_v32 = vpop.permute.xlu1 %765 }
 0x10b   : > { %2467 = vst [vmem:[#allocation16_spill] sm:$0xff] %v2023_v32 }
 0x10d   : > { %v813_v37 = vpop.permute.xlu0 %812 }
 0x10e   : > { %v1680_v36 = vpop.f32.mrb[0].mxu0  ;;  %v818_v41 = vpop.permute.xlu1 %817 }
 0x10f   : > { %v424_v39 = vadd.f32 %v1680_v36, %v2028_v33  ;;  %v415_v40 = vpop.f32.mrb[1].mxu0 }
 0x110   : > { %v416_v44 = vadd.f32 %v2028_v33, %v415_v40  ;;  %v1681_v45 = vpop.f32.mrb[2].mxu0 }
 0x111   : > { %v2040_v48 = vmax.f32 %v424_v39, 0.0  ;;  %v427_v49 = vadd.f32 %v1681_v45, %v2028_v33  ;;  %v418_v50 = vpop.f32.mrb[3].mxu0  ;;  %v2046_v31 = vpop.permute.xlu0 %483 }
 0x112   : > { %v2043_v53 = vmax.f32 %v416_v44, 0.0  ;;  %v419_v32 = vadd.f32 %v2028_v33, %v418_v50  ;;  %2468 = vst [vmem:[#allocation17_spill] sm:$0xff] %v2046_v31  ;;  %v2052_v36 = vpop.permute.xlu1 %488 }
 0x113   : > { %v2050_v34 = vmax.f32 %v427_v49, 0.0  ;;  %v1078_v35 = vmul.f32 %v1951_v57, %v2040_v48  ;;  %v590_v39 = vmul.f32 %v565_v63, %v2040_v48  ;;  %v622_v29 = vrot.slane %v2040_v48, 1  ;;  %v1731_v63 = vld [vmem:[%s2447_s5 + $0x48] sm:$0xff]  }
 0x114   : > { %v2059_v44 = vmul.f32 %v813_v37, %v2043_v53  ;;  %v447_v45 = vmax.f32 %v419_v32, 0.0  ;;  %v1732_v32 = vld [vmem:[%s2447_s5 + $0x8] sm:$0xff]   ;;  %1632 = vmatprep.subr.bf16.mxu1 %v1731_v63  ;;  %v2472_v27 = vrot.slane %v2040_v48, 7  ;;  %v2473_v63 = vrot.slane %v2043_v53, 7 }
 0x115   : > { %v2067_v57 = vmul.f32 %v570_v10, %v2050_v34  ;;  %v823_v40 = vpop.permute.xlu0 %822  ;;  %v2471_v23 = vrot.slane %v2050_v34, 1  ;;  %1633 = vmatpush3.bf16.msra.mxu1 %v1732_v32 }
 0x116   : > { %2469 = vst [vmem:[#allocation18_spill] sm:$0xff] %v2059_v44  ;;  %v2075_v37 = vmul.f32 %v818_v41, %v447_v45  ;;  %v1684_v50 = vpop.f32.mrb[4].mxu0  ;;  %v1077_v49 = vmul.f32 %v1949_v56, %v447_v45  ;;  %v589_v28 = vmul.f32 %v1961_v62, %v447_v45  ;;  %v455_v25 = vrot.slane %v447_v45, 7  ;;  %v828_v24 = vpop.permute.xlu1 %827 }
 0x117   : > { %v440_v10 = vadd.f32 %v1684_v50, %v2028_v33  ;;  %v431_v44 = vpop.f32.mrb[5].mxu0  ;;  %v852_v31 = vmul.f32 %v823_v40, %v2040_v48  ;;  %v621_v21 = vrot.slane %v447_v45, 1  ;;  %v2085_v41 = vsel %vm628_vm2, %v622_v29, %v2471_v23 }
 0x118   : > { %2470 = vst [vmem:[#allocation19_spill] sm:$0xff] %v2075_v37  ;;  %v432_v37 = vadd.f32 %v2028_v33, %v431_v44  ;;  %v1685_v56 = vpop.f32.mrb[6].mxu0  ;;  %v853_v62 = vmul.f32 %v828_v24, %v2050_v34  ;;  %v1085_v22 = vpack.c.bf16 %v1078_v35, %v1077_v49  ;;  %v596_v20 = vpack.c.bf16 %v590_v39, %v589_v28  ;;  %v1733_v39 = vld [vmem:[%s2447_s5 + $0x50] sm:$0xff]  }
 0x119   : > { %v2089_v50 = vmax.f32 %v440_v10, 0.0  ;;  %v443_v40 = vadd.f32 %v1685_v56, %v2028_v33  ;;  %v434_v45 = vpop.f32.mrb[7].mxu0  ;;  %v470_v23 = vsel %vm464_vm1, %v455_v25, %v2472_v27  ;;  %v471_v44 = vsel %vm464_vm1, %v2473_v63, %v455_v25  ;;  %v494_v27 = vpop.permute.xlu0 %493  ;;  %v1734_v25 = vld [vmem:[%s2447_s5 + $0x10] sm:$0xff]   ;;  %1634 = vmatprep.subr.bf16.mxu1 %v1733_v39 }
 0x11a   : > { %v2100_v9 = vmax.f32 %v432_v37, 0.0  ;;  %v859_v24 = vpack.c.bf16 %v853_v62, %v852_v31  ;;  %v435_v28 = vadd.f32 %v2028_v33, %v434_v45  ;;  %1093 = vrot.lane.b32.xlu0 %v1085_v22, %s1789_s26  ;;  %605 = vrot.lane.b32.xlu1 %v596_v20, %s1790_s25  ;;  %v2106_v35 = vmul.f32 %v1975_v6, %v470_v23  ;;  %v499_v33 = vpop.permute.xlu1 %498 }
 0x11b   : > { %v2114_v31 = vmax.f32 %v443_v40, 0.0  ;;  %v2117_v22 = vmul.f32 %v1940_v52, %v470_v23  ;;  %v523_v49 = vmul.f32 %v494_v27, %v471_v44  ;;  %v2120_v20 = vmul.f32 %v1955_v59, %v471_v44  ;;  %v1735_v52 = vld [vmem:[%s2447_s5 + $0x58] sm:$0xff]   ;;  %1635 = vmatpush3.bf16.msra.mxu1 %v1734_v25 }
 0x11c   : > { %863 = vst.msk [vmem:[#allocation2 + $0x20] sm:$0xff] %vm533_vm3, %v859_v24  ;;  %v2123_v6 = vmax.f32 %v435_v28, 0.0  ;;  %v524_v32 = vmul.f32 %v499_v33, %v470_v23  ;;  %v996_v37 = vmul.f32 %v1938_v51, %v471_v44  ;;  %v2128_v10 = vsel %vm628_vm2, %v621_v21, %v622_v29  ;;  %1636 = vmatprep.subr.bf16.mxu1 %v1735_v52 }
 0x11d   : > { %v688_v59 = vmul.f32 %v1967_v2, %v2128_v10  ;;  %v689_v56 = vmul.f32 %v1969_v3, %v2085_v41  ;;  %v2474_v62 = vrot.slane %v2043_v53, 1  ;;  %v916_v29 = vmul.f32 %v1931_v46, %v2128_v10  ;;  %v833_v23 = vpop.permute.xlu0 %832 }
 0x11e   : > { %v530_v40 = vpack.c.bf16 %v524_v32, %v523_v49  ;;  %v2475_v2 = vrot.slane %v2050_v34, 7  ;;  %v2476_v63 = vrot.slane %v2040_v48, 7  ;;  %v838_v24 = vpop.permute.xlu1 %837  ;;  %v854_v46 = vmul.f32 %v833_v23, %v2100_v9  ;;  %v1736_v48 = vld [vmem:[%s2447_s5 + $0x18] sm:$0xff]  }
 0x11f   : > { %v2141_v51 = vsel %vm628_vm2, %v2474_v62, %v621_v21  ;;  %v1004_v21 = vpack.c.bf16 %v2117_v22, %v996_v37  ;;  %v695_v44 = vpack.c.bf16 %v689_v56, %v688_v59  ;;  %v855_v39 = vmul.f32 %v838_v24, %v2123_v6  ;;  %1637 = vmatpush3.bf16.msra.mxu1 %v1736_v48 }
 0x120   : > { %v915_v45 = vmul.f32 %v1927_v42, %v2141_v51  ;;  %v2153_v3 = vsel %vm464_vm1, %v2476_v63, %v2475_v2  ;;  %v458_v42 = vrot.slane %v2100_v9, 7  ;;  %535 = vst.msk [vmem:[#allocation2 + $0x18] sm:$0xff] %vm533_vm3, %v530_v40  ;;  %v592_v25 = vmul.f32 %v1983_v11, %v2100_v9 }
 0x121   : > { %v771_v28 = vmul.f32 %v1977_v7, %v2153_v3  ;;  %v1079_v33 = vmul.f32 %v1971_v4, %v2050_v34  ;;  %v1737_v7 = vld [vmem:[%s2447_s5 + $0x60] sm:$0xff]   ;;  %704 = vrot.lane.b32.xlu1 %v695_v44, %s1791_s15  ;;  %v2477_v49 = vmov %v2475_v2  ;;  %v1080_v11 = vmul.f32 %v1973_v5, %v2100_v9  ;;  %v504_v59 = vpop.permute.xlu0 %503 }
 0x122   : > { %v923_v27 = vpack.c.bf16 %v916_v29, %v915_v45  ;;  %v468_v32 = vsel %vm464_vm1, %v2477_v49, %v458_v42  ;;  %v2184_v4 = vmul.f32 %v1929_v43, %v2114_v31  ;;  %v860_v37 = vpack.c.bf16 %v855_v39, %v854_v46  ;;  %v509_v62 = vpop.permute.xlu1 %508  ;;  %1638 = vmatprep.subr.bf16.mxu1 %v1737_v7 }
 0x123   : > { %v777_v22 = vpack.c.bf16 %v771_v28, %v2106_v35  ;;  %v2188_v52 = vmul.f32 %v1997_v18, %v468_v32  ;;  %v2191_v35 = vmul.f32 %v1965_v1, %v468_v32  ;;  %v597_v56 = vpack.c.bf16 %v592_v25, %v2067_v57  ;;  %v1738_v1 = vld [vmem:[%s2447_s5 + $0x20] sm:$0xff]  }
 0x124   : > { %931 = vrot.lane.b32.xlu0 %v923_v27, %s1790_s25  ;;  %v525_v29 = vmul.f32 %v504_v59, %v2153_v3  ;;  %v1086_v5 = vpack.c.bf16 %v1080_v11, %v1079_v33  ;;  %v588_v43 = vmul.f32 %v1933_v47, %v2043_v53  ;;  %v2199_v40 = vmul.f32 %v1993_v16, %v2123_v6 }
 0x125   : > { %864 = vst.msk [vmem:[#allocation2 + $0x38] sm:$0xff] %vm533_vm3, %v860_v37  ;;  %v526_v18 = vmul.f32 %v509_v62, %v468_v32  ;;  %v1082_v57 = vmul.f32 %v1995_v17, %v2089_v50  ;;  %v624_v45 = vrot.slane %v2100_v9, 1  ;;  %v625_v23 = vrot.slane %v2123_v6, 1  ;;  %786 = vrot.lane.b32.xlu1 %v777_v22, %s1789_s26  ;;  %v1739_v17 = vld [vmem:[%s2447_s5 + $0x68] sm:$0xff]   ;;  %v1126_v24 = vpop.permute.xlu0 %1125  ;;  %1639 = vmatpush3.bf16.msra.mxu1 %v1738_v1  ;;  %v1743_v9 = vld [vmem:[%s2447_s5 + $0x78] sm:$0xff]  }
 0x126   : > { %v595_v47 = vpack.c.bf16 %v588_v43, %v2184_v4  ;;  %v627_v16 = vrot.slane %v2114_v31, 1  ;;  %v2214_v2 = vmul.f32 %v1947_v55, %v2141_v51  ;;  %v2218_v63 = vmul.f32 %v1957_v60, %v2085_v41  ;;  %v1121_v48 = vpop.permute.xlu1 %1120  ;;  %1640 = vmatprep.subr.bf16.mxu1 %v1739_v17  ;;  %v2481_v17 = vld [vmem:[#allocation6_spill] sm:$0xff] }
 0x127   : > { %v531_v44 = vpack.c.bf16 %v526_v18, %v525_v29  ;;  %v1087_v46 = vpack.c.bf16 %v1082_v57, %v2199_v40  ;;  %v2478_v28 = vrot.slane %v2050_v34, 1  ;;  %v631_v60 = vsel %vm628_vm2, %v624_v45, %v625_v23  ;;  %v1740_v34 = vld [vmem:[%s2447_s5 + $0x28] sm:$0xff]  }
 0x128   : > { %1012 = vrot.lane.b32.xlu0 %v1004_v21, %s1791_s15  ;;  %v1159_v27 = vmul.f32 %v1126_v24, %v2085_v41  ;;  %v2241_v25 = vmul.f32 %v1991_v15, %v631_v60  ;;  %v1158_v33 = vmul.f32 %v1121_v48, %v2128_v10  ;;  %v2249_v41 = vmul.f32 %v1979_v8, %v631_v60  ;;  %v2482_v24 = vld [vmem:[#allocation13_spill] sm:$0xff] }
 0x129   : > { %v632_v55 = vsel %vm628_vm2, %v2478_v28, %v624_v45  ;;  %536 = vst.msk [vmem:[#allocation2 + $0x30] sm:$0xff] %vm533_vm3, %v531_v44  ;;  %v2259_v15 = vmul.f32 %v1963_v0, %v2153_v3  ;;  %607 = vrot.lane.b32.xlu1 %v597_v56, %s1790_s25  ;;  %v461_v10 = vrot.slane %v2114_v31, 7  ;;  %v459_v22 = vrot.slane %v2123_v6, 7  ;;  %v1136_v32 = vpop.permute.xlu0 %1135  ;;  %1641 = vmatpush3.bf16.msra.mxu1 %v1740_v34 }
 0x12a   : > { %v2235_v39 = vmul.f32 %v1989_v14, %v632_v55  ;;  %v2238_v21 = vmul.f32 %v1959_v61, %v632_v55  ;;  %v2479_v14 = vrot.slane %v2043_v53, 1  ;;  %v1166_v49 = vpack.c.bf16 %v1159_v27, %v1158_v33  ;;  %v1131_v4 = vpop.permute.xlu1 %1130  ;;  %v2486_v33 = vld [vmem:[#allocation8_spill] sm:$0xff] }
 0x12b   : > { %v1005_v0 = vpack.c.bf16 %v2191_v35, %v2259_v15  ;;  %v460_v3 = vrot.slane %v2089_v50, 7  ;;  %v626_v11 = vrot.slane %v2089_v50, 1  ;;  %v1161_v37 = vmul.f32 %v1136_v32, %v631_v60  ;;  %v2485_v60 = vld [vmem:[#allocation10_spill] sm:$0xff] }
 0x12c   : > { %v2255_v61 = vsel %vm628_vm2, %v627_v16, %v2479_v14  ;;  %v924_v8 = vpack.c.bf16 %v2238_v21, %v2218_v63  ;;  %1095 = vrot.lane.b32.xlu0 %v1086_v5, %s1789_s26  ;;  %v2480_v56 = vrot.slane %v2043_v53, 7  ;;  %v467_v29 = vsel %vm464_vm1, %v458_v42, %v459_v22  ;;  %v1742_v5 = vld [vmem:[%s2447_s5 + $0x30] sm:$0xff]   ;;  %1170 = vst.msk [vmem:[#allocation2 + $0x10] sm:$0xff] %vm533_vm3, %v1166_v49 }
 0x12d   : > { %v686_v7 = vmul.f32 %v1945_v54, %v2255_v61  ;;  %v1741_v54 = vld [vmem:[%s2447_s5 + $0x70] sm:$0xff]   ;;  %v1160_v43 = vmul.f32 %v1131_v4, %v632_v55  ;;  %v466_v18 = vsel %vm464_vm1, %v459_v22, %v460_v3  ;;  %603 = vrot.lane.b32.xlu1 %v595_v47, %s1790_s25  ;;  %v2484_v55 = vld [vmem:[#allocation9_spill] sm:$0xff]  ;;  %v594_v48 = vmul.f32 %v2485_v60, %v2089_v50 }
 0x12e   : > { %v472_v62 = vsel %vm464_vm1, %v461_v10, %v2480_v56  ;;  %1642 = vmatprep.subr.bf16.mxu1 %v1741_v54  ;;  %v2300_v42 = vmul.f32 %v2021_v30, %v466_v18  ;;  %v2303_v57 = vmul.f32 %v1987_v13, %v466_v18  ;;  %v630_v30 = vsel %vm628_vm2, %v625_v23, %v626_v11  ;;  %v848_v47 = vpop.permute.xlu1 %847  ;;  %v2487_v4 = vld [vmem:[#allocation17_spill] sm:$0xff] }
 0x12f   : > { %v694_v59 = vpack.c.bf16 %v2214_v2, %v686_v7  ;;  %v2290_v40 = vmul.f32 %v2052_v36, %v472_v62  ;;  %v768_v1 = vmul.f32 %v1953_v58, %v472_v62  ;;  %v2306_v36 = vmul.f32 %v1999_v19, %v467_v29  ;;  %v843_v2 = vpop.permute.xlu0 %842  ;;  %1643 = vmatpush3.bf16.msra.mxu1 %v1742_v5  ;;  %v2492_v5 = vld [vmem:[#allocation16_spill] sm:$0xff] }
 0x130   : > { %v2309_v58 = vmul.f32 %v1985_v12, %v467_v29  ;;  %1097 = vrot.lane.b32.xlu0 %v1087_v46, %s1789_s26  ;;  %v1167_v45 = vpack.c.bf16 %v1161_v37, %v1160_v43  ;;  %v629_v13 = vsel %vm628_vm2, %v626_v11, %v627_v16  ;;  %v856_v19 = vmul.f32 %v843_v2, %v2089_v50  ;;  %v2483_v16 = vld [vmem:[#allocation7_spill] sm:$0xff] }
 0x131   : > { %v776_v63 = vpack.c.bf16 %v2120_v20, %v768_v1  ;;  %v2321_v12 = vmul.f32 %v2013_v26, %v630_v30  ;;  %v920_v44 = vmul.f32 %v2481_v17, %v630_v30  ;;  %v2325_v46 = vmul.f32 %v2482_v24, %v629_v13  ;;  %v1744_v20 = vld [vmem:[%s2447_s5 + $0x38] sm:$0xff]   ;;  %1644 = vmatprep.subr.bf16.mxu1 %v1743_v9  ;;  %v2493_v1 = vld [vmem:[#allocation18_spill] sm:$0xff]  ;;  %v2494_v9 = vld [vmem:[#allocation19_spill] sm:$0xff] }
 0x132   : > { %1171 = vst.msk [vmem:[#allocation2 + $0x28] sm:$0xff] %vm533_vm3, %v1167_v45  ;;  %v857_v23 = vmul.f32 %v848_v47, %v2114_v31  ;;  %v921_v28 = vmul.f32 %v2483_v16, %v629_v13  ;;  %v593_v26 = vmul.f32 %v2484_v55, %v2123_v6  ;;  %702 = vrot.lane.b32.xlu1 %v694_v59, %s1791_s15  ;;  %v519_v49 = vpop.permute.xlu1 %518  ;;  %v2489_v59 = vld [vmem:[#allocation12_spill] sm:$0xff]  ;;  %v1117_v45 = vld [vmem:[#allocation3 + $0x238] sm:$0xff] }
 0x133   : > { %v925_v27 = vpack.c.bf16 %v920_v44, %v2249_v41  ;;  %v1006_v21 = vpack.c.bf16 %v2303_v57, %v2309_v58  ;;  %v696_v34 = vpack.c.bf16 %v2241_v25, %v2235_v39  ;;  %v922_v14 = vmul.f32 %v2486_v33, %v2255_v61  ;;  %v514_v7 = vpop.permute.xlu0 %513  ;;  %v1176_v11 = vld [vmem:[#allocation2 + $0x10] sm:$0xff]  ;;  %v2488_v25 = vld [vmem:[#allocation11_spill] sm:$0xff]  ;;  %1645 = vmatpush3.bf16.msra.mxu1 %v1744_v20 }
 0x134   : > { %933 = vrot.lane.b32.xlu0 %v924_v8, %s1790_s25  ;;  %v861_v6 = vpack.c.bf16 %v857_v23, %v856_v19  ;;  %v598_v22 = vpack.c.bf16 %v594_v48, %v593_v26  ;;  %v778_v50 = vpack.c.bf16 %v2306_v36, %v2188_v52  ;;  %v465_v41 = vsel %vm464_vm1, %v460_v3, %v461_v10  ;;  %v2490_v52 = vld [vmem:[#allocation14_spill] sm:$0xff]  ;;  %v2491_v3 = vld [vmem:[#allocation15_spill] sm:$0xff]  ;;  %v1116_v57 = vld [vmem:[#allocation3 + $0x230] sm:$0xff] }
 0x135   : > { %v527_v32 = vmul.f32 %v514_v7, %v467_v29  ;;  %v926_v54 = vpack.c.bf16 %v922_v14, %v921_v28  ;;  %v521_v39 = vmul.f32 %v2487_v4, %v465_v41  ;;  %v1002_v37 = vmul.f32 %v2488_v25, %v465_v41  ;;  %1690 = vmatprep.mubr.msk.bf16.mxu0 %vm533_vm3, %v1176_v11 }
 0x136   : > { %865 = vst.msk [vmem:[#allocation2 + $0x50] sm:$0xff] %vm533_vm3, %v861_v6  ;;  %v528_v8 = vmul.f32 %v519_v49, %v466_v18  ;;  %v1003_v56 = vmul.f32 %v2489_v59, %v472_v62  ;;  %v697_v38 = vpack.c.bf16 %v2325_v46, %v2321_v12  ;;  %v1083_v10 = vmul.f32 %v2490_v52, %v2114_v31  ;;  %v1141_v2 = vpop.permute.xlu1 %1140 }
 0x137   : > { %784 = vrot.lane.b32.xlu1 %v776_v63, %s1789_s26  ;;  %v1084_v29 = vmul.f32 %v2491_v3, %v2043_v53  ;;  %v775_v43 = vmul.f32 %v2492_v5, %v465_v41  ;;  %v858_v18 = vpack.c.bf16 %v2494_v9, %v2493_v1  ;;  %v1146_v36 = vpop.permute.xlu0 %1145  ;;  %v529_v31 = vpack.c.bf16 %v2290_v40, %v521_v39 }
 0x138   : > { %1014 = vrot.lane.b32.xlu0 %v1005_v0, %s1791_s15  ;;  %v532_v62 = vpack.c.bf16 %v528_v8, %v527_v32  ;;  %v1007_v58 = vpack.c.bf16 %v1003_v56, %v1002_v37  ;;  %v1163_v63 = vmul.f32 %v1146_v36, %v629_v13  ;;  %v1162_v12 = vmul.f32 %v1141_v2, %v630_v30 }
 0x139   : > { %v1179_v53 = vld [vmem:[#allocation2 + $0x28] sm:$0xff]  ;;  %v1088_v47 = vpack.c.bf16 %v1084_v29, %v1083_v10  ;;  %v779_v19 = vpack.c.bf16 %v775_v43, %v2300_v42  ;;  %862 = vst.msk [vmem:[#allocation2 + $0x8] sm:$0xff] %vm533_vm3, %v858_v18  ;;  %534 = vst.msk [vmem:[#allocation2] sm:$0xff] %vm533_vm3, %v529_v31 }
 0x13a   : > { %537 = vst.msk [vmem:[#allocation2 + $0x48] sm:$0xff] %vm533_vm3, %v532_v62  ;;  %1691 = vmatmul.mubr.msk.bf16.vlgmr.msra.gmra.mrb[8].mxu0 %vm533_vm3, %v1179_v53  ;;  %v1168_v35 = vpack.c.bf16 %v1163_v63, %v1162_v12 }
 0x13b   : > { %1150 = vperm.xlu1 %1725, %v1116_v57  }
 0x13c   : > { %1155 = vperm.xlu0 %1724, %v1117_v45   ;;  %1172 = vst.msk [vmem:[#allocation2 + $0x40] sm:$0xff] %vm533_vm3, %v1168_v35 }
 0x13f   : > { %609 = vrot.lane.b32.xlu1 %v598_v22, %s1790_s25 }
 0x140   : > { %935 = vrot.lane.b32.xlu0 %v925_v27, %s1790_s25 }
 0x143   : > { %706 = vrot.lane.b32.xlu1 %v696_v34, %s1791_s15  ;;  %v1182_v15 = vld [vmem:[#allocation2 + $0x40] sm:$0xff] }
 0x144   : > { %1016 = vrot.lane.b32.xlu0 %v1006_v21, %s1791_s15  ;;  %1694 = vmatprep.mubr.msk.bf16.mxu0 %vm533_vm3, %v1182_v15 }
 0x147   : > { %788 = vrot.lane.b32.xlu1 %v778_v50, %s1789_s26 }
 0x148   : > { %937 = vrot.lane.b32.xlu0 %v926_v54, %s1790_s25 }
 0x14b   : > { %708 = vrot.lane.b32.xlu1 %v697_v38, %s1791_s15 }
 0x14c   : > { %1018 = vrot.lane.b32.xlu0 %v1007_v58, %s1791_s15 }
 0x14f   : > { %790 = vrot.lane.b32.xlu1 %v779_v19, %s1789_s26 }
 0x150   : > { %1099 = vrot.lane.b32.xlu0 %v1088_v47, %s1789_s26  ;;  %s1792_s26 = smov 16  }
 0x18c   : > { %v606_v0 = vpop.permute.xlu1 %605  ;;  %v1094_v40 = vpop.permute.xlu0 %1093 }
 0x18d   : > { %617 = vst.msk [vmem:[#allocation2 + $0x18] sm:$0xff] %vm615_vm4, %v606_v0 }
 0x193   : > { %v705_v42 = vpop.permute.xlu1 %704 }
 0x194   : > { %716 = vst.msk [vmem:[#allocation2 + $0x18] sm:$0xff] %vm714_vm5, %v705_v42 }
 0x196   : > { %v932_v30 = vpop.permute.xlu0 %931 }
 0x197   : > { %943 = vst.msk [vmem:[#allocation2 + $0x8] sm:$0xff] %vm615_vm4, %v932_v30  ;;  %v787_v13 = vpop.permute.xlu1 %786 }
 0x198   : > { %798 = vst.msk [vmem:[#allocation2 + $0x18] sm:$0xff] %vm796_vm6, %v787_v13 }
 0x19a   : > { %v1013_v17 = vpop.permute.xlu0 %1012 }
 0x19b   : > { %1024 = vst.msk [vmem:[#allocation2 + $0x8] sm:$0xff] %vm714_vm5, %v1013_v17  ;;  %v608_v44 = vpop.permute.xlu1 %607 }
 0x19c   : > { %1105 = vst.msk [vmem:[#allocation2 + $0x8] sm:$0xff] %vm796_vm6, %v1094_v40 }
 0x19d   : > { %618 = vst.msk [vmem:[#allocation2 + $0x30] sm:$0xff] %vm615_vm4, %v608_v44 }
 0x19e   : > { %v1096_v24 = vpop.permute.xlu0 %1095 }
 0x19f   : > { %v604_v46 = vpop.permute.xlu1 %603  ;;  %v1177_v27 = vld [vmem:[#allocation2 + $0x18] sm:$0xff] }
 0x1a0   : > { %616 = vst.msk [vmem:[#allocation2] sm:$0xff] %vm615_vm4, %v604_v46 }
 0x1a2   : > { %v1098_v20 = vpop.permute.xlu0 %1097 }
 0x1a3   : > { %v1175_v23 = vld [vmem:[#allocation2 + $0x8] sm:$0xff] }
 0x1a4   : > { %1374 = vmatprep.mubr.bf16.mxu1 %v1175_v23  ;;  %v703_v16 = vpop.permute.xlu1 %702 }
 0x1a5   : > { %715 = vst.msk [vmem:[#allocation2] sm:$0xff] %vm714_vm5, %v703_v16 }
 0x1a6   : > { %v934_v28 = vpop.permute.xlu0 %933 }
 0x1a7   : > { %944 = vst.msk [vmem:[#allocation2 + $0x20] sm:$0xff] %vm615_vm4, %v934_v28 }
 0x1a9   : > { %v785_v55 = vpop.permute.xlu1 %784 }
 0x1aa   : > { %v1015_v26 = vpop.permute.xlu0 %1014  ;;  %797 = vst.msk [vmem:[#allocation2] sm:$0xff] %vm796_vm6, %v785_v55 }
 0x1ab   : > { %1025 = vst.msk [vmem:[#allocation2 + $0x20] sm:$0xff] %vm714_vm5, %v1015_v26 }
 0x1ac   : > { %1106 = vst.msk [vmem:[#allocation2 + $0x20] sm:$0xff] %vm796_vm6, %v1096_v24 }
 0x1b1   : > { %v1174_v60 = vld [vmem:[#allocation2] sm:$0xff] }
 0x1b2   : > { %1375 = vmatmul.mubr.bf16.vlgmr.msra.gmra.mrb[0].mxu1 %v1174_v60 }
 0x1b3   : > { %v1178_v48 = vld [vmem:[#allocation2 + $0x20] sm:$0xff] }
 0x1b4   : > { %1382 = vmatprep.mubr.bf16.mxu1 %v1178_v48 }
 0x1ba   : > { %v1151_v21 = vpop.permute.xlu1 %1150  ;;  %1383 = vmatmul.mubr.bf16.gmra.mrb[4].mxu1 %v1177_v27 }
 0x1bb   : > { %v1156_v34 = vpop.permute.xlu0 %1155  ;;  %v1164_v33 = vmul.f32 %v1151_v21, %v2255_v61 }
 0x1bc   : > { %v1165_v14 = vmul.f32 %v1156_v34, %v2141_v51 }
 0x1be   : > { %v1169_v6 = vpack.c.bf16 %v1165_v14, %v1164_v33  ;;  %v610_v7 = vpop.permute.xlu1 %609 }
 0x1bf   : > { %v936_v22 = vpop.permute.xlu0 %935  ;;  %619 = vst.msk [vmem:[#allocation2 + $0x48] sm:$0xff] %vm615_vm4, %v610_v7 }
 0x1c0   : > { %1173 = vst.msk [vmem:[#allocation2 + $0x58] sm:$0xff] %vm533_vm3, %v1169_v6 }
 0x1c1   : > { %945 = vst.msk [vmem:[#allocation2 + $0x38] sm:$0xff] %vm615_vm4, %v936_v22 }
 0x1c2   : > { %v707_v50 = vpop.permute.xlu1 %706 }
 0x1c3   : > { %v1017_v41 = vpop.permute.xlu0 %1016  ;;  %717 = vst.msk [vmem:[#allocation2 + $0x30] sm:$0xff] %vm714_vm5, %v707_v50 }
 0x1c4   : > { %1026 = vst.msk [vmem:[#allocation2 + $0x38] sm:$0xff] %vm714_vm5, %v1017_v41 }
 0x1c5   : > { %1107 = vst.msk [vmem:[#allocation2 + $0x38] sm:$0xff] %vm796_vm6, %v1098_v20 }
 0x1c6   : > { %v789_v61 = vpop.permute.xlu1 %788 }
 0x1c7   : > { %v938_v49 = vpop.permute.xlu0 %937  ;;  %799 = vst.msk [vmem:[#allocation2 + $0x30] sm:$0xff] %vm796_vm6, %v789_v61  ;;  %v1185_v51 = vld [vmem:[#allocation2 + $0x58] sm:$0xff] }
 0x1c8   : > { %946 = vst.msk [vmem:[#allocation2 + $0x50] sm:$0xff] %vm615_vm4, %v938_v49  ;;  %1695 = vmatmul.mubr.msk.bf16.gmra.mrb[12].mxu0 %vm533_vm3, %v1185_v51 }
 0x1ca   : > { %v709_v32 = vpop.permute.xlu1 %708 }
 0x1cb   : > { %v1019_v11 = vpop.permute.xlu0 %1018  ;;  %718 = vst.msk [vmem:[#allocation2 + $0x48] sm:$0xff] %vm714_vm5, %v709_v32 }
 0x1cc   : > { %1027 = vst.msk [vmem:[#allocation2 + $0x50] sm:$0xff] %vm714_vm5, %v1019_v11  ;;  %v1181_v54 = vld [vmem:[#allocation2 + $0x38] sm:$0xff] }
 0x1cd   : > { %1390 = vmatprep.mubr.bf16.mxu1 %v1181_v54 }
 0x1ce   : > { %v791_v4 = vpop.permute.xlu1 %790  ;;  %v1180_v39 = vld [vmem:[#allocation2 + $0x30] sm:$0xff] }
 0x1cf   : > { %v1100_v25 = vpop.permute.xlu0 %1099  ;;  %800 = vst.msk [vmem:[#allocation2 + $0x48] sm:$0xff] %vm796_vm6, %v791_v4  ;;  %1391 = vmatmul.mubr.bf16.gmra.mrb[8].mxu1 %v1180_v39 }
 0x1d0   : > { %1108 = vst.msk [vmem:[#allocation2 + $0x50] sm:$0xff] %vm796_vm6, %v1100_v25 }
 0x1d6   : > { %v1183_v37 = vld [vmem:[#allocation2 + $0x48] sm:$0xff] }
 0x1d7   : > { %v1184_v8 = vld [vmem:[#allocation2 + $0x50] sm:$0xff] }
 0x1d8   : > { %1398 = vmatprep.mubr.bf16.mxu1 %v1184_v8 }
 0x1d9   : > { %1399 = vmatmul.mubr.bf16.gmra.mrb[12].mxu1 %v1183_v37 }
 0x20d   : > { %v1692_v59 = vpop.f32.mrb[8].mxu0 }
 0x20e   : > { %v1441_v56 = vpop.f32.mrb[9].mxu0 }
 0x20f   : > { %v1693_v38 = vpop.f32.mrb[10].mxu0 }
 0x210   : > { %v1444_v52 = vpop.f32.mrb[11].mxu0 }
 0x285   : > { %v1646_v10 = vpop.f32.mrb[0].mxu1 }
 0x286   : > { %v1647_v3 = vpop.f32.mrb[1].mxu1 }
 0x287   : > { %v1648_v29 = vadd.f32 %v1647_v3, %v1646_v10  ;;  %v1649_v5 = vpop.f32.mrb[2].mxu1 }
 0x288   : > { %v1650_v43 = vpop.f32.mrb[3].mxu1 }
 0x289   : > { %v1442_v1 = vadd.f32 %v1648_v29, %v1441_v56  ;;  %v1651_v9 = vadd.f32 %v1650_v43, %v1649_v5 }
 0x28b   : > { %v1445_v18 = vadd.f32 %v1651_v9, %v1444_v52  ;;  %1480 = vrot.lane.b32.xlu0 %v1442_v1, %s1792_s26 }
 0x28d   : > { %1482 = vrot.lane.b32.xlu1 %v1445_v18, %s1792_s26  ;;  %v1652_v62 = vpop.f32.mrb[4].mxu1 }
 0x28e   : > { %v1653_v57 = vpop.f32.mrb[5].mxu1 }
 0x28f   : > { %v1654_v36 = vadd.f32 %v1653_v57, %v1652_v62  ;;  %v1655_v58 = vpop.f32.mrb[6].mxu1 }
 0x290   : > { %v1656_v31 = vpop.f32.mrb[7].mxu1 }
 0x291   : > { %v1450_v45 = vadd.f32 %v1692_v59, %v1654_v36  ;;  %v1657_v2 = vadd.f32 %v1656_v31, %v1655_v58 }
 0x293   : > { %v1453_v63 = vadd.f32 %v1693_v38, %v1657_v2  ;;  %1484 = vrot.lane.b32.xlu0 %v1450_v45, %s1792_s26 }
 0x295   : > { %1486 = vrot.lane.b32.xlu1 %v1453_v63, %s1792_s26 }
 0x29b   : > { %v1696_v53 = vpop.f32.mrb[12].mxu0 }
 0x29c   : > { %v1457_v47 = vpop.f32.mrb[13].mxu0 }
 0x29d   : > { %v1697_v19 = vpop.f32.mrb[14].mxu0 }
 0x29e   : > { %v1460_v12 = vpop.f32.mrb[15].mxu0 }
 0x2a2   : > { %v1658_v35 = vpop.f32.mrb[8].mxu1 }
 0x2a3   : > { %v1659_v15 = vpop.f32.mrb[9].mxu1 }
 0x2a4   : > { %v1660_v0 = vadd.f32 %v1659_v15, %v1658_v35  ;;  %v1661_v40 = vpop.f32.mrb[10].mxu1 }
 0x2a5   : > { %v1662_v42 = vpop.f32.mrb[11].mxu1 }
 0x2a6   : > { %v1458_v30 = vadd.f32 %v1660_v0, %v1457_v47  ;;  %v1663_v13 = vadd.f32 %v1662_v42, %v1661_v40 }
 0x2a8   : > { %v1461_v17 = vadd.f32 %v1663_v13, %v1460_v12  ;;  %1488 = vrot.lane.b32.xlu0 %v1458_v30, %s1792_s26 }
 0x2aa   : > { %1490 = vrot.lane.b32.xlu1 %v1461_v17, %s1792_s26 }
 0x2ac   : > { %v1664_v44 = vpop.f32.mrb[12].mxu1 }
 0x2ad   : > { %v1665_v24 = vpop.f32.mrb[13].mxu1 }
 0x2ae   : > { %v1666_v46 = vadd.f32 %v1665_v24, %v1664_v44  ;;  %v1667_v20 = vpop.f32.mrb[14].mxu1 }
 0x2af   : > { %v1668_v23 = vpop.f32.mrb[15].mxu1 }
 0x2b0   : > { %v1466_v16 = vadd.f32 %v1696_v53, %v1666_v46  ;;  %v1669_v28 = vadd.f32 %v1668_v23, %v1667_v20 }
 0x2b2   : > { %v1469_v55 = vadd.f32 %v1697_v19, %v1669_v28  ;;  %1492 = vrot.lane.b32.xlu0 %v1466_v16, %s1792_s26 }
 0x2b4   : > { %1494 = vrot.lane.b32.xlu1 %v1469_v55, %s1792_s26 }
 0x2fd   : > { %v1481_v26 = vpop.permute.xlu0 %1480 }
 0x2fe   : > { %1505 = vst.msk [vmem:[%s1888_s27] sm:$0xff] %vm1504_vm7, %v1481_v26 }
 0x2ff   : > { %v1483_v60 = vpop.permute.xlu1 %1482 }
 0x300   : > { %1506 = vst.msk [vmem:[%s1888_s27 + $0x8] sm:$0xff] %vm1504_vm7, %v1483_v60 }
 0x305   : > { %v1485_v48 = vpop.permute.xlu0 %1484 }
 0x306   : > { %1507 = vst.msk [vmem:[%s1888_s27 + $0x10] sm:$0xff] %vm1504_vm7, %v1485_v48 }
 0x307   : > { %v1487_v27 = vpop.permute.xlu1 %1486 }
 0x308   : > { %1508 = vst.msk [vmem:[%s1888_s27 + $0x18] sm:$0xff] %vm1504_vm7, %v1487_v27 }
 0x31a   : > { %v1489_v21 = vpop.permute.xlu0 %1488 }
 0x31b   : > { %1509 = vst.msk [vmem:[%s1888_s27 + $0x20] sm:$0xff] %vm1504_vm7, %v1489_v21 }
 0x31c   : > { %v1491_v34 = vpop.permute.xlu1 %1490 }
 0x31d   : > { %1510 = vst.msk [vmem:[%s1888_s27 + $0x28] sm:$0xff] %vm1504_vm7, %v1491_v34 }
 0x324   : > { %v1493_v33 = vpop.permute.xlu0 %1492 }
 0x325   : > { %1511 = vst.msk [vmem:[%s1888_s27 + $0x30] sm:$0xff] %vm1504_vm7, %v1493_v33 }
 0x326   : > { %v1495_v14 = vpop.permute.xlu1 %1494 }
 0x327   : > { %1512 = vst.msk [vmem:[%s1888_s27 + $0x38] sm:$0xff] %vm1504_vm7, %v1495_v14 }
 0x328 PF: > { %s18_s24 = sadd.s32 1, %s1783_s24  }
 0x329   : > { %p15_p3 = scmp.ge.s32.totalorder %s18_s24, 4  }
 0x32b   :  { %17 = sbr.rel (!%p15_p3) target bundleno = 1 (0x1), region = 91 }
 0x332   :  { %1534 = vsyncpa [#allocation4], 1 }
 0x333   :  { %1536 = vsyncpa [#allocation4 + $0x1], 1 }

// kernel: dense_block_forward.4
= control target key start
LH: loop header
LB: loop body
LE: loop exit
PB: predicated region body
PF: predicated region fallthrough
CT: control target
= control target key end

     0   :  { %s1834_s24 = smov 0   ;;  %s2618_s0 = inlined_call_operand.vmem [shape: f32[2,8,8,24], index: 0, kind: input, shape index: {}]   ;;  %s2619_s1 = inlined_call_operand.vmem [shape: f32[1,24], index: 1, kind: input, shape index: {}]   ;;  %s2620_s2 = inlined_call_operand.vmem [shape: f32[1,24], index: 2, kind: input, shape index: {}]   ;;  %s2621_s3 = inlined_call_operand.vmem [shape: bf16[24,32], index: 3, kind: input, shape index: {}]   ;;  %s2622_s4 = inlined_call_operand.vmem [shape: f32[1,32], index: 4, kind: input, shape index: {}]   ;;  %s2623_s5 = inlined_call_operand.vmem [shape: bf16[288,8], index: 5, kind: input, shape index: {}]   ;;  %s2624_s6 = inlined_call_operand.vmem [shape: f32[9,64,1], index: 6, kind: input, shape index: {}]   ;;  %s2625_s7 = inlined_call_operand.vmem [shape: f32[2,8,8,32], index: 7, kind: output, shape index: {}]  }
   0x1 LB: > { %s1561_s25 = sadd.s32 4294967295, %s1787_s24   ;;  %p1565_p0 = scmp.ge.s32.totalorder %s1787_s24, 1  ;;  %s1787_s24 = sphi %s1834_s24, %s17_s24  }
   0x2   : > { %p237_p1 = scmp.lt.s32.totalorder %s1787_s24, 3 }
   0x4   : > { %p238_p2 = pnand %p1565_p0, %p237_p1 }
   0x6   : > { %241 = sbr.rel (%p238_p2) target bundleno = 779 (0x30b), region = 48 }
   0xd   : > { %v1579_v0 = vld [vmem:[%s2624_s6 + $0x40] sm:$0xff]  ;;  %p269_p3 = scmp.lt.s32.totalorder %s1561_s25, 1  ;;  %v1789_v2 = vmov 0   ;;  %v1580_v3 = vld [vmem:[%s2624_s6 + $0x48] sm:$0xff]  ;;  %vm370_vm0 = vcmask 1043456   ;;  %vm288_vm1 = vcmask 195584  }
   0xe   : > { %v1611_v1 = vld [vmem:[%s2624_s6 + $0x140] sm:$0xff]  ;;  %1760 = vset.pattern.permute.xlu1 %v1789_v2  ;;  %1759 = vset.pattern.permute.xlu0 %v1789_v2  ;;  %v1612_v5 = vld [vmem:[%s2624_s6 + $0x148] sm:$0xff]  ;;  %v1614_v54 = vld [vmem:[%s2624_s6 + $0x158] sm:$0xff]  ;;  %vm526_vm4 = vcmask 261120   ;;  %s1790_s26 = smov 96   ;;  %s1791_s10 = smov 32  }
   0xf   : > { %542 = vperm.xlu1 %1760, %v1579_v0   ;;  %870 = vperm.xlu0 %1759, %v1611_v1   ;;  %v1761_v4 = vld [vmem:[%s2621_s3] sm:$0xff]   ;;  %s2670_s25 = smov (!%p269_p3, %s1561_s25), 1  ;;  %v1762_v6 = vld [vmem:[%s2621_s3 + $0x8] ss:$0 sps:$4 sm:$0xff]   ;;  %v1613_v55 = vld [vmem:[%s2624_s6 + $0x150] sm:$0xff]  ;;  %vm608_vm5 = vcmask 523520  }
  0x10   : > { %1721 = vmatprep.subr.bf16.mxu0 %v1761_v4  ;;  %s1667_s15 = sshll.u32 %s2670_s25, 6  ;;  %v1570_v7 = vld [vmem:[%s2619_s1] ss:$0 sm:$0xff]  ;;  %v1620_v8 = vld [vmem:[%s2624_s6 + $0x188] sm:$0xff]  ;;  %v372_v10 = vsel %vm370_vm0, %v1762_v6, 0  ;;  %v1582_v56 = vld [vmem:[%s2624_s6 + $0x58] sm:$0xff] }
  0x11   : > { %1722 = vmatpush3.bf16.msra.mxu0 %v1761_v4  ;;  %s273_s22 = scalar_lea.vmem %s2618_s0, %s1667_s15  ;;  %s1872_s27 = scalar_lea.vmem %s2625_s7, %s1667_s15  ;;  %v1571_v9 = vld [vmem:[%s2620_s2] ss:$0 sm:$0xff]  ;;  %v1588_v32 = vld [vmem:[%s2624_s6 + $0x88] sm:$0xff]  ;;  %v1581_v57 = vld [vmem:[%s2624_s6 + $0x50] sm:$0xff]  ;;  %vm707_vm6 = vcmask 785920   ;;  %vm789_vm7 = vcmask 1048320  }
  0x12   : > { %v280_v11 = vld [vmem:[%s273_s22] sm:$0xff]  ;;  %v281_v12 = vld [vmem:[%s273_s22 + $0x8] sm:$0xff]  ;;  %v282_v13 = vld [vmem:[%s273_s22 + $0x10] sm:$0xff]  ;;  %1745 = vmatprep.subr.msk.bf16.mxu0 %vm370_vm0, %v1762_v6  ;;  %s1792_s15 = smov 64   ;;  %vm1497_vm8 = vcmask 261312  }
  0x13   : > { %547 = vperm.xlu1 %1760, %v1580_v3   ;;  %875 = vperm.xlu0 %1759, %v1612_v5   ;;  %v1619_v14 = vld [vmem:[%s2624_s6 + $0x180] sm:$0xff]  ;;  %v304_v15 = vmul.f32 %v1570_v7, %v280_v11  ;;  %v305_v16 = vmul.f32 %v1570_v7, %v281_v12  ;;  %289 = vst.msk [vmem:[%s1872_s27] sm:$0xff] %vm288_vm1, %v280_v11  ;;  %290 = vst.msk [vmem:[%s1872_s27 + $0x8] sm:$0xff] %vm288_vm1, %v281_v12  ;;  %v283_v17 = vld [vmem:[%s273_s22 + $0x18] sm:$0xff] }
  0x14   : > { %v306_v18 = vmul.f32 %v1570_v7, %v282_v13  ;;  %291 = vst.msk [vmem:[%s1872_s27 + $0x10] sm:$0xff] %vm288_vm1, %v282_v13  ;;  %v284_v19 = vld [vmem:[%s273_s22 + $0x20] sm:$0xff]  ;;  %v307_v20 = vmul.f32 %v1570_v7, %v283_v17  ;;  %292 = vst.msk [vmem:[%s1872_s27 + $0x18] sm:$0xff] %vm288_vm1, %v283_v17  ;;  %v285_v21 = vld [vmem:[%s273_s22 + $0x28] sm:$0xff] }
  0x15   : > { %v308_v22 = vmul.f32 %v1570_v7, %v284_v19  ;;  %293 = vst.msk [vmem:[%s1872_s27 + $0x20] sm:$0xff] %vm288_vm1, %v284_v19  ;;  %v286_v23 = vld [vmem:[%s273_s22 + $0x30] sm:$0xff]  ;;  %v287_v24 = vld [vmem:[%s273_s22 + $0x38] sm:$0xff]  ;;  %1724 = vmatpush3.bf16.msra.mxu0 %v372_v10  ;;  %v319_v25 = vadd.f32 %v1571_v9, %v304_v15  ;;  %v320_v26 = vadd.f32 %v1571_v9, %v305_v16  ;;  %294 = vst.msk [vmem:[%s1872_s27 + $0x28] sm:$0xff] %vm288_vm1, %v285_v21 }
  0x16   : > { %v321_v27 = vadd.f32 %v1571_v9, %v306_v18  ;;  %v309_v28 = vmul.f32 %v1570_v7, %v285_v21  ;;  %295 = vst.msk [vmem:[%s1872_s27 + $0x30] sm:$0xff] %vm288_vm1, %v286_v23  ;;  %296 = vst.msk [vmem:[%s1872_s27 + $0x38] sm:$0xff] %vm288_vm1, %v287_v24  ;;  %v322_v29 = vadd.f32 %v1571_v9, %v307_v20  ;;  %v1587_v33 = vld [vmem:[%s2624_s6 + $0x80] sm:$0xff]  ;;  %v1628_v46 = vld [vmem:[%s2624_s6 + $0x1c8] sm:$0xff] }
  0x17   : > { %956 = vperm.xlu1 %1760, %v1620_v8   ;;  %951 = vperm.xlu0 %1759, %v1619_v14   ;;  %v323_v30 = vadd.f32 %v1571_v9, %v308_v22  ;;  %v310_v31 = vmul.f32 %v1570_v7, %v286_v23  ;;  %v327_v34 = vmax.f32 %v319_v25, 0.0  ;;  %v328_v35 = vmax.f32 %v320_v26, 0.0  ;;  %v1627_v47 = vld [vmem:[%s2624_s6 + $0x1c0] sm:$0xff]  ;;  %v1596_v51 = vld [vmem:[%s2624_s6 + $0xc8] sm:$0xff]  ;;  %v1622_v58 = vld [vmem:[%s2624_s6 + $0x198] sm:$0xff] }
  0x18   : > { %v329_v36 = vmax.f32 %v321_v27, 0.0  ;;  %v324_v37 = vadd.f32 %v1571_v9, %v309_v28  ;;  %v330_v38 = vmax.f32 %v322_v29, 0.0  ;;  %v311_v40 = vmul.f32 %v1570_v7, %v287_v24  ;;  %v1595_v52 = vld [vmem:[%s2624_s6 + $0xc0] sm:$0xff]  ;;  %v1621_v59 = vld [vmem:[%s2624_s6 + $0x190] sm:$0xff]  ;;  %v1590_v60 = vld [vmem:[%s2624_s6 + $0x98] sm:$0xff] }
  0x19   : > { %v331_v39 = vmax.f32 %v323_v30, 0.0  ;;  %v325_v41 = vadd.f32 %v1571_v9, %v310_v31  ;;  %v335_v42 = vpack.c.bf16 %v328_v35, %v327_v34  ;;  %v1589_v61 = vld [vmem:[%s2624_s6 + $0x90] sm:$0xff]  ;;  %v1630_v62 = vld [vmem:[%s2624_s6 + $0x1d8] sm:$0xff]  ;;  %v1616_v2 = vld [vmem:[%s2624_s6 + $0x168] sm:$0xff] }
  0x1a   : > { %v332_v43 = vmax.f32 %v324_v37, 0.0  ;;  %v336_v44 = vpack.c.bf16 %v330_v38, %v329_v36  ;;  %v326_v45 = vadd.f32 %v1571_v9, %v311_v40  ;;  %v1629_v63 = vld [vmem:[%s2624_s6 + $0x1d0] sm:$0xff]  ;;  %v1598_v0 = vld [vmem:[%s2624_s6 + $0xd8] sm:$0xff]  ;;  %v1615_v3 = vld [vmem:[%s2624_s6 + $0x160] sm:$0xff] }
  0x1b   : > { %646 = vperm.xlu1 %1760, %v1588_v32   ;;  %641 = vperm.xlu0 %1759, %v1587_v33   ;;  %v333_v49 = vmax.f32 %v325_v41, 0.0  ;;  %v1597_v1 = vld [vmem:[%s2624_s6 + $0xd0] sm:$0xff]  ;;  %v1584_v4 = vld [vmem:[%s2624_s6 + $0x68] sm:$0xff]  ;;  %v1583_v5 = vld [vmem:[%s2624_s6 + $0x60] sm:$0xff] }
  0x1c   : > { %1725 = vmatprep.mubr.msk.bf16.mxu0 %vm288_vm1, %v335_v42  ;;  %v337_v48 = vpack.c.bf16 %v332_v43, %v331_v39  ;;  %v334_v50 = vmax.f32 %v326_v45, 0.0  ;;  %v1624_v6 = vld [vmem:[%s2624_s6 + $0x1a8] sm:$0xff]  ;;  %v1623_v7 = vld [vmem:[%s2624_s6 + $0x1a0] sm:$0xff]  ;;  %v1618_v14 = vld [vmem:[%s2624_s6 + $0x178] sm:$0xff] }
  0x1d   : > { %1726 = vmatmul.mubr.msk.bf16.vlgmr.msra.gmra.mrb[0].mxu0 %vm288_vm1, %v336_v44  ;;  %v1592_v8 = vld [vmem:[%s2624_s6 + $0xa8] sm:$0xff]  ;;  %v1591_v9 = vld [vmem:[%s2624_s6 + $0xa0] sm:$0xff]  ;;  %v1617_v15 = vld [vmem:[%s2624_s6 + $0x170] sm:$0xff] }
  0x1e   : > { %1729 = vmatprep.mubr.msk.bf16.mxu0 %vm288_vm1, %v337_v48  ;;  %v338_v53 = vpack.c.bf16 %v334_v50, %v333_v49  ;;  %v1632_v10 = vld [vmem:[%s2624_s6 + $0x1e8] sm:$0xff]  ;;  %v1631_v11 = vld [vmem:[%s2624_s6 + $0x1e0] sm:$0xff]  ;;  %v1586_v16 = vld [vmem:[%s2624_s6 + $0x78] sm:$0xff] }
  0x1f   : > { %1037 = vperm.xlu1 %1760, %v1628_v46   ;;  %1032 = vperm.xlu0 %1759, %v1627_v47   ;;  %v1600_v12 = vld [vmem:[%s2624_s6 + $0xe8] sm:$0xff]  ;;  %v1599_v13 = vld [vmem:[%s2624_s6 + $0xe0] sm:$0xff]  ;;  %v1585_v17 = vld [vmem:[%s2624_s6 + $0x70] sm:$0xff] }
  0x20   : > { %v1626_v18 = vld [vmem:[%s2624_s6 + $0x1b8] sm:$0xff]  ;;  %v1625_v19 = vld [vmem:[%s2624_s6 + $0x1b0] sm:$0xff]  ;;  %v1604_v26 = vld [vmem:[%s2624_s6 + $0x108] sm:$0xff] }
  0x21   : > { %v1594_v20 = vld [vmem:[%s2624_s6 + $0xb8] sm:$0xff]  ;;  %v1593_v21 = vld [vmem:[%s2624_s6 + $0xb0] sm:$0xff]  ;;  %v1603_v27 = vld [vmem:[%s2624_s6 + $0x100] sm:$0xff] }
  0x22   : > { %v1634_v22 = vld [vmem:[%s2624_s6 + $0x1f8] sm:$0xff]  ;;  %v1633_v23 = vld [vmem:[%s2624_s6 + $0x1f0] sm:$0xff]  ;;  %v467_v28 = vld [vmem:[%s2624_s6 + $0x8] sm:$0xff] }
  0x23   : > { %728 = vperm.xlu1 %1760, %v1596_v51   ;;  %723 = vperm.xlu0 %1759, %v1595_v52   ;;  %v1602_v24 = vld [vmem:[%s2624_s6 + $0xf8] sm:$0xff]  ;;  %v1601_v25 = vld [vmem:[%s2624_s6 + $0xf0] sm:$0xff]  ;;  %v466_v29 = vld [vmem:[%s2624_s6] sm:$0xff] }
  0x24   : > { %v1606_v30 = vld [vmem:[%s2624_s6 + $0x118] sm:$0xff]  ;;  %v1605_v31 = vld [vmem:[%s2624_s6 + $0x110] sm:$0xff]  ;;  %v1608_v34 = vld [vmem:[%s2624_s6 + $0x128] sm:$0xff] }
  0x25   : > { %1730 = vmatmul.mubr.msk.bf16.gmra.mrb[4].mxu0 %vm288_vm1, %v338_v53  ;;  %v469_v32 = vld [vmem:[%s2624_s6 + $0x18] sm:$0xff]  ;;  %v468_v33 = vld [vmem:[%s2624_s6 + $0x10] sm:$0xff]  ;;  %v1607_v35 = vld [vmem:[%s2624_s6 + $0x120] sm:$0xff] }
  0x26   : > { %v471_v36 = vld [vmem:[%s2624_s6 + $0x28] sm:$0xff]  ;;  %v470_v37 = vld [vmem:[%s2624_s6 + $0x20] sm:$0xff]  ;;  %v1637_v40 = vld [vmem:[%s2624_s6 + $0x210] sm:$0xff] }
  0x27   : > { %885 = vperm.xlu1 %1760, %v1614_v54   ;;  %880 = vperm.xlu0 %1759, %v1613_v55   ;;  %v1635_v38 = vld [vmem:[%s2624_s6 + $0x200] sm:$0xff]  ;;  %v1636_v39 = vld [vmem:[%s2624_s6 + $0x208] sm:$0xff]  ;;  %v1638_v41 = vld [vmem:[%s2624_s6 + $0x218] sm:$0xff] }
  0x28   : > { %v1610_v42 = vld [vmem:[%s2624_s6 + $0x138] sm:$0xff]  ;;  %v1609_v43 = vld [vmem:[%s2624_s6 + $0x130] sm:$0xff]  ;;  %v1763_v50 = vld [vmem:[%s2623_s5 + $0x80] sm:$0xff]  }
  0x29   : > { %v473_v46 = vld [vmem:[%s2624_s6 + $0x38] sm:$0xff]  ;;  %v472_v47 = vld [vmem:[%s2624_s6 + $0x30] sm:$0xff]  ;;  %v1639_v51 = vld [vmem:[%s2624_s6 + $0x220] sm:$0xff]  ;;  %1733 = vmatprep.subr.bf16.mxu0 %v1763_v50 }
  0x2a   : > { %v1640_v52 = vld [vmem:[%s2624_s6 + $0x228] sm:$0xff]  ;;  %1734 = vmatpush3.bf16.msra.mxu0 %v1763_v50 }
  0x2b   : > { %557 = vperm.xlu1 %1760, %v1582_v56   ;;  %552 = vperm.xlu0 %1759, %v1581_v57   ;;  %v1764_v55 = vld [vmem:[%s2623_s5 + $0x88] sm:$0xff]  }
  0x2c   : > { %1735 = vmatprep.subr.bf16.mxu0 %v1764_v55 }
  0x2e   : > { %1736 = vmatpush3.bf16.msra.mxu0 %v1764_v55 }
  0x2f   : > { %966 = vperm.xlu1 %1760, %v1622_v58   ;;  %961 = vperm.xlu0 %1759, %v1621_v59  }
  0x33   : > { %656 = vperm.xlu1 %1760, %v1590_v60   ;;  %651 = vperm.xlu0 %1759, %v1589_v61  }
  0x37   : > { %1047 = vperm.xlu1 %1760, %v1630_v62   ;;  %1042 = vperm.xlu0 %1759, %v1629_v63  }
  0x3b   : > { %738 = vperm.xlu1 %1760, %v1598_v0   ;;  %733 = vperm.xlu0 %1759, %v1597_v1  }
  0x3f   : > { %895 = vperm.xlu1 %1760, %v1616_v2   ;;  %890 = vperm.xlu0 %1759, %v1615_v3  }
  0x43   : > { %567 = vperm.xlu1 %1760, %v1584_v4   ;;  %562 = vperm.xlu0 %1759, %v1583_v5  }
  0x47   : > { %976 = vperm.xlu1 %1760, %v1624_v6   ;;  %971 = vperm.xlu0 %1759, %v1623_v7  }
  0x4b   : > { %666 = vperm.xlu1 %1760, %v1592_v8   ;;  %661 = vperm.xlu0 %1759, %v1591_v9  }
  0x4f   : > { %1057 = vperm.xlu1 %1760, %v1632_v10   ;;  %1052 = vperm.xlu0 %1759, %v1631_v11  }
  0x53   : > { %748 = vperm.xlu1 %1760, %v1600_v12   ;;  %743 = vperm.xlu0 %1759, %v1599_v13  }
  0x57   : > { %905 = vperm.xlu1 %1760, %v1618_v14   ;;  %900 = vperm.xlu0 %1759, %v1617_v15  }
  0x5b   : > { %577 = vperm.xlu1 %1760, %v1586_v16   ;;  %572 = vperm.xlu0 %1759, %v1585_v17  }
  0x5f   : > { %986 = vperm.xlu1 %1760, %v1626_v18   ;;  %981 = vperm.xlu0 %1759, %v1625_v19  }
  0x63   : > { %676 = vperm.xlu1 %1760, %v1594_v20   ;;  %671 = vperm.xlu0 %1759, %v1593_v21  }
  0x67   : > { %1067 = vperm.xlu1 %1760, %v1634_v22   ;;  %1062 = vperm.xlu0 %1759, %v1633_v23  }
  0x6b   : > { %758 = vperm.xlu1 %1760, %v1602_v24   ;;  %753 = vperm.xlu0 %1759, %v1601_v25  }
  0x6f   : > { %810 = vperm.xlu1 %1760, %v1604_v26   ;;  %805 = vperm.xlu0 %1759, %v1603_v27  }
  0x73   : > { %481 = vperm.xlu1 %1760, %v467_v28   ;;  %476 = vperm.xlu0 %1759, %v466_v29  }
  0x77   : > { %820 = vperm.xlu1 %1760, %v1606_v30   ;;  %815 = vperm.xlu0 %1759, %v1605_v31  }
  0x7b   : > { %491 = vperm.xlu1 %1760, %v469_v32   ;;  %486 = vperm.xlu0 %1759, %v468_v33  }
  0x7f   : > { %830 = vperm.xlu1 %1760, %v1608_v34   ;;  %825 = vperm.xlu0 %1759, %v1607_v35   ;;  %v455_v34 = vlaneseq }
  0x83   : > { %501 = vperm.xlu1 %1760, %v471_v36   ;;  %496 = vperm.xlu0 %1759, %v470_v37   ;;  %v2197_v37 = vld [vmem:[%s2622_s4] ss:$0 sm:$0xff] }
  0x87   : > { %1113 = vperm.xlu1 %1760, %v1635_v38   ;;  %1118 = vperm.xlu0 %1759, %v1636_v39   ;;  %v2199_v38 = vshrl.u32 %v455_v34, 7 }
  0x89   : > { %vm457_vm2 = vcmp.lt.s32.totalorder %v2199_v38, 1  ;;  %vm621_vm3 = vcmp.lt.s32.totalorder %v2199_v38, 7 }
  0x8b   : > { %1123 = vperm.xlu1 %1760, %v1637_v40   ;;  %1128 = vperm.xlu0 %1759, %v1638_v41  }
  0x8e   : > { %v2082_v44 = vpop.permute.xlu1 %542  ;;  %v2084_v45 = vpop.permute.xlu0 %870 }
  0x8f   : > { %840 = vperm.xlu1 %1760, %v1610_v42   ;;  %835 = vperm.xlu0 %1759, %v1609_v43  }
  0x92   : > { %v2092_v48 = vpop.permute.xlu1 %547  ;;  %v2094_v49 = vpop.permute.xlu0 %875 }
  0x93   : > { %511 = vperm.xlu1 %1760, %v473_v46   ;;  %506 = vperm.xlu0 %1759, %v472_v47  }
  0x96   : > { %v2105_v53 = vpop.permute.xlu1 %956  ;;  %v2107_v54 = vpop.permute.xlu0 %951 }
  0x97   : > { %1133 = vperm.xlu1 %1760, %v1639_v51   ;;  %1138 = vperm.xlu0 %1759, %v1640_v52   ;;  %v1765_v51 = vld [vmem:[%s2623_s5 + $0x40] sm:$0xff]  }
  0x98   : > { %v1766_v52 = vld [vmem:[%s2623_s5] sm:$0xff]   ;;  %1675 = vmatprep.subr.bf16.mxu1 %v1765_v51 }
  0x99   : > { %1676 = vmatpush3.bf16.msra.mxu1 %v1766_v52 }
  0x9a   : > { %v2112_v56 = vpop.permute.xlu1 %646  ;;  %v2114_v57 = vpop.permute.xlu0 %641 }
  0x9e   : > { %v2116_v58 = vpop.permute.xlu1 %1037  ;;  %v2118_v59 = vpop.permute.xlu0 %1032 }
  0xa2   : > { %v2120_v60 = vpop.permute.xlu1 %728  ;;  %v2122_v61 = vpop.permute.xlu0 %723 }
  0xa3   : > { %2627 = vst [vmem:[#allocation3_spill] sm:$0xff] %v2122_v61 }
  0xa6   : > { %v2124_v62 = vpop.permute.xlu1 %885  ;;  %v2126_v63 = vpop.permute.xlu0 %880 }
  0xaa   : > { %v558_v0 = vpop.permute.xlu1 %557  ;;  %v2128_v1 = vpop.permute.xlu0 %552 }
  0xae   : > { %v2130_v2 = vpop.permute.xlu1 %966  ;;  %v2132_v3 = vpop.permute.xlu0 %961 }
  0xb2   : > { %v2134_v4 = vpop.permute.xlu1 %656  ;;  %v2136_v5 = vpop.permute.xlu0 %651 }
  0xb6   : > { %v2138_v6 = vpop.permute.xlu1 %1047  ;;  %v2140_v7 = vpop.permute.xlu0 %1042 }
  0xba   : > { %v2142_v8 = vpop.permute.xlu1 %738  ;;  %v2144_v9 = vpop.permute.xlu0 %733 }
  0xbe   : > { %v2146_v10 = vpop.permute.xlu1 %895  ;;  %v2148_v11 = vpop.permute.xlu0 %890 }
  0xbf   : > { %2628 = vst [vmem:[#allocation4_spill] sm:$0xff] %v2146_v10 }
  0xc2   : > { %v2150_v12 = vpop.permute.xlu1 %567  ;;  %v563_v13 = vpop.permute.xlu0 %562 }
  0xc6   : > { %v2152_v14 = vpop.permute.xlu1 %976  ;;  %v2154_v15 = vpop.permute.xlu0 %971 }
  0xca   : > { %v2156_v16 = vpop.permute.xlu1 %666  ;;  %v2158_v17 = vpop.permute.xlu0 %661 }
  0xce   : > { %v2160_v18 = vpop.permute.xlu1 %1057  ;;  %v2162_v19 = vpop.permute.xlu0 %1052 }
  0xd2   : > { %v2164_v20 = vpop.permute.xlu1 %748  ;;  %v2166_v21 = vpop.permute.xlu0 %743 }
  0xd6   : > { %v2168_v22 = vpop.permute.xlu1 %905  ;;  %v2170_v23 = vpop.permute.xlu0 %900 }
  0xd7   : > { %2629 = vst [vmem:[#allocation5_spill] sm:$0xff] %v2168_v22  ;;  %2630 = vst [vmem:[#allocation6_spill] sm:$0xff] %v2170_v23 }
  0xda   : > { %v2172_v24 = vpop.permute.xlu1 %577  ;;  %v2174_v25 = vpop.permute.xlu0 %572 }
  0xde   : > { %v2176_v26 = vpop.permute.xlu1 %986  ;;  %v2178_v27 = vpop.permute.xlu0 %981 }
  0xdf   : > { %2631 = vst [vmem:[#allocation7_spill] sm:$0xff] %v2176_v26  ;;  %2632 = vst [vmem:[#allocation8_spill] sm:$0xff] %v2178_v27 }
  0xe2   : > { %v2180_v28 = vpop.permute.xlu1 %676  ;;  %v2182_v29 = vpop.permute.xlu0 %671 }
  0xe3   : > { %2633 = vst [vmem:[#allocation9_spill] sm:$0xff] %v2180_v28  ;;  %2634 = vst [vmem:[#allocation10_spill] sm:$0xff] %v2182_v29 }
  0xe6   : > { %v1068_v30 = vpop.permute.xlu1 %1067  ;;  %v2184_v31 = vpop.permute.xlu0 %1062 }
  0xe7   : > { %2635 = vst [vmem:[#allocation11_spill] sm:$0xff] %v2184_v31 }
  0xea   : > { %v2186_v32 = vpop.permute.xlu1 %758  ;;  %v2188_v33 = vpop.permute.xlu0 %753 }
  0xeb   : > { %2636 = vst [vmem:[#allocation12_spill] sm:$0xff] %v2186_v32 }
  0xee   : > { %v2190_v35 = vpop.permute.xlu1 %810  ;;  %v2192_v36 = vpop.permute.xlu0 %805 }
  0xef   : > { %2637 = vst [vmem:[#allocation13_spill] sm:$0xff] %v2190_v35  ;;  %2638 = vst [vmem:[#allocation14_spill] sm:$0xff] %v2192_v36 }
  0xf0   : > { %v1727_v39 = vpop.f32.mrb[0].mxu0 }
  0xf1   : > { %v417_v40 = vadd.f32 %v1727_v39, %v2197_v37  ;;  %v408_v41 = vpop.f32.mrb[1].mxu0 }
  0xf2   : > { %v409_v42 = vadd.f32 %v2197_v37, %v408_v41  ;;  %v2203_v43 = vpop.permute.xlu1 %481  ;;  %v2205_v46 = vpop.permute.xlu0 %476 }
  0xf3   : > { %2639 = vst [vmem:[#allocation15_spill] sm:$0xff] %v2203_v43  ;;  %2640 = vst [vmem:[#allocation16_spill] sm:$0xff] %v2205_v46  ;;  %v2207_v47 = vmax.f32 %v417_v40, 0.0  ;;  %v1728_v50 = vpop.f32.mrb[2].mxu0 }
  0xf4   : > { %v2216_v55 = vmax.f32 %v409_v42, 0.0  ;;  %v420_v34 = vadd.f32 %v1728_v50, %v2197_v37  ;;  %v411_v39 = vpop.f32.mrb[3].mxu0 }
  0xf5   : > { %v412_v40 = vadd.f32 %v2197_v37, %v411_v39  ;;  %v1071_v43 = vmul.f32 %v2116_v58, %v2207_v47  ;;  %v2225_v46 = vmul.f32 %v558_v0, %v2207_v47  ;;  %v615_v32 = vrot.slane %v2207_v47, 1 }
  0xf6   : > { %v2227_v35 = vmax.f32 %v420_v34, 0.0  ;;  %v821_v42 = vpop.permute.xlu1 %820  ;;  %v816_v36 = vpop.permute.xlu0 %815  ;;  %v2237_v58 = vmul.f32 %v2092_v48, %v2216_v55  ;;  %v2240_v0 = vmul.f32 %v1068_v30, %v2216_v55  ;;  %v1768_v48 = vld [vmem:[%s2623_s5 + $0x8] sm:$0xff]  }
  0xf7   : > { %v2232_v39 = vmax.f32 %v412_v40, 0.0  ;;  %v845_v41 = vmul.f32 %v816_v36, %v2207_v47  ;;  %v1767_v36 = vld [vmem:[%s2623_s5 + $0x48] sm:$0xff]  }
  0xf8   : > { %2642 = vst [vmem:[#allocation18_spill] sm:$0xff] %v2240_v0  ;;  %v846_v51 = vmul.f32 %v821_v42, %v2227_v35  ;;  %v1731_v34 = vpop.f32.mrb[4].mxu0  ;;  %v2246_v52 = vmul.f32 %v563_v13, %v2227_v35  ;;  %v2643_v23 = vrot.slane %v2227_v35, 1  ;;  %1677 = vmatprep.subr.bf16.mxu1 %v1767_v36 }
  0xf9   : > { %2641 = vst [vmem:[#allocation17_spill] sm:$0xff] %v2232_v39  ;;  %v433_v30 = vadd.f32 %v1731_v34, %v2197_v37  ;;  %v424_v40 = vpop.f32.mrb[5].mxu0  ;;  %v448_v42 = vrot.slane %v2232_v39, 7  ;;  %v1070_v31 = vmul.f32 %v2118_v59, %v2232_v39  ;;  %v582_v13 = vmul.f32 %v2128_v1, %v2232_v39  ;;  %1678 = vmatpush3.bf16.msra.mxu1 %v1768_v48 }
  0xfa   : > { %v852_v27 = vpack.c.bf16 %v846_v51, %v845_v41  ;;  %v425_v50 = vadd.f32 %v2197_v37, %v424_v40  ;;  %v492_v0 = vpop.permute.xlu1 %491  ;;  %v487_v26 = vpop.permute.xlu0 %486  ;;  %v614_v22 = vrot.slane %v2232_v39, 1  ;;  %v2266_v34 = vsel %vm621_vm3, %v615_v32, %v2643_v23 }
  0xfb   : > { %v2268_v28 = vmax.f32 %v433_v30, 0.0  ;;  %v2644_v59 = vrot.slane %v2207_v47, 7  ;;  %v2645_v41 = vrot.slane %v2216_v55, 7  ;;  %v1732_v40 = vpop.f32.mrb[6].mxu0  ;;  %v1078_v39 = vpack.c.bf16 %v1071_v43, %v1070_v31 }
  0xfc   : > { %v2278_v10 = vmax.f32 %v425_v50, 0.0  ;;  %v427_v29 = vpop.f32.mrb[7].mxu0  ;;  %856 = vst.msk [vmem:[#allocation2 + $0x20] sm:$0xff] %vm526_vm4, %v852_v27  ;;  %v436_v31 = vadd.f32 %v1732_v40, %v2197_v37  ;;  %v627_v43 = vsel %vm621_vm3, %v614_v22, %v615_v32  ;;  %v682_v50 = vmul.f32 %v2134_v4, %v2266_v34 }
  0xfd   : > { %v463_v1 = vsel %vm457_vm2, %v448_v42, %v2644_v59  ;;  %v464_v51 = vsel %vm457_vm2, %v2645_v41, %v448_v42  ;;  %1086 = vrot.lane.b32.xlu0 %v1078_v39, %s1790_s26  ;;  %v2646_v32 = vrot.slane %v2216_v55, 1  ;;  %v2648_v40 = vrot.slane %v2207_v47, 7 }
  0xfe   : > { %v517_v23 = vmul.f32 %v492_v0, %v463_v1  ;;  %v2281_v36 = vmul.f32 %v2144_v9, %v463_v1  ;;  %v2284_v30 = vmul.f32 %v2105_v53, %v463_v1  ;;  %v516_v59 = vmul.f32 %v487_v26, %v464_v51  ;;  %v1769_v53 = vld [vmem:[%s2623_s5 + $0x50] sm:$0xff]   ;;  %v831_v27 = vpop.permute.xlu1 %830 }
  0xff   : > { %v2288_v61 = vmul.f32 %v2120_v60, %v464_v51  ;;  %v2291_v42 = vmul.f32 %v2107_v54, %v464_v51  ;;  %v1770_v9 = vld [vmem:[%s2623_s5 + $0x10] sm:$0xff]   ;;  %v428_v26 = vadd.f32 %v2197_v37, %v427_v29  ;;  %v589_v60 = vpack.c.bf16 %v2225_v46, %v582_v13  ;;  %v826_v54 = vpop.permute.xlu0 %825  ;;  %1679 = vmatprep.subr.bf16.mxu1 %v1769_v53  ;;  %v1771_v29 = vld [vmem:[%s2623_s5 + $0x58] sm:$0xff]  }
 0x100   : > { %v523_v39 = vpack.c.bf16 %v517_v23, %v516_v59  ;;  %v2307_v0 = vmax.f32 %v436_v31, 0.0  ;;  %v847_v48 = vmul.f32 %v826_v54, %v2278_v10  ;;  %v681_v1 = vmul.f32 %v2136_v5, %v627_v43  ;;  %1680 = vmatpush3.bf16.msra.mxu1 %v1770_v9  ;;  %v1773_v54 = vld [vmem:[%s2623_s5 + $0x60] sm:$0xff]  }
 0x101   : > { %v2314_v37 = vmax.f32 %v428_v26, 0.0  ;;  %598 = vrot.lane.b32.xlu1 %v589_v60, %s1791_s10  ;;  %v2321_v4 = vsel %vm621_vm3, %v2646_v32, %v614_v22  ;;  %v909_v46 = vmul.f32 %v2094_v49, %v627_v43  ;;  %v451_v5 = vrot.slane %v2278_v10, 7  ;;  %1681 = vmatprep.subr.bf16.mxu1 %v1771_v29  ;;  %v1772_v49 = vld [vmem:[%s2623_s5 + $0x18] sm:$0xff]  }
 0x102   : > { %v688_v13 = vpack.c.bf16 %v682_v50, %v681_v1  ;;  %v908_v41 = vmul.f32 %v2084_v45, %v2321_v4  ;;  %v2647_v51 = vrot.slane %v2227_v35, 7  ;;  %v997_v22 = vpack.c.bf16 %v2284_v30, %v2291_v42  ;;  %528 = vst.msk [vmem:[#allocation2 + $0x18] sm:$0xff] %vm526_vm4, %v523_v39  ;;  %v502_v45 = vpop.permute.xlu1 %501 }
 0x103   : > { %v848_v59 = vmul.f32 %v831_v27, %v2314_v37  ;;  %v497_v53 = vpop.permute.xlu0 %496  ;;  %v585_v39 = vmul.f32 %v2150_v12, %v2278_v10  ;;  %v617_v1 = vrot.slane %v2278_v10, 1 }
 0x104   : > { %v462_v23 = vsel %vm457_vm2, %v2648_v40, %v2647_v51  ;;  %v2649_v47 = vmov %v2647_v51  ;;  %v916_v9 = vpack.c.bf16 %v909_v46, %v908_v41  ;;  %1682 = vmatpush3.bf16.msra.mxu1 %v1772_v49  ;;  %v2650_v40 = vrot.slane %v2227_v35, 1 }
 0x105   : > { %v461_v31 = vsel %vm457_vm2, %v2649_v47, %v451_v5  ;;  %v764_v30 = vmul.f32 %v2142_v8, %v462_v23  ;;  %v2348_v42 = vmul.f32 %v2132_v3, %v462_v23  ;;  %v853_v50 = vpack.c.bf16 %v848_v59, %v847_v48  ;;  %697 = vrot.lane.b32.xlu1 %v688_v13, %s1792_s15 }
 0x106   : > { %v519_v26 = vmul.f32 %v502_v45, %v461_v31  ;;  %v2351_v60 = vmul.f32 %v2166_v21, %v461_v31  ;;  %v2354_v27 = vmul.f32 %v2130_v2, %v461_v31  ;;  %v518_v8 = vmul.f32 %v497_v53, %v462_v23  ;;  %924 = vrot.lane.b32.xlu0 %v916_v9, %s1791_s10  ;;  %v1114_v32 = vpop.permute.xlu1 %1113  ;;  %v1775_v23 = vld [vmem:[%s2623_s5 + $0x68] sm:$0xff]  }
 0x107   : > { %v770_v3 = vpack.c.bf16 %v764_v30, %v2281_v36  ;;  %v1072_v2 = vmul.f32 %v2140_v7, %v2227_v35  ;;  %v1073_v21 = vmul.f32 %v2138_v6, %v2278_v10  ;;  %v618_v48 = vrot.slane %v2314_v37, 1  ;;  %v1119_v46 = vpop.permute.xlu0 %1118  ;;  %857 = vst.msk [vmem:[#allocation2 + $0x38] sm:$0xff] %vm526_vm4, %v853_v50  ;;  %1683 = vmatprep.subr.bf16.mxu1 %v1773_v54  ;;  %v1774_v6 = vld [vmem:[%s2623_s5 + $0x20] sm:$0xff]   ;;  %v1777_v10 = vld [vmem:[%s2623_s5 + $0x70] sm:$0xff]  }
 0x108   : > { %v524_v29 = vpack.c.bf16 %v519_v26, %v518_v8  ;;  %v590_v12 = vpack.c.bf16 %v585_v39, %v2246_v52  ;;  %v580_v36 = vmul.f32 %v2082_v44, %v2307_v0  ;;  %v2376_v7 = vmul.f32 %v2162_v19, %v2314_v37  ;;  %1684 = vmatpush3.bf16.msra.mxu1 %v1774_v6 }
 0x109   : > { %v1151_v13 = vmul.f32 %v1114_v32, %v627_v43  ;;  %v1152_v41 = vmul.f32 %v1119_v46, %v2266_v34  ;;  %v1079_v51 = vpack.c.bf16 %v1073_v21, %v1072_v2  ;;  %v625_v52 = vsel %vm621_vm3, %v2650_v40, %v617_v1  ;;  %779 = vrot.lane.b32.xlu1 %v770_v3, %s1790_s26 }
 0x10a   : > { %529 = vst.msk [vmem:[#allocation2 + $0x30] sm:$0xff] %vm526_vm4, %v524_v29  ;;  %v2389_v44 = vmul.f32 %v2158_v17, %v625_v52  ;;  %v2392_v19 = vmul.f32 %v2124_v62, %v625_v52  ;;  %v624_v43 = vsel %vm621_vm3, %v617_v1, %v618_v48  ;;  %v588_v35 = vpack.c.bf16 %v2237_v58, %v580_v36  ;;  %v1124_v45 = vpop.permute.xlu1 %1123 }
 0x10b   : > { %1005 = vrot.lane.b32.xlu0 %v997_v22, %s1792_s15  ;;  %v1159_v49 = vpack.c.bf16 %v1152_v41, %v1151_v13  ;;  %v2404_v17 = vmul.f32 %v2156_v16, %v624_v43  ;;  %v2407_v62 = vmul.f32 %v2148_v11, %v624_v43  ;;  %v1075_v59 = vmul.f32 %v2160_v18, %v2268_v28  ;;  %v1129_v47 = vpop.permute.xlu0 %1128  ;;  %v1776_v11 = vld [vmem:[%s2623_s5 + $0x28] sm:$0xff]   ;;  %v2653_v41 = vld [vmem:[#allocation3_spill] sm:$0xff] }
 0x10c   : > { %v620_v58 = vrot.slane %v2307_v0, 1  ;;  %v680_v31 = vmul.f32 %v2112_v56, %v2321_v4  ;;  %v2416_v22 = vmul.f32 %v2126_v63, %v2266_v34  ;;  %v452_v16 = vrot.slane %v2314_v37, 7  ;;  %1685 = vmatprep.subr.bf16.mxu1 %v1775_v23 }
 0x10d   : > { %1163 = vst.msk [vmem:[#allocation2 + $0x10] sm:$0xff] %vm526_vm4, %v1159_v49  ;;  %v1153_v18 = vmul.f32 %v1124_v45, %v625_v52  ;;  %v1154_v53 = vmul.f32 %v1129_v47, %v624_v43  ;;  %v1080_v30 = vpack.c.bf16 %v1075_v59, %v2376_v7  ;;  %v453_v9 = vrot.slane %v2268_v28, 7  ;;  %600 = vrot.lane.b32.xlu1 %v590_v12, %s1791_s10  ;;  %v2656_v49 = vld [vmem:[#allocation9_spill] sm:$0xff]  ;;  %v2657_v45 = vld [vmem:[#allocation6_spill] sm:$0xff] }
 0x10e   : > { %v2651_v56 = vrot.slane %v2216_v55, 1  ;;  %v917_v34 = vpack.c.bf16 %v2392_v19, %v2416_v22  ;;  %v460_v26 = vsel %vm457_vm2, %v451_v5, %v452_v16  ;;  %v998_v54 = vpack.c.bf16 %v2354_v27, %v2348_v42  ;;  %v841_v5 = vpop.permute.xlu1 %840  ;;  %1686 = vmatpush3.bf16.msra.mxu1 %v1776_v11 }
 0x10f   : > { %1088 = vrot.lane.b32.xlu0 %v1079_v51, %s1790_s26  ;;  %v1160_v50 = vpack.c.bf16 %v1154_v53, %v1153_v18  ;;  %v459_v3 = vsel %vm457_vm2, %v452_v16, %v453_v9  ;;  %v2446_v39 = vmul.f32 %v2164_v20, %v460_v26  ;;  %v836_v2 = vpop.permute.xlu0 %835  ;;  %v454_v29 = vrot.slane %v2307_v0, 7  ;;  %v1778_v20 = vld [vmem:[%s2623_s5 + $0x30] sm:$0xff]   ;;  %1687 = vmatprep.subr.bf16.mxu1 %v1777_v10 }
 0x110   : > { %v2430_v63 = vsel %vm621_vm3, %v620_v58, %v2651_v56  ;;  %v2452_v21 = vmul.f32 %v2188_v33, %v459_v3  ;;  %v2455_v1 = vmul.f32 %v2152_v14, %v459_v3  ;;  %v850_v32 = vmul.f32 %v841_v5, %v2307_v0  ;;  %v2658_v18 = vld [vmem:[#allocation5_spill] sm:$0xff]  ;;  %v2660_v5 = vld [vmem:[#allocation8_spill] sm:$0xff] }
 0x111   : > { %v679_v8 = vmul.f32 %v2114_v57, %v2430_v63  ;;  %v2458_v57 = vmul.f32 %v2154_v15, %v460_v26  ;;  %1164 = vst.msk [vmem:[#allocation2 + $0x28] sm:$0xff] %vm526_vm4, %v1160_v50  ;;  %v849_v33 = vmul.f32 %v836_v2, %v2268_v28  ;;  %v619_v14 = vrot.slane %v2268_v28, 1  ;;  %596 = vrot.lane.b32.xlu1 %v588_v35, %s1791_s10  ;;  %v2655_v35 = vld [vmem:[#allocation4_spill] sm:$0xff] }
 0x112   : > { %v2652_v15 = vrot.slane %v2216_v55, 7  ;;  %v2475_v36 = vmul.f32 %v2174_v25, %v2314_v37  ;;  %v2479_v7 = vmul.f32 %v2172_v24, %v2268_v28  ;;  %v512_v52 = vpop.permute.xlu1 %511  ;;  %v2654_v28 = vld [vmem:[#allocation10_spill] sm:$0xff]  ;;  %1688 = vmatpush3.bf16.msra.mxu1 %v1778_v20  ;;  %v689_v11 = vpack.c.bf16 %v2404_v17, %v2389_v44  ;;  %v2662_v20 = vld [vmem:[#allocation12_spill] sm:$0xff] }
 0x113   : > { %v687_v46 = vpack.c.bf16 %v680_v31, %v679_v8  ;;  %v999_v6 = vpack.c.bf16 %v2455_v1, %v2458_v57  ;;  %1090 = vrot.lane.b32.xlu0 %v1080_v30, %s1790_s26  ;;  %v854_v13 = vpack.c.bf16 %v850_v32, %v849_v33  ;;  %v623_v40 = vsel %vm621_vm3, %v618_v48, %v619_v14  ;;  %v507_v19 = vpop.permute.xlu0 %506  ;;  %v1779_v37 = vld [vmem:[%s2623_s5 + $0x78] sm:$0xff]   ;;  %v2664_v33 = vld [vmem:[#allocation17_spill] sm:$0xff] }
 0x114   : > { %v465_v12 = vsel %vm457_vm2, %v454_v29, %v2652_v15  ;;  %v622_v25 = vsel %vm621_vm3, %v619_v14, %v620_v58  ;;  %v1169_v24 = vld [vmem:[#allocation2 + $0x10] sm:$0xff]  ;;  %v2492_v43 = vmul.f32 %v2654_v28, %v623_v40  ;;  %v913_v23 = vmul.f32 %v2655_v35, %v623_v40  ;;  %1689 = vmatprep.subr.bf16.mxu1 %v1779_v37 }
 0x115   : > { %v761_v51 = vmul.f32 %v2653_v41, %v465_v12  ;;  %v686_v59 = vmul.f32 %v2656_v49, %v622_v25  ;;  %v914_v47 = vmul.f32 %v2657_v45, %v622_v25  ;;  %858 = vst.msk [vmem:[#allocation2 + $0x50] sm:$0xff] %vm526_vm4, %v854_v13  ;;  %v521_v48 = vmul.f32 %v512_v52, %v459_v3 }
 0x116   : > { %v520_v58 = vmul.f32 %v507_v19, %v460_v26  ;;  %1737 = vmatprep.mubr.msk.bf16.mxu0 %vm526_vm4, %v1169_v24  ;;  %v591_v22 = vpack.c.bf16 %v2479_v7, %v2475_v36  ;;  %695 = vrot.lane.b32.xlu1 %v687_v46, %s1792_s15  ;;  %v918_v16 = vpack.c.bf16 %v913_v23, %v2407_v62  ;;  %v2659_v62 = vld [vmem:[#allocation7_spill] sm:$0xff]  ;;  %v1134_v17 = vpop.permute.xlu1 %1133  ;;  %v2665_v46 = vld [vmem:[#allocation13_spill] sm:$0xff]  ;;  %v2666_v36 = vld [vmem:[#allocation18_spill] sm:$0xff] }
 0x117   : > { %v769_v31 = vpack.c.bf16 %v2288_v61, %v761_v51  ;;  %v915_v53 = vmul.f32 %v2658_v18, %v2430_v63  ;;  %v771_v30 = vpack.c.bf16 %v2446_v39, %v2351_v60  ;;  %v1780_v61 = vld [vmem:[%s2623_s5 + $0x38] sm:$0xff]   ;;  %926 = vrot.lane.b32.xlu0 %v917_v34, %s1791_s10  ;;  %v458_v26 = vsel %vm457_vm2, %v453_v9, %v454_v29  ;;  %v1139_v8 = vpop.permute.xlu0 %1138  ;;  %v2661_v39 = vld [vmem:[#allocation11_spill] sm:$0xff]  ;;  %v2667_v51 = vld [vmem:[#allocation16_spill] sm:$0xff] }
 0x118   : > { %v525_v56 = vpack.c.bf16 %v521_v48, %v520_v58  ;;  %v996_v50 = vmul.f32 %v2659_v62, %v465_v12  ;;  %v690_v44 = vpack.c.bf16 %v686_v59, %v2492_v43  ;;  %v1172_v3 = vld [vmem:[#allocation2 + $0x28] sm:$0xff]  ;;  %v995_v60 = vmul.f32 %v2660_v5, %v458_v26  ;;  %v2663_v34 = vld [vmem:[#allocation14_spill] sm:$0xff]  ;;  %1690 = vmatpush3.bf16.msra.mxu1 %v1780_v61 }
 0x119   : > { %v919_v10 = vpack.c.bf16 %v915_v53, %v914_v47  ;;  %v1076_v2 = vmul.f32 %v2661_v39, %v2307_v0  ;;  %v768_v32 = vmul.f32 %v2662_v20, %v458_v26  ;;  %v1155_v38 = vmul.f32 %v1134_v17, %v623_v40  ;;  %1738 = vmatmul.mubr.msk.bf16.vlgmr.msra.gmra.mrb[8].mxu0 %vm526_vm4, %v1172_v3 }
 0x11a   : > { %530 = vst.msk [vmem:[#allocation2 + $0x48] sm:$0xff] %vm526_vm4, %v525_v56  ;;  %v1156_v9 = vmul.f32 %v1139_v8, %v622_v25  ;;  %v843_v29 = vmul.f32 %v2663_v34, %v2216_v55  ;;  %v844_v14 = vmul.f32 %v2665_v46, %v2664_v33  ;;  %777 = vrot.lane.b32.xlu1 %v769_v31, %s1790_s26  ;;  %v1641_v55 = vld [vmem:[%s2624_s6 + $0x230] sm:$0xff]  ;;  %v2668_v25 = vld [vmem:[#allocation15_spill] sm:$0xff] }
 0x11b   : > { %v1000_v15 = vpack.c.bf16 %v996_v50, %v995_v60  ;;  %v1081_v0 = vpack.c.bf16 %v2666_v36, %v1076_v2  ;;  %v772_v7 = vpack.c.bf16 %v768_v32, %v2452_v21  ;;  %1007 = vrot.lane.b32.xlu0 %v998_v54, %s1792_s15  ;;  %v514_v40 = vmul.f32 %v2667_v51, %v458_v26  ;;  %v1642_v21 = vld [vmem:[%s2624_s6 + $0x238] sm:$0xff] }
 0x11c   : > { %v1161_v13 = vpack.c.bf16 %v1156_v9, %v1155_v38  ;;  %v851_v41 = vpack.c.bf16 %v844_v14, %v843_v29  ;;  %v515_v52 = vmul.f32 %v2668_v25, %v465_v12 }
 0x11e   : > { %1165 = vst.msk [vmem:[#allocation2 + $0x40] sm:$0xff] %vm526_vm4, %v1161_v13  ;;  %855 = vst.msk [vmem:[#allocation2 + $0x8] sm:$0xff] %vm526_vm4, %v851_v41  ;;  %v522_v42 = vpack.c.bf16 %v515_v52, %v514_v40  ;;  %1143 = vperm.xlu1 %1760, %v1641_v55  }
 0x11f   : > { %1148 = vperm.xlu0 %1759, %v1642_v21  }
 0x120   : > { %527 = vst.msk [vmem:[#allocation2] sm:$0xff] %vm526_vm4, %v522_v42 }
 0x122   : > { %602 = vrot.lane.b32.xlu1 %v591_v22, %s1791_s10 }
 0x123   : > { %928 = vrot.lane.b32.xlu0 %v918_v16, %s1791_s10 }
 0x125   : > { %v1175_v27 = vld [vmem:[#allocation2 + $0x40] sm:$0xff] }
 0x126   : > { %1741 = vmatprep.mubr.msk.bf16.mxu0 %vm526_vm4, %v1175_v27  ;;  %699 = vrot.lane.b32.xlu1 %v689_v11, %s1792_s15 }
 0x127   : > { %1009 = vrot.lane.b32.xlu0 %v999_v6, %s1792_s15 }
 0x12a   : > { %781 = vrot.lane.b32.xlu1 %v771_v30, %s1790_s26 }
 0x12b   : > { %930 = vrot.lane.b32.xlu0 %v919_v10, %s1791_s10 }
 0x12e   : > { %701 = vrot.lane.b32.xlu1 %v690_v44, %s1792_s15 }
 0x12f   : > { %1011 = vrot.lane.b32.xlu0 %v1000_v15, %s1792_s15 }
 0x132   : > { %783 = vrot.lane.b32.xlu1 %v772_v7, %s1790_s26 }
 0x133   : > { %1092 = vrot.lane.b32.xlu0 %v1081_v0, %s1790_s26  ;;  %s1793_s26 = smov 24  }
 0x16f   : > { %v1087_v54 = vpop.permute.xlu0 %1086 }
 0x173   : > { %v599_v12 = vpop.permute.xlu1 %598 }
 0x174   : > { %610 = vst.msk [vmem:[#allocation2 + $0x18] sm:$0xff] %vm608_vm5, %v599_v12 }
 0x177   : > { %v698_v1 = vpop.permute.xlu1 %697 }
 0x178   : > { %709 = vst.msk [vmem:[#allocation2 + $0x18] sm:$0xff] %vm707_vm6, %v698_v1  ;;  %v925_v57 = vpop.permute.xlu0 %924 }
 0x179   : > { %936 = vst.msk [vmem:[#allocation2 + $0x8] sm:$0xff] %vm608_vm5, %v925_v57 }
 0x17b   : > { %v780_v6 = vpop.permute.xlu1 %779 }
 0x17c   : > { %791 = vst.msk [vmem:[#allocation2 + $0x18] sm:$0xff] %vm789_vm7, %v780_v6 }
 0x17d   : > { %v1006_v19 = vpop.permute.xlu0 %1005 }
 0x17e   : > { %1017 = vst.msk [vmem:[#allocation2 + $0x8] sm:$0xff] %vm707_vm6, %v1006_v19 }
 0x17f   : > { %1098 = vst.msk [vmem:[#allocation2 + $0x8] sm:$0xff] %vm789_vm7, %v1087_v54  ;;  %v601_v24 = vpop.permute.xlu1 %600 }
 0x180   : > { %611 = vst.msk [vmem:[#allocation2 + $0x30] sm:$0xff] %vm608_vm5, %v601_v24 }
 0x181   : > { %v1089_v28 = vpop.permute.xlu0 %1088 }
 0x183   : > { %v597_v43 = vpop.permute.xlu1 %596  ;;  %v1170_v58 = vld [vmem:[#allocation2 + $0x18] sm:$0xff] }
 0x184   : > { %609 = vst.msk [vmem:[#allocation2] sm:$0xff] %vm608_vm5, %v597_v43 }
 0x185   : > { %v1091_v35 = vpop.permute.xlu0 %1090 }
 0x186   : > { %v1168_v23 = vld [vmem:[#allocation2 + $0x8] sm:$0xff] }
 0x187   : > { %1367 = vmatprep.mubr.bf16.mxu1 %v1168_v23 }
 0x188   : > { %v696_v49 = vpop.permute.xlu1 %695 }
 0x189   : > { %708 = vst.msk [vmem:[#allocation2] sm:$0xff] %vm707_vm6, %v696_v49  ;;  %v927_v59 = vpop.permute.xlu0 %926 }
 0x18a   : > { %937 = vst.msk [vmem:[#allocation2 + $0x20] sm:$0xff] %vm608_vm5, %v927_v59 }
 0x18c   : > { %v778_v45 = vpop.permute.xlu1 %777 }
 0x18d   : > { %v1008_v47 = vpop.permute.xlu0 %1007  ;;  %790 = vst.msk [vmem:[#allocation2] sm:$0xff] %vm789_vm7, %v778_v45 }
 0x18e   : > { %1018 = vst.msk [vmem:[#allocation2 + $0x20] sm:$0xff] %vm707_vm6, %v1008_v47 }
 0x18f   : > { %1099 = vst.msk [vmem:[#allocation2 + $0x20] sm:$0xff] %vm789_vm7, %v1089_v28 }
 0x194   : > { %v1167_v37 = vld [vmem:[#allocation2] sm:$0xff] }
 0x195   : > { %1368 = vmatmul.mubr.bf16.vlgmr.msra.gmra.mrb[0].mxu1 %v1167_v37 }
 0x196   : > { %v1171_v48 = vld [vmem:[#allocation2 + $0x20] sm:$0xff] }
 0x197   : > { %1375 = vmatprep.mubr.bf16.mxu1 %v1171_v48 }
 0x19d   : > { %v1144_v31 = vpop.permute.xlu1 %1143  ;;  %1376 = vmatmul.mubr.bf16.gmra.mrb[4].mxu1 %v1170_v58 }
 0x19e   : > { %v1149_v22 = vpop.permute.xlu0 %1148  ;;  %v1157_v16 = vmul.f32 %v1144_v31, %v2430_v63 }
 0x19f   : > { %v1158_v11 = vmul.f32 %v1149_v22, %v2321_v4 }
 0x1a1   : > { %v1162_v18 = vpack.c.bf16 %v1158_v11, %v1157_v16  ;;  %v603_v53 = vpop.permute.xlu1 %602 }
 0x1a2   : > { %v929_v30 = vpop.permute.xlu0 %928  ;;  %612 = vst.msk [vmem:[#allocation2 + $0x48] sm:$0xff] %vm608_vm5, %v603_v53 }
 0x1a3   : > { %1166 = vst.msk [vmem:[#allocation2 + $0x58] sm:$0xff] %vm526_vm4, %v1162_v18 }
 0x1a4   : > { %938 = vst.msk [vmem:[#allocation2 + $0x38] sm:$0xff] %vm608_vm5, %v929_v30 }
 0x1a5   : > { %v700_v61 = vpop.permute.xlu1 %699 }
 0x1a6   : > { %v1010_v56 = vpop.permute.xlu0 %1009  ;;  %710 = vst.msk [vmem:[#allocation2 + $0x30] sm:$0xff] %vm707_vm6, %v700_v61 }
 0x1a7   : > { %1019 = vst.msk [vmem:[#allocation2 + $0x38] sm:$0xff] %vm707_vm6, %v1010_v56 }
 0x1a8   : > { %1100 = vst.msk [vmem:[#allocation2 + $0x38] sm:$0xff] %vm789_vm7, %v1091_v35 }
 0x1a9   : > { %v782_v63 = vpop.permute.xlu1 %781 }
 0x1aa   : > { %v931_v26 = vpop.permute.xlu0 %930  ;;  %792 = vst.msk [vmem:[#allocation2 + $0x30] sm:$0xff] %vm789_vm7, %v782_v63  ;;  %v1178_v4 = vld [vmem:[#allocation2 + $0x58] sm:$0xff] }
 0x1ab   : > { %939 = vst.msk [vmem:[#allocation2 + $0x50] sm:$0xff] %vm608_vm5, %v931_v26  ;;  %1742 = vmatmul.mubr.msk.bf16.gmra.mrb[12].mxu0 %vm526_vm4, %v1178_v4 }
 0x1ad   : > { %v702_v62 = vpop.permute.xlu1 %701 }
 0x1ae   : > { %v1012_v50 = vpop.permute.xlu0 %1011  ;;  %711 = vst.msk [vmem:[#allocation2 + $0x48] sm:$0xff] %vm707_vm6, %v702_v62 }
 0x1af   : > { %1020 = vst.msk [vmem:[#allocation2 + $0x50] sm:$0xff] %vm707_vm6, %v1012_v50  ;;  %v1174_v44 = vld [vmem:[#allocation2 + $0x38] sm:$0xff] }
 0x1b0   : > { %1383 = vmatprep.mubr.bf16.mxu1 %v1174_v44 }
 0x1b1   : > { %v784_v17 = vpop.permute.xlu1 %783  ;;  %v1173_v8 = vld [vmem:[#allocation2 + $0x30] sm:$0xff] }
 0x1b2   : > { %v1093_v3 = vpop.permute.xlu0 %1092  ;;  %793 = vst.msk [vmem:[#allocation2 + $0x48] sm:$0xff] %vm789_vm7, %v784_v17  ;;  %1384 = vmatmul.mubr.bf16.gmra.mrb[8].mxu1 %v1173_v8 }
 0x1b3   : > { %1101 = vst.msk [vmem:[#allocation2 + $0x50] sm:$0xff] %vm789_vm7, %v1093_v3 }
 0x1b9   : > { %v1176_v10 = vld [vmem:[#allocation2 + $0x48] sm:$0xff] }
 0x1ba   : > { %v1177_v5 = vld [vmem:[#allocation2 + $0x50] sm:$0xff] }
 0x1bb   : > { %1391 = vmatprep.mubr.bf16.mxu1 %v1177_v5 }
 0x1bc   : > { %1392 = vmatmul.mubr.bf16.gmra.mrb[12].mxu1 %v1176_v10 }
 0x1ec   : > { %v1739_v60 = vpop.f32.mrb[8].mxu0 }
 0x1ed   : > { %v1434_v39 = vpop.f32.mrb[9].mxu0 }
 0x1ee   : > { %v1740_v2 = vpop.f32.mrb[10].mxu0 }
 0x1ef   : > { %v1437_v20 = vpop.f32.mrb[11].mxu0 }
 0x268   : > { %v1691_v32 = vpop.f32.mrb[0].mxu1 }
 0x269   : > { %v1692_v38 = vpop.f32.mrb[1].mxu1 }
 0x26a   : > { %v1693_v9 = vadd.f32 %v1692_v38, %v1691_v32  ;;  %v1694_v34 = vpop.f32.mrb[2].mxu1 }
 0x26b   : > { %v1695_v29 = vpop.f32.mrb[3].mxu1 }
 0x26c   : > { %v1435_v33 = vadd.f32 %v1693_v9, %v1434_v39  ;;  %v1696_v46 = vadd.f32 %v1695_v29, %v1694_v34 }
 0x26e   : > { %v1438_v14 = vadd.f32 %v1696_v46, %v1437_v20  ;;  %1473 = vrot.lane.b32.xlu0 %v1435_v33, %s1793_s26 }
 0x270   : > { %1475 = vrot.lane.b32.xlu1 %v1438_v14, %s1793_s26  ;;  %v1697_v15 = vpop.f32.mrb[4].mxu1 }
 0x271   : > { %v1698_v36 = vpop.f32.mrb[5].mxu1 }
 0x272   : > { %v1699_v0 = vadd.f32 %v1698_v36, %v1697_v15  ;;  %v1700_v7 = vpop.f32.mrb[6].mxu1 }
 0x273   : > { %v1701_v13 = vpop.f32.mrb[7].mxu1 }
 0x274   : > { %v1443_v55 = vadd.f32 %v1739_v60, %v1699_v0  ;;  %v1702_v41 = vadd.f32 %v1701_v13, %v1700_v7 }
 0x276   : > { %v1446_v51 = vadd.f32 %v1740_v2, %v1702_v41  ;;  %1477 = vrot.lane.b32.xlu0 %v1443_v55, %s1793_s26 }
 0x278   : > { %1479 = vrot.lane.b32.xlu1 %v1446_v51, %s1793_s26 }
 0x27e   : > { %v1743_v40 = vpop.f32.mrb[12].mxu0 }
 0x27f   : > { %v1450_v25 = vpop.f32.mrb[13].mxu0 }
 0x280   : > { %v1744_v52 = vpop.f32.mrb[14].mxu0 }
 0x281   : > { %v1453_v21 = vpop.f32.mrb[15].mxu0 }
 0x285   : > { %v1703_v42 = vpop.f32.mrb[8].mxu1 }
 0x286   : > { %v1704_v27 = vpop.f32.mrb[9].mxu1 }
 0x287   : > { %v1705_v54 = vadd.f32 %v1704_v27, %v1703_v42  ;;  %v1706_v12 = vpop.f32.mrb[10].mxu1 }
 0x288   : > { %v1707_v1 = vpop.f32.mrb[11].mxu1 }
 0x289   : > { %v1451_v57 = vadd.f32 %v1705_v54, %v1450_v25  ;;  %v1708_v6 = vadd.f32 %v1707_v1, %v1706_v12 }
 0x28b   : > { %v1454_v19 = vadd.f32 %v1708_v6, %v1453_v21  ;;  %1481 = vrot.lane.b32.xlu0 %v1451_v57, %s1793_s26 }
 0x28d   : > { %1483 = vrot.lane.b32.xlu1 %v1454_v19, %s1793_s26 }
 0x28f   : > { %v1709_v24 = vpop.f32.mrb[12].mxu1 }
 0x290   : > { %v1710_v28 = vpop.f32.mrb[13].mxu1 }
 0x291   : > { %v1711_v43 = vadd.f32 %v1710_v28, %v1709_v24  ;;  %v1712_v35 = vpop.f32.mrb[14].mxu1 }
 0x292   : > { %v1713_v23 = vpop.f32.mrb[15].mxu1 }
 0x293   : > { %v1459_v49 = vadd.f32 %v1743_v40, %v1711_v43  ;;  %v1714_v59 = vadd.f32 %v1713_v23, %v1712_v35 }
 0x295   : > { %v1462_v45 = vadd.f32 %v1744_v52, %v1714_v59  ;;  %1485 = vrot.lane.b32.xlu0 %v1459_v49, %s1793_s26 }
 0x297   : > { %1487 = vrot.lane.b32.xlu1 %v1462_v45, %s1793_s26 }
 0x2e0   : > { %v1474_v47 = vpop.permute.xlu0 %1473 }
 0x2e1   : > { %1498 = vst.msk [vmem:[%s1872_s27] sm:$0xff] %vm1497_vm8, %v1474_v47 }
 0x2e2   : > { %v1476_v37 = vpop.permute.xlu1 %1475 }
 0x2e3   : > { %1499 = vst.msk [vmem:[%s1872_s27 + $0x8] sm:$0xff] %vm1497_vm8, %v1476_v37 }
 0x2e8   : > { %v1478_v48 = vpop.permute.xlu0 %1477 }
 0x2e9   : > { %1500 = vst.msk [vmem:[%s1872_s27 + $0x10] sm:$0xff] %vm1497_vm8, %v1478_v48 }
 0x2ea   : > { %v1480_v58 = vpop.permute.xlu1 %1479 }
 0x2eb   : > { %1501 = vst.msk [vmem:[%s1872_s27 + $0x18] sm:$0xff] %vm1497_vm8, %v1480_v58 }
 0x2fd   : > { %v1482_v31 = vpop.permute.xlu0 %1481 }
 0x2fe   : > { %1502 = vst.msk [vmem:[%s1872_s27 + $0x20] sm:$0xff] %vm1497_vm8, %v1482_v31 }
 0x2ff   : > { %v1484_v22 = vpop.permute.xlu1 %1483 }
 0x300   : > { %1503 = vst.msk [vmem:[%s1872_s27 + $0x28] sm:$0xff] %vm1497_vm8, %v1484_v22 }
 0x307   : > { %v1486_v16 = vpop.permute.xlu0 %1485 }
 0x308   : > { %1504 = vst.msk [vmem:[%s1872_s27 + $0x30] sm:$0xff] %vm1497_vm8, %v1486_v16 }
 0x309   : > { %v1488_v11 = vpop.permute.xlu1 %1487 }
 0x30a   : > { %1505 = vst.msk [vmem:[%s1872_s27 + $0x38] sm:$0xff] %vm1497_vm8, %v1488_v11 }
 0x30b PF: > { %s17_s24 = sadd.s32 1, %s1787_s24  }
 0x30c   : > { %p14_p4 = scmp.ge.s32.totalorder %s17_s24, 4  }
 0x30e   :  { %16 = sbr.rel (!%p14_p4) target bundleno = 1 (0x1), region = 86 }

// kernel: dense_block_forward.5
= control target key start
LH: loop header
LB: loop body
LE: loop exit
PB: predicated region body
PF: predicated region fallthrough
CT: control target
= control target key end

     0   :  { %12 = vsyncpa [#allocation4], 0  ;;  %s2844_s0 = inlined_call_operand.vmem [shape: f32[2,8,8,32], index: 0, kind: input, shape index: {}]   ;;  %s2845_s1 = inlined_call_operand.vmem [shape: f32[1,32], index: 1, kind: input, shape index: {}]   ;;  %s2846_s2 = inlined_call_operand.vmem [shape: f32[1,32], index: 2, kind: input, shape index: {}]   ;;  %s2847_s3 = inlined_call_operand.vmem [shape: bf16[32,32], index: 3, kind: input, shape index: {}]   ;;  %s2848_s4 = inlined_call_operand.vmem [shape: f32[1,32], index: 4, kind: input, shape index: {}]   ;;  %s2849_s5 = inlined_call_operand.vmem [shape: bf16[288,8], index: 5, kind: input, shape index: {}]   ;;  %s2850_s6 = inlined_call_operand.vmem [shape: f32[9,64,1], index: 6, kind: input, shape index: {}]   ;;  %s2851_s7 = inlined_call_operand.hbm [shape: f32[2,8,8,40], index: 7, kind: output, shape index: {}]  }
   0x1   :  { %14 = vsyncpa [#allocation4 + $0x1], 0  ;;  %s1942_s24 = smov 0   ;;  %s1944_s25 = smov 0  }
   0x2   :  { %s1946_s26 = smov 0   ;;  %s1948_s27 = smov 0  }
   0x3 LB: > { %s1963_s28 = sadd.s32 4294967295, %s1893_s27   ;;  %s1579_s29 = sadd.s32 4294967294, %s1893_s27   ;;  %s1893_s27 = sphi %s1948_s27, %s2924_s27   ;;  %s1889_s26 = sphi %s1946_s26, %s2923_s26   ;;  %s1885_s25 = sphi %s1944_s25, %s2922_s25   ;;  %s1881_s24 = sphi %s1942_s24, %s2921_s24  }
   0x4   : > { %s1967_s30 = sadd.s32 1, %s1893_s27   ;;  %s179_s8 = sadd.s32 1, %s1889_s26 }
   0x5   : > { %s176_s9 = ssub.s32 %s1893_s27, %s1967_s30  ;;  %p189_p0 = scmp.ne.s32.totalorder %s1889_s26, %s1885_s25 }
   0x6   : > { %p177_p1 = scmp.eq.s32.totalorder %s176_s9, 0  ;;  %p190_p2 = scmp.eq.s32.totalorder %s1963_s28, 1 }
   0x7   : > { %p195_p3 = scmp.ne.s32.totalorder %s1885_s25, %s1881_s24  ;;  %p196_p4 = scmp.eq.s32.totalorder %s1579_s29, 1 }
   0x8   : > { %s1978_s10 = scalar_select %p177_p1, %s1889_s26, %s179_s8  }
   0x9   : > { %p1980_p5 = por %p190_p2, %p189_p0  ;;  %p1984_p6 = por %p196_p4, %p195_p3 }
   0xa   : > { %p1582_p7 = scmp.ge.s32.totalorder %s1893_s27, 1  ;;  %p240_p8 = scmp.lt.s32.totalorder %s1893_s27, 3 }
   0xc   : > { %p241_p9 = pnand %p1582_p7, %p240_p8 }
   0xe   : > { %244 = sbr.rel (%p241_p9) target bundleno = 801 (0x321), region = 48 }
  0x15   : > { %v1595_v0 = vld [vmem:[%s2850_s6 + $0x40] sm:$0xff]  ;;  %p272_p10 = scmp.lt.s32.totalorder %s1963_s28, 1  ;;  %v1895_v2 = vmov 0   ;;  %v1596_v3 = vld [vmem:[%s2850_s6 + $0x48] sm:$0xff]  ;;  %vm286_vm0 = vcmask 261120   ;;  %v1630_v53 = vld [vmem:[%s2850_s6 + $0x158] sm:$0xff] }
  0x16   : > { %v1627_v1 = vld [vmem:[%s2850_s6 + $0x140] sm:$0xff]  ;;  %1810 = vset.pattern.permute.xlu1 %v1895_v2  ;;  %1809 = vset.pattern.permute.xlu0 %v1895_v2  ;;  %v1628_v4 = vld [vmem:[%s2850_s6 + $0x148] sm:$0xff]  ;;  %v1629_v54 = vld [vmem:[%s2850_s6 + $0x150] sm:$0xff]  ;;  %s1897_s19 = smov 32   ;;  %s1898_s29 = smov 64   ;;  %vm605_vm3 = vcmask 523520  }
  0x17   : > { %539 = vperm.xlu1 %1810, %v1595_v0   ;;  %867 = vperm.xlu0 %1809, %v1627_v1   ;;  %v1811_v5 = vld [vmem:[%s2847_s3] sm:$0xff]   ;;  %s273_s23 = scalar_select %p272_p10, %s1963_s28, 1  ;;  %v1812_v6 = vld [vmem:[%s2847_s3 + $0x8] sm:$0xff]   ;;  %v1598_v55 = vld [vmem:[%s2850_s6 + $0x58] sm:$0xff]  ;;  %vm704_vm4 = vcmask 785920   ;;  %vm786_vm5 = vcmask 1048320  }
  0x18   : > { %1740 = vmatprep.subr.bf16.mxu0 %v1811_v5  ;;  %v1586_v7 = vld [vmem:[%s2845_s1] ss:$0 sm:$0xff]  ;;  %v1636_v12 = vld [vmem:[%s2850_s6 + $0x188] sm:$0xff]  ;;  %v1597_v56 = vld [vmem:[%s2850_s6 + $0x50] sm:$0xff]  ;;  %vm1494_vm6 = vcmask 326912   ;;  %s1899_s14 = smov [#allocation3]  }
  0x19   : > { %s1686_s9 = sshll.u32 %s273_s23, 6  ;;  %1741 = vmatpush3.bf16.msra.mxu0 %v1811_v5  ;;  %v1587_v8 = vld [vmem:[%s2846_s2] ss:$0 sm:$0xff]  ;;  %v1604_v30 = vld [vmem:[%s2850_s6 + $0x88] sm:$0xff]  ;;  %v1638_v57 = vld [vmem:[%s2850_s6 + $0x198] sm:$0xff]  ;;  %s1835_s15 = sshll.u32 %s1899_s14, 4  ;;  %s1836_s15 = int_to_ptr.vmem [resolvable:$false] %s1835_s15 }
  0x1a   : > { %s276_s17 = scalar_lea.vmem %s2844_s0, %s1686_s9  ;;  %v1635_v13 = vld [vmem:[%s2850_s6 + $0x180] sm:$0xff]  ;;  %1742 = vmatprep.subr.bf16.mxu0 %v1812_v6  ;;  %v1644_v45 = vld [vmem:[%s2850_s6 + $0x1c8] sm:$0xff]  ;;  %v1637_v58 = vld [vmem:[%s2850_s6 + $0x190] sm:$0xff]  ;;  %s1896_s9 = smov 96  }
  0x1b   : > { %544 = vperm.xlu1 %1810, %v1596_v3   ;;  %872 = vperm.xlu0 %1809, %v1628_v4   ;;  %v2019_v9 = vld [vmem:[%s276_s17] sm:$0xff]  ;;  %v2021_v10 = vld [vmem:[%s276_s17 + $0x8] sm:$0xff]  ;;  %v2023_v11 = vld [vmem:[%s276_s17 + $0x10] sm:$0xff]  ;;  %s1837_s16 = scalar_lea.vmem %s1836_s15, 2048 }
  0x1c   : > { %2863 = vst [vmem:[#allocation6_spill] sm:$0xff] %v2019_v9  ;;  %2864 = vst [vmem:[#allocation7_spill] sm:$0xff] %v2021_v10  ;;  %v302_v14 = vmul.f32 %v1586_v7, %v2019_v9  ;;  %v303_v15 = vmul.f32 %v1586_v7, %v2021_v10  ;;  %v2033_v16 = vld [vmem:[%s276_s17 + $0x18] sm:$0xff]  ;;  %v304_v17 = vmul.f32 %v1586_v7, %v2023_v11  ;;  %v2037_v19 = vld [vmem:[%s276_s17 + $0x20] sm:$0xff] }
  0x1d   : > { %2865 = vst [vmem:[#allocation8_spill] sm:$0xff] %v2023_v11  ;;  %2866 = vst [vmem:[#allocation9_spill] sm:$0xff] %v2033_v16  ;;  %v305_v18 = vmul.f32 %v1586_v7, %v2033_v16  ;;  %v2039_v20 = vld [vmem:[%s276_s17 + $0x28] sm:$0xff]  ;;  %v2041_v21 = vld [vmem:[%s276_s17 + $0x30] sm:$0xff]  ;;  %1743 = vmatpush3.bf16.msra.mxu0 %v1812_v6  ;;  %v306_v25 = vmul.f32 %v1586_v7, %v2037_v19 }
  0x1e   : > { %2867 = vst [vmem:[#allocation10_spill] sm:$0xff] %v2037_v19  ;;  %2868 = vst [vmem:[#allocation11_spill] sm:$0xff] %v2039_v20  ;;  %v317_v22 = vadd.f32 %v1587_v8, %v302_v14  ;;  %v318_v23 = vadd.f32 %v1587_v8, %v303_v15  ;;  %v319_v24 = vadd.f32 %v1587_v8, %v304_v17  ;;  %v2044_v26 = vld [vmem:[%s276_s17 + $0x38] sm:$0xff]  ;;  %v1603_v31 = vld [vmem:[%s2850_s6 + $0x80] sm:$0xff] }
  0x1f   : > { %2869 = vst [vmem:[#allocation12_spill] sm:$0xff] %v2041_v21  ;;  %2870 = vst [vmem:[#allocation13_spill] sm:$0xff] %v2044_v26  ;;  %953 = vperm.xlu1 %1810, %v1636_v12   ;;  %948 = vperm.xlu0 %1809, %v1635_v13   ;;  %v320_v27 = vadd.f32 %v1587_v8, %v305_v18  ;;  %v307_v28 = vmul.f32 %v1586_v7, %v2039_v20  ;;  %v1643_v46 = vld [vmem:[%s2850_s6 + $0x1c0] sm:$0xff]  ;;  %v1612_v50 = vld [vmem:[%s2850_s6 + $0xc8] sm:$0xff] }
  0x20   : > { %v308_v29 = vmul.f32 %v1586_v7, %v2041_v21  ;;  %v325_v32 = vmax.f32 %v317_v22, 0.0  ;;  %v326_v33 = vmax.f32 %v318_v23, 0.0  ;;  %v327_v34 = vmax.f32 %v319_v24, 0.0  ;;  %v1611_v51 = vld [vmem:[%s2850_s6 + $0xc0] sm:$0xff]  ;;  %v1606_v59 = vld [vmem:[%s2850_s6 + $0x98] sm:$0xff]  ;;  %v1605_v60 = vld [vmem:[%s2850_s6 + $0x90] sm:$0xff] }
  0x21   : > { %v321_v35 = vadd.f32 %v1587_v8, %v306_v25  ;;  %v328_v36 = vmax.f32 %v320_v27, 0.0  ;;  %v322_v37 = vadd.f32 %v1587_v8, %v307_v28  ;;  %v309_v38 = vmul.f32 %v1586_v7, %v2044_v26  ;;  %v1646_v61 = vld [vmem:[%s2850_s6 + $0x1d8] sm:$0xff]  ;;  %v1645_v62 = vld [vmem:[%s2850_s6 + $0x1d0] sm:$0xff]  ;;  %v1632_v1 = vld [vmem:[%s2850_s6 + $0x168] sm:$0xff] }
  0x22   : > { %v323_v39 = vadd.f32 %v1587_v8, %v308_v29  ;;  %v333_v40 = vpack.c.bf16 %v326_v33, %v325_v32  ;;  %v1614_v63 = vld [vmem:[%s2850_s6 + $0xd8] sm:$0xff]  ;;  %v1613_v0 = vld [vmem:[%s2850_s6 + $0xd0] sm:$0xff]  ;;  %v1631_v2 = vld [vmem:[%s2850_s6 + $0x160] sm:$0xff] }
  0x23   : > { %v329_v41 = vmax.f32 %v321_v35, 0.0  ;;  %643 = vperm.xlu1 %1810, %v1604_v30   ;;  %638 = vperm.xlu0 %1809, %v1603_v31   ;;  %v334_v42 = vpack.c.bf16 %v328_v36, %v327_v34  ;;  %v330_v43 = vmax.f32 %v322_v37, 0.0  ;;  %v324_v44 = vadd.f32 %v1587_v8, %v309_v38  ;;  %v1600_v3 = vld [vmem:[%s2850_s6 + $0x68] sm:$0xff]  ;;  %v1599_v4 = vld [vmem:[%s2850_s6 + $0x60] sm:$0xff]  ;;  %v1634_v17 = vld [vmem:[%s2850_s6 + $0x178] sm:$0xff] }
  0x24   : > { %1744 = vmatprep.mubr.msk.bf16.mxu0 %vm286_vm0, %v333_v40  ;;  %v331_v48 = vmax.f32 %v323_v39, 0.0  ;;  %v1640_v5 = vld [vmem:[%s2850_s6 + $0x1a8] sm:$0xff]  ;;  %v1639_v6 = vld [vmem:[%s2850_s6 + $0x1a0] sm:$0xff]  ;;  %v1633_v18 = vld [vmem:[%s2850_s6 + $0x170] sm:$0xff] }
  0x25   : > { %1745 = vmatmul.mubr.msk.bf16.vlgmr.msra.gmra.mrb[0].mxu0 %vm286_vm0, %v334_v42  ;;  %v335_v47 = vpack.c.bf16 %v330_v43, %v329_v41  ;;  %v332_v49 = vmax.f32 %v324_v44, 0.0  ;;  %v1608_v7 = vld [vmem:[%s2850_s6 + $0xa8] sm:$0xff]  ;;  %v1607_v8 = vld [vmem:[%s2850_s6 + $0xa0] sm:$0xff]  ;;  %v1602_v22 = vld [vmem:[%s2850_s6 + $0x78] sm:$0xff] }
  0x26   : > { %v1648_v12 = vld [vmem:[%s2850_s6 + $0x1e8] sm:$0xff]  ;;  %v1647_v13 = vld [vmem:[%s2850_s6 + $0x1e0] sm:$0xff]  ;;  %v1601_v23 = vld [vmem:[%s2850_s6 + $0x70] sm:$0xff] }
  0x27   : > { %1034 = vperm.xlu1 %1810, %v1644_v45   ;;  %1029 = vperm.xlu0 %1809, %v1643_v46   ;;  %v336_v52 = vpack.c.bf16 %v332_v49, %v331_v48  ;;  %v1616_v14 = vld [vmem:[%s2850_s6 + $0xe8] sm:$0xff]  ;;  %v1615_v15 = vld [vmem:[%s2850_s6 + $0xe0] sm:$0xff]  ;;  %v1642_v24 = vld [vmem:[%s2850_s6 + $0x1b8] sm:$0xff] }
  0x28   : > { %1748 = vmatprep.mubr.msk.bf16.mxu0 %vm286_vm0, %v335_v47  ;;  %v1641_v25 = vld [vmem:[%s2850_s6 + $0x1b0] sm:$0xff]  ;;  %v1610_v27 = vld [vmem:[%s2850_s6 + $0xb8] sm:$0xff]  ;;  %v1620_v33 = vld [vmem:[%s2850_s6 + $0x108] sm:$0xff] }
  0x29   : > { %v1609_v28 = vld [vmem:[%s2850_s6 + $0xb0] sm:$0xff]  ;;  %v1650_v29 = vld [vmem:[%s2850_s6 + $0x1f8] sm:$0xff]  ;;  %v1619_v34 = vld [vmem:[%s2850_s6 + $0x100] sm:$0xff] }
  0x2a   : > { %v1649_v30 = vld [vmem:[%s2850_s6 + $0x1f0] sm:$0xff]  ;;  %v1618_v31 = vld [vmem:[%s2850_s6 + $0xf8] sm:$0xff]  ;;  %v465_v35 = vld [vmem:[%s2850_s6 + $0x8] sm:$0xff] }
  0x2b   : > { %725 = vperm.xlu1 %1810, %v1612_v50   ;;  %720 = vperm.xlu0 %1809, %v1611_v51   ;;  %v1617_v32 = vld [vmem:[%s2850_s6 + $0xf0] sm:$0xff]  ;;  %v464_v36 = vld [vmem:[%s2850_s6] sm:$0xff]  ;;  %v1622_v37 = vld [vmem:[%s2850_s6 + $0x118] sm:$0xff] }
  0x2c   : > { %v1621_v38 = vld [vmem:[%s2850_s6 + $0x110] sm:$0xff]  ;;  %v467_v39 = vld [vmem:[%s2850_s6 + $0x18] sm:$0xff]  ;;  %v1624_v41 = vld [vmem:[%s2850_s6 + $0x128] sm:$0xff] }
  0x2d   : > { %1749 = vmatmul.mubr.msk.bf16.gmra.mrb[4].mxu0 %vm286_vm0, %v336_v52  ;;  %v466_v40 = vld [vmem:[%s2850_s6 + $0x10] sm:$0xff]  ;;  %v1623_v42 = vld [vmem:[%s2850_s6 + $0x120] sm:$0xff]  ;;  %v469_v43 = vld [vmem:[%s2850_s6 + $0x28] sm:$0xff] }
  0x2e   : > { %v468_v44 = vld [vmem:[%s2850_s6 + $0x20] sm:$0xff]  ;;  %v1652_v46 = vld [vmem:[%s2850_s6 + $0x208] sm:$0xff]  ;;  %v1653_v47 = vld [vmem:[%s2850_s6 + $0x210] sm:$0xff] }
  0x2f   : > { %882 = vperm.xlu1 %1810, %v1630_v53   ;;  %877 = vperm.xlu0 %1809, %v1629_v54   ;;  %v1651_v45 = vld [vmem:[%s2850_s6 + $0x200] sm:$0xff]  ;;  %v1654_v48 = vld [vmem:[%s2850_s6 + $0x218] sm:$0xff]  ;;  %v1625_v50 = vld [vmem:[%s2850_s6 + $0x130] sm:$0xff] }
  0x30   : > { %v1626_v49 = vld [vmem:[%s2850_s6 + $0x138] sm:$0xff]  ;;  %v470_v54 = vld [vmem:[%s2850_s6 + $0x30] sm:$0xff]  ;;  %v1815_v11 = vld [vmem:[%s2849_s5 + $0x40] sm:$0xff]  }
  0x31   : > { %v471_v53 = vld [vmem:[%s2850_s6 + $0x38] sm:$0xff]  ;;  %1694 = vmatprep.subr.bf16.mxu1 %v1815_v11 }
  0x33   : > { %554 = vperm.xlu1 %1810, %v1598_v55   ;;  %549 = vperm.xlu0 %1809, %v1597_v56  }
  0x37   : > { %963 = vperm.xlu1 %1810, %v1638_v57   ;;  %958 = vperm.xlu0 %1809, %v1637_v58   ;;  %v1813_v57 = vld [vmem:[%s2849_s5 + $0x80] sm:$0xff]  }
  0x38   : > { %v1655_v58 = vld [vmem:[%s2850_s6 + $0x220] sm:$0xff]  ;;  %1752 = vmatprep.subr.bf16.mxu0 %v1813_v57 }
  0x39   : > { %1753 = vmatpush3.bf16.msra.mxu0 %v1813_v57 }
  0x3b   : > { %653 = vperm.xlu1 %1810, %v1606_v59   ;;  %648 = vperm.xlu0 %1809, %v1605_v60   ;;  %v1656_v59 = vld [vmem:[%s2850_s6 + $0x228] sm:$0xff] }
  0x3f   : > { %1044 = vperm.xlu1 %1810, %v1646_v61   ;;  %1039 = vperm.xlu0 %1809, %v1645_v62   ;;  %v1814_v62 = vld [vmem:[%s2849_s5 + $0x88] sm:$0xff]  }
  0x40   : > { %1754 = vmatprep.subr.bf16.mxu0 %v1814_v62 }
  0x41   : > { %1755 = vmatpush3.bf16.msra.mxu0 %v1814_v62 }
  0x43   : > { %735 = vperm.xlu1 %1810, %v1614_v63   ;;  %730 = vperm.xlu0 %1809, %v1613_v0  }
  0x47   : > { %892 = vperm.xlu1 %1810, %v1632_v1   ;;  %887 = vperm.xlu0 %1809, %v1631_v2  }
  0x4b   : > { %564 = vperm.xlu1 %1810, %v1600_v3   ;;  %559 = vperm.xlu0 %1809, %v1599_v4  }
  0x4f   : > { %973 = vperm.xlu1 %1810, %v1640_v5   ;;  %968 = vperm.xlu0 %1809, %v1639_v6  }
  0x53   : > { %663 = vperm.xlu1 %1810, %v1608_v7   ;;  %658 = vperm.xlu0 %1809, %v1607_v8  }
  0x57   : > { %1054 = vperm.xlu1 %1810, %v1648_v12   ;;  %1049 = vperm.xlu0 %1809, %v1647_v13  }
  0x5b   : > { %745 = vperm.xlu1 %1810, %v1616_v14   ;;  %740 = vperm.xlu0 %1809, %v1615_v15  }
  0x5f   : > { %902 = vperm.xlu1 %1810, %v1634_v17   ;;  %897 = vperm.xlu0 %1809, %v1633_v18  }
  0x63   : > { %574 = vperm.xlu1 %1810, %v1602_v22   ;;  %569 = vperm.xlu0 %1809, %v1601_v23  }
  0x67   : > { %983 = vperm.xlu1 %1810, %v1642_v24   ;;  %978 = vperm.xlu0 %1809, %v1641_v25  }
  0x6b   : > { %673 = vperm.xlu1 %1810, %v1610_v27   ;;  %668 = vperm.xlu0 %1809, %v1609_v28  }
  0x6f   : > { %1064 = vperm.xlu1 %1810, %v1650_v29   ;;  %1059 = vperm.xlu0 %1809, %v1649_v30  }
  0x73   : > { %755 = vperm.xlu1 %1810, %v1618_v31   ;;  %750 = vperm.xlu0 %1809, %v1617_v32  }
  0x77   : > { %807 = vperm.xlu1 %1810, %v1620_v33   ;;  %802 = vperm.xlu0 %1809, %v1619_v34  }
  0x7b   : > { %479 = vperm.xlu1 %1810, %v465_v35   ;;  %474 = vperm.xlu0 %1809, %v464_v36  }
  0x7f   : > { %817 = vperm.xlu1 %1810, %v1622_v37   ;;  %812 = vperm.xlu0 %1809, %v1621_v38  }
  0x83   : > { %489 = vperm.xlu1 %1810, %v467_v39   ;;  %484 = vperm.xlu0 %1809, %v466_v40  }
  0x87   : > { %827 = vperm.xlu1 %1810, %v1624_v41   ;;  %822 = vperm.xlu0 %1809, %v1623_v42  }
  0x8b   : > { %499 = vperm.xlu1 %1810, %v469_v43   ;;  %494 = vperm.xlu0 %1809, %v468_v44  }
  0x8f   : > { %1110 = vperm.xlu1 %1810, %v1651_v45   ;;  %1115 = vperm.xlu0 %1809, %v1652_v46  }
  0x93   : > { %1120 = vperm.xlu1 %1810, %v1653_v47   ;;  %1125 = vperm.xlu0 %1809, %v1654_v48  }
  0x96   : > { %v2233_v51 = vpop.permute.xlu1 %539  ;;  %v2235_v52 = vpop.permute.xlu0 %867 }
  0x97   : > { %837 = vperm.xlu1 %1810, %v1626_v49   ;;  %832 = vperm.xlu0 %1809, %v1625_v50   ;;  %v453_v49 = vlaneseq }
  0x9a   : > { %v2243_v55 = vpop.permute.xlu1 %544  ;;  %v2245_v56 = vpop.permute.xlu0 %872 }
  0x9b   : > { %509 = vperm.xlu1 %1810, %v471_v53   ;;  %504 = vperm.xlu0 %1809, %v470_v54   ;;  %v2346_v54 = vld [vmem:[%s2848_s4] ss:$0 sm:$0xff] }
  0x9e   : > { %v2256_v60 = vpop.permute.xlu1 %953  ;;  %v2258_v61 = vpop.permute.xlu0 %948 }
  0x9f   : > { %1130 = vperm.xlu1 %1810, %v1655_v58   ;;  %1135 = vperm.xlu0 %1809, %v1656_v59   ;;  %v2348_v58 = vshrl.u32 %v453_v49, 7  ;;  %v1816_v49 = vld [vmem:[%s2849_s5] sm:$0xff]  }
  0xa0   : > { %1695 = vmatpush3.bf16.msra.mxu1 %v1816_v49 }
  0xa1   : > { %vm455_vm1 = vcmp.lt.s32.totalorder %v2348_v58, 1  ;;  %vm618_vm2 = vcmp.lt.s32.totalorder %v2348_v58, 7 }
  0xa2   : > { %v2263_v63 = vpop.permute.xlu1 %643  ;;  %v2265_v0 = vpop.permute.xlu0 %638 }
  0xa6   : > { %v1035_v1 = vpop.permute.xlu1 %1034  ;;  %v2267_v2 = vpop.permute.xlu0 %1029 }
  0xaa   : > { %v2269_v3 = vpop.permute.xlu1 %725  ;;  %v2271_v4 = vpop.permute.xlu0 %720 }
  0xab   : > { %2871 = vst [vmem:[#allocation14_spill] sm:$0xff] %v2271_v4 }
  0xae   : > { %v2273_v5 = vpop.permute.xlu1 %882  ;;  %v2275_v6 = vpop.permute.xlu0 %877 }
  0xb2   : > { %v555_v7 = vpop.permute.xlu1 %554  ;;  %v2277_v8 = vpop.permute.xlu0 %549 }
  0xb6   : > { %v2279_v12 = vpop.permute.xlu1 %963  ;;  %v2281_v13 = vpop.permute.xlu0 %958 }
  0xba   : > { %v2283_v14 = vpop.permute.xlu1 %653  ;;  %v2285_v15 = vpop.permute.xlu0 %648 }
  0xbe   : > { %v2287_v17 = vpop.permute.xlu1 %1044  ;;  %v2289_v18 = vpop.permute.xlu0 %1039 }
  0xc2   : > { %v2291_v22 = vpop.permute.xlu1 %735  ;;  %v2293_v23 = vpop.permute.xlu0 %730 }
  0xc6   : > { %v2295_v24 = vpop.permute.xlu1 %892  ;;  %v2297_v25 = vpop.permute.xlu0 %887 }
  0xc7   : > { %2872 = vst [vmem:[#allocation15_spill] sm:$0xff] %v2295_v24 }
  0xca   : > { %v2299_v27 = vpop.permute.xlu1 %564  ;;  %v560_v28 = vpop.permute.xlu0 %559 }
  0xce   : > { %v2301_v29 = vpop.permute.xlu1 %973  ;;  %v2303_v30 = vpop.permute.xlu0 %968 }
  0xd2   : > { %v2305_v31 = vpop.permute.xlu1 %663  ;;  %v2307_v32 = vpop.permute.xlu0 %658 }
  0xd6   : > { %v2309_v33 = vpop.permute.xlu1 %1054  ;;  %v2311_v34 = vpop.permute.xlu0 %1049 }
  0xda   : > { %v2313_v35 = vpop.permute.xlu1 %745  ;;  %v2315_v36 = vpop.permute.xlu0 %740 }
  0xde   : > { %v2317_v37 = vpop.permute.xlu1 %902  ;;  %v2319_v38 = vpop.permute.xlu0 %897 }
  0xdf   : > { %2873 = vst [vmem:[#allocation16_spill] sm:$0xff] %v2317_v37  ;;  %2874 = vst [vmem:[#allocation17_spill] sm:$0xff] %v2319_v38 }
  0xe2   : > { %v2321_v39 = vpop.permute.xlu1 %574  ;;  %v2323_v40 = vpop.permute.xlu0 %569 }
  0xe6   : > { %v2325_v41 = vpop.permute.xlu1 %983  ;;  %v2327_v42 = vpop.permute.xlu0 %978 }
  0xe7   : > { %2875 = vst [vmem:[#allocation18_spill] sm:$0xff] %v2325_v41  ;;  %2876 = vst [vmem:[#allocation19_spill] sm:$0xff] %v2327_v42 }
  0xea   : > { %v2329_v43 = vpop.permute.xlu1 %673  ;;  %v2331_v44 = vpop.permute.xlu0 %668 }
  0xeb   : > { %2877 = vst [vmem:[#allocation20_spill] sm:$0xff] %v2329_v43  ;;  %2878 = vst [vmem:[#allocation21_spill] sm:$0xff] %v2331_v44 }
  0xee   : > { %v1065_v45 = vpop.permute.xlu1 %1064  ;;  %v2333_v46 = vpop.permute.xlu0 %1059 }
  0xef   : > { %2879 = vst [vmem:[#allocation22_spill] sm:$0xff] %v2333_v46 }
  0xf2   : > { %v2335_v47 = vpop.permute.xlu1 %755  ;;  %v2337_v48 = vpop.permute.xlu0 %750 }
  0xf3   : > { %2880 = vst [vmem:[#allocation23_spill] sm:$0xff] %v2335_v47 }
  0xf6   : > { %v2339_v50 = vpop.permute.xlu1 %807  ;;  %v2341_v53 = vpop.permute.xlu0 %802 }
  0xf7   : > { %2881 = vst [vmem:[#allocation24_spill] sm:$0xff] %v2339_v50  ;;  %2882 = vst [vmem:[#allocation25_spill] sm:$0xff] %v2341_v53 }
  0xf8   : > { %v1746_v57 = vpop.f32.mrb[0].mxu0 }
  0xf9   : > { %v415_v59 = vadd.f32 %v1746_v57, %v2346_v54  ;;  %v406_v62 = vpop.f32.mrb[1].mxu0 }
  0xfa   : > { %v407_v26 = vadd.f32 %v2346_v54, %v406_v62  ;;  %v2352_v21 = vpop.permute.xlu1 %479  ;;  %v2354_v20 = vpop.permute.xlu0 %474 }
  0xfb   : > { %2883 = vst [vmem:[#allocation26_spill] sm:$0xff] %v2352_v21  ;;  %2884 = vst [vmem:[#allocation27_spill] sm:$0xff] %v2354_v20  ;;  %v2356_v19 = vmax.f32 %v415_v59, 0.0  ;;  %v1747_v16 = vpop.f32.mrb[2].mxu0 }
  0xfc   : > { %v2364_v10 = vmax.f32 %v407_v26, 0.0  ;;  %v418_v57 = vadd.f32 %v1747_v16, %v2346_v54  ;;  %v409_v62 = vpop.f32.mrb[3].mxu0 }
  0xfd   : > { %v410_v59 = vadd.f32 %v2346_v54, %v409_v62  ;;  %v1068_v21 = vmul.f32 %v1035_v1, %v2356_v19  ;;  %v2373_v20 = vmul.f32 %v555_v7, %v2356_v19  ;;  %v612_v47 = vrot.slane %v2356_v19, 1 }
  0xfe   : > { %v2375_v50 = vmax.f32 %v418_v57, 0.0  ;;  %v818_v26 = vpop.permute.xlu1 %817  ;;  %v813_v53 = vpop.permute.xlu0 %812  ;;  %v2385_v1 = vmul.f32 %v2243_v55, %v2364_v10  ;;  %v2388_v11 = vmul.f32 %v1065_v45, %v2364_v10  ;;  %v1818_v55 = vld [vmem:[%s2849_s5 + $0x8] sm:$0xff]  }
  0xff   : > { %v2380_v62 = vmax.f32 %v410_v59, 0.0  ;;  %v842_v9 = vmul.f32 %v813_v53, %v2356_v19  ;;  %v1817_v53 = vld [vmem:[%s2849_s5 + $0x48] sm:$0xff]  }
 0x100   : > { %2886 = vst [vmem:[#allocation29_spill] sm:$0xff] %v2388_v11  ;;  %v843_v7 = vmul.f32 %v818_v26, %v2375_v50  ;;  %v1750_v57 = vpop.f32.mrb[4].mxu0  ;;  %v2394_v49 = vmul.f32 %v560_v28, %v2375_v50  ;;  %v2887_v38 = vrot.slane %v2375_v50, 1  ;;  %1696 = vmatprep.subr.bf16.mxu1 %v1817_v53 }
 0x101   : > { %2885 = vst [vmem:[#allocation28_spill] sm:$0xff] %v2380_v62  ;;  %v431_v45 = vadd.f32 %v1750_v57, %v2346_v54  ;;  %v422_v59 = vpop.f32.mrb[5].mxu0  ;;  %v446_v26 = vrot.slane %v2380_v62, 7  ;;  %v1067_v46 = vmul.f32 %v2267_v2, %v2380_v62  ;;  %v579_v28 = vmul.f32 %v2277_v8, %v2380_v62  ;;  %1697 = vmatpush3.bf16.msra.mxu1 %v1818_v55 }
 0x102   : > { %v849_v42 = vpack.c.bf16 %v843_v7, %v842_v9  ;;  %v423_v16 = vadd.f32 %v2346_v54, %v422_v59  ;;  %v490_v11 = vpop.permute.xlu1 %489  ;;  %v485_v41 = vpop.permute.xlu0 %484  ;;  %v611_v37 = vrot.slane %v2380_v62, 1  ;;  %v2414_v57 = vsel %vm618_vm2, %v612_v47, %v2887_v38 }
 0x103   : > { %v2416_v43 = vmax.f32 %v431_v45, 0.0  ;;  %v2888_v2 = vrot.slane %v2356_v19, 7  ;;  %v2889_v8 = vrot.slane %v2364_v10, 7  ;;  %v1751_v59 = vpop.f32.mrb[6].mxu0  ;;  %v1075_v62 = vpack.c.bf16 %v1068_v21, %v1067_v46 }
 0x104   : > { %853 = vst.msk [vmem:[#allocation2 + $0x20] sm:$0xff] %vm286_vm0, %v849_v42  ;;  %v2427_v38 = vmax.f32 %v423_v16, 0.0  ;;  %v434_v21 = vadd.f32 %v1751_v59, %v2346_v54  ;;  %v624_v46 = vsel %vm618_vm2, %v611_v37, %v612_v47  ;;  %v679_v16 = vmul.f32 %v2283_v14, %v2414_v57 }
 0x105   : > { %v461_v9 = vsel %vm455_vm1, %v446_v26, %v2888_v2  ;;  %v462_v7 = vsel %vm455_vm1, %v2889_v8, %v446_v26  ;;  %v425_v2 = vpop.f32.mrb[7].mxu0  ;;  %1083 = vrot.lane.b32.xlu0 %v1075_v62, %s1896_s9  ;;  %v2890_v47 = vrot.slane %v2364_v10, 1  ;;  %v2892_v59 = vrot.slane %v2356_v19, 7 }
 0x106   : > { %v515_v53 = vmul.f32 %v490_v11, %v461_v9  ;;  %v2430_v45 = vmul.f32 %v2293_v23, %v461_v9  ;;  %v2433_v24 = vmul.f32 %v2256_v60, %v461_v9  ;;  %v514_v44 = vmul.f32 %v485_v41, %v462_v7  ;;  %v1819_v23 = vld [vmem:[%s2849_s5 + $0x50] sm:$0xff]   ;;  %v828_v42 = vpop.permute.xlu1 %827 }
 0x107   : > { %v2436_v4 = vmul.f32 %v2269_v3, %v462_v7  ;;  %v2439_v26 = vmul.f32 %v2258_v61, %v462_v7  ;;  %v1820_v60 = vld [vmem:[%s2849_s5 + $0x10] sm:$0xff]   ;;  %v426_v41 = vadd.f32 %v2346_v54, %v425_v2  ;;  %v586_v3 = vpack.c.bf16 %v2373_v20, %v579_v28  ;;  %v823_v61 = vpop.permute.xlu0 %822  ;;  %1698 = vmatprep.subr.bf16.mxu1 %v1819_v23  ;;  %v1821_v20 = vld [vmem:[%s2849_s5 + $0x58] sm:$0xff]  }
 0x108   : > { %v521_v62 = vpack.c.bf16 %v515_v53, %v514_v44  ;;  %v2455_v11 = vmax.f32 %v434_v21, 0.0  ;;  %v844_v55 = vmul.f32 %v823_v61, %v2427_v38  ;;  %v678_v9 = vmul.f32 %v2285_v15, %v624_v46  ;;  %1699 = vmatpush3.bf16.msra.mxu1 %v1820_v60  ;;  %v1823_v61 = vld [vmem:[%s2849_s5 + $0x60] sm:$0xff]  }
 0x109   : > { %v2462_v54 = vmax.f32 %v426_v41, 0.0  ;;  %595 = vrot.lane.b32.xlu1 %v586_v3, %s1897_s19  ;;  %v2469_v14 = vsel %vm618_vm2, %v2890_v47, %v611_v37  ;;  %v906_v44 = vmul.f32 %v2245_v56, %v624_v46  ;;  %v449_v15 = vrot.slane %v2427_v38, 7  ;;  %1700 = vmatprep.subr.bf16.mxu1 %v1821_v20  ;;  %v1822_v56 = vld [vmem:[%s2849_s5 + $0x18] sm:$0xff]  }
 0x10a   : > { %525 = vst.msk [vmem:[#allocation2 + $0x18] sm:$0xff] %vm286_vm0, %v521_v62  ;;  %v685_v28 = vpack.c.bf16 %v679_v16, %v678_v9  ;;  %v905_v8 = vmul.f32 %v2235_v52, %v2469_v14  ;;  %v2891_v7 = vrot.slane %v2375_v50, 7  ;;  %v994_v37 = vpack.c.bf16 %v2433_v24, %v2439_v26  ;;  %v500_v21 = vpop.permute.xlu1 %499 }
 0x10b   : > { %v845_v2 = vmul.f32 %v828_v42, %v2462_v54  ;;  %v495_v23 = vpop.permute.xlu0 %494  ;;  %v582_v62 = vmul.f32 %v2299_v27, %v2427_v38  ;;  %v614_v9 = vrot.slane %v2427_v38, 1 }
 0x10c   : > { %v460_v53 = vsel %vm455_vm1, %v2892_v59, %v2891_v7  ;;  %v2893_v52 = vmov %v2891_v7  ;;  %v913_v26 = vpack.c.bf16 %v906_v44, %v905_v8  ;;  %1701 = vmatpush3.bf16.msra.mxu1 %v1822_v56  ;;  %v577_v44 = vmul.f32 %v2233_v51, %v2455_v11 }
 0x10d   : > { %v459_v19 = vsel %vm455_vm1, %v2893_v52, %v449_v15  ;;  %v761_v60 = vmul.f32 %v2291_v22, %v460_v53  ;;  %v2496_v24 = vmul.f32 %v2281_v13, %v460_v53  ;;  %v850_v16 = vpack.c.bf16 %v845_v2, %v844_v55  ;;  %694 = vrot.lane.b32.xlu1 %v685_v28, %s1898_s29 }
 0x10e   : > { %v517_v41 = vmul.f32 %v500_v21, %v459_v19  ;;  %v2499_v3 = vmul.f32 %v2315_v36, %v459_v19  ;;  %v2502_v42 = vmul.f32 %v2279_v12, %v459_v19  ;;  %v516_v22 = vmul.f32 %v495_v23, %v460_v53  ;;  %921 = vrot.lane.b32.xlu0 %v913_v26, %s1897_s19  ;;  %v1825_v53 = vld [vmem:[%s2849_s5 + $0x68] sm:$0xff]  }
 0x10f   : > { %v767_v13 = vpack.c.bf16 %v761_v60, %v2430_v45  ;;  %v1069_v12 = vmul.f32 %v2289_v18, %v2375_v50  ;;  %v1070_v36 = vmul.f32 %v2287_v17, %v2427_v38  ;;  %v615_v55 = vrot.slane %v2462_v54, 1  ;;  %854 = vst.msk [vmem:[#allocation2 + $0x38] sm:$0xff] %vm286_vm0, %v850_v16  ;;  %v1111_v45 = vpop.permute.xlu1 %1110  ;;  %v1116_v47 = vpop.permute.xlu0 %1115  ;;  %1702 = vmatprep.subr.bf16.mxu1 %v1823_v61  ;;  %v1824_v17 = vld [vmem:[%s2849_s5 + $0x20] sm:$0xff]   ;;  %v1827_v38 = vld [vmem:[%s2849_s5 + $0x70] sm:$0xff]  }
 0x110   : > { %v522_v20 = vpack.c.bf16 %v517_v41, %v516_v22  ;;  %v587_v27 = vpack.c.bf16 %v582_v62, %v2394_v49  ;;  %v2524_v18 = vmul.f32 %v2311_v34, %v2462_v54  ;;  %v1148_v28 = vmul.f32 %v1111_v45, %v624_v46  ;;  %1703 = vmatpush3.bf16.msra.mxu1 %v1824_v17 }
 0x111   : > { %v1149_v8 = vmul.f32 %v1116_v47, %v2414_v57  ;;  %v1076_v7 = vpack.c.bf16 %v1070_v36, %v1069_v12  ;;  %v2894_v59 = vrot.slane %v2375_v50, 1  ;;  %776 = vrot.lane.b32.xlu1 %v767_v13, %s1896_s9  ;;  %v621_v46 = vsel %vm618_vm2, %v614_v9, %v615_v55  ;;  %1704 = vmatprep.subr.bf16.mxu1 %v1825_v53 }
 0x112   : > { %526 = vst.msk [vmem:[#allocation2 + $0x30] sm:$0xff] %vm286_vm0, %v522_v20  ;;  %v585_v50 = vpack.c.bf16 %v2385_v1, %v577_v44  ;;  %1002 = vrot.lane.b32.xlu0 %v994_v37, %s1898_s29  ;;  %v1072_v2 = vmul.f32 %v2309_v33, %v2416_v43  ;;  %v617_v1 = vrot.slane %v2455_v11, 1  ;;  %v677_v19 = vmul.f32 %v2263_v63, %v2469_v14 }
 0x113   : > { %v622_v49 = vsel %vm618_vm2, %v2894_v59, %v614_v9  ;;  %v1156_v56 = vpack.c.bf16 %v1149_v8, %v1148_v28  ;;  %v1121_v21 = vpop.permute.xlu1 %1120  ;;  %v1126_v52 = vpop.permute.xlu0 %1125  ;;  %v2564_v37 = vmul.f32 %v2275_v6, %v2414_v57  ;;  %v451_v26 = vrot.slane %v2416_v43, 7  ;;  %v2897_v8 = vld [vmem:[#allocation14_spill] sm:$0xff] }
 0x114   : > { %v2537_v51 = vmul.f32 %v2307_v32, %v622_v49  ;;  %v2540_v34 = vmul.f32 %v2273_v5, %v622_v49  ;;  %v2552_v32 = vmul.f32 %v2305_v31, %v621_v46  ;;  %v2555_v5 = vmul.f32 %v2297_v25, %v621_v46  ;;  %v1826_v25 = vld [vmem:[%s2849_s5 + $0x28] sm:$0xff]  }
 0x115   : > { %v450_v31 = vrot.slane %v2462_v54, 7  ;;  %1160 = vst.msk [vmem:[#allocation2 + $0x10] sm:$0xff] %vm286_vm0, %v1156_v56  ;;  %v1150_v33 = vmul.f32 %v1121_v21, %v622_v49  ;;  %v1151_v23 = vmul.f32 %v1126_v52, %v621_v46  ;;  %v1077_v60 = vpack.c.bf16 %v1072_v2, %v2524_v18  ;;  %597 = vrot.lane.b32.xlu1 %v587_v27, %s1897_s19  ;;  %v2900_v56 = vld [vmem:[#allocation20_spill] sm:$0xff]  ;;  %v2901_v21 = vld [vmem:[#allocation17_spill] sm:$0xff] }
 0x116   : > { %v2895_v63 = vrot.slane %v2364_v10, 1  ;;  %v914_v57 = vpack.c.bf16 %v2540_v34, %v2564_v37  ;;  %v995_v61 = vpack.c.bf16 %v2502_v42, %v2496_v24  ;;  %1085 = vrot.lane.b32.xlu0 %v1076_v7, %s1896_s9  ;;  %v452_v20 = vrot.slane %v2455_v11, 7  ;;  %1705 = vmatpush3.bf16.msra.mxu1 %v1826_v25 }
 0x117   : > { %v458_v41 = vsel %vm455_vm1, %v449_v15, %v450_v31  ;;  %v1157_v16 = vpack.c.bf16 %v1151_v23, %v1150_v33  ;;  %v457_v13 = vsel %vm455_vm1, %v450_v31, %v451_v26  ;;  %v838_v15 = vpop.permute.xlu1 %837  ;;  %v833_v12 = vpop.permute.xlu0 %832  ;;  %1706 = vmatprep.subr.bf16.mxu1 %v1827_v38  ;;  %v2623_v44 = vmul.f32 %v2323_v40, %v2462_v54  ;;  %v1829_v54 = vld [vmem:[%s2849_s5 + $0x78] sm:$0xff]   ;;  %v2902_v33 = vld [vmem:[#allocation16_spill] sm:$0xff] }
 0x118   : > { %v2578_v6 = vsel %vm618_vm2, %v617_v1, %v2895_v63  ;;  %v2594_v62 = vmul.f32 %v2313_v35, %v458_v41  ;;  %v2600_v36 = vmul.f32 %v2337_v48, %v457_v13  ;;  %v2603_v9 = vmul.f32 %v2301_v29, %v457_v13  ;;  %v1828_v35 = vld [vmem:[%s2849_s5 + $0x30] sm:$0xff]  }
 0x119   : > { %v676_v22 = vmul.f32 %v2265_v0, %v2578_v6  ;;  %v2606_v0 = vmul.f32 %v2303_v30, %v458_v41  ;;  %1161 = vst.msk [vmem:[#allocation2 + $0x28] sm:$0xff] %vm286_vm0, %v1157_v16  ;;  %v847_v45 = vmul.f32 %v838_v15, %v2455_v11  ;;  %v846_v48 = vmul.f32 %v833_v12, %v2416_v43  ;;  %v2904_v15 = vld [vmem:[#allocation19_spill] sm:$0xff] }
 0x11a   : > { %v616_v29 = vrot.slane %v2416_v43, 1  ;;  %593 = vrot.lane.b32.xlu1 %v585_v50, %s1897_s19  ;;  %v2896_v30 = vrot.slane %v2364_v10, 7  ;;  %v2627_v18 = vmul.f32 %v2321_v39, %v2416_v43  ;;  %1087 = vrot.lane.b32.xlu0 %v1077_v60, %s1896_s9  ;;  %v2898_v43 = vld [vmem:[#allocation21_spill] sm:$0xff]  ;;  %v2899_v50 = vld [vmem:[#allocation15_spill] sm:$0xff]  ;;  %v686_v25 = vpack.c.bf16 %v2552_v32, %v2537_v51 }
 0x11b   : > { %v684_v47 = vpack.c.bf16 %v677_v19, %v676_v22  ;;  %v996_v17 = vpack.c.bf16 %v2603_v9, %v2606_v0  ;;  %v851_v28 = vpack.c.bf16 %v847_v45, %v846_v48  ;;  %v510_v49 = vpop.permute.xlu1 %509  ;;  %v505_v34 = vpop.permute.xlu0 %504  ;;  %1707 = vmatpush3.bf16.msra.mxu1 %v1828_v35  ;;  %v912_v23 = vmul.f32 %v2902_v33, %v2578_v6  ;;  %v2906_v35 = vld [vmem:[#allocation23_spill] sm:$0xff]  ;;  %v2908_v48 = vld [vmem:[#allocation28_spill] sm:$0xff] }
 0x11c   : > { %v463_v27 = vsel %vm455_vm1, %v452_v20, %v2896_v30  ;;  %v620_v59 = vsel %vm618_vm2, %v615_v55, %v616_v29  ;;  %v619_v40 = vsel %vm618_vm2, %v616_v29, %v617_v1  ;;  %v1166_v39 = vld [vmem:[#allocation2 + $0x10] sm:$0xff]  ;;  %v519_v55 = vmul.f32 %v510_v49, %v457_v13  ;;  %1708 = vmatprep.subr.bf16.mxu1 %v1829_v54 }
 0x11d   : > { %v758_v7 = vmul.f32 %v2897_v8, %v463_v27  ;;  %v2640_v46 = vmul.f32 %v2898_v43, %v620_v59  ;;  %v910_v53 = vmul.f32 %v2899_v50, %v620_v59  ;;  %v683_v2 = vmul.f32 %v2900_v56, %v619_v40  ;;  %855 = vst.msk [vmem:[#allocation2 + $0x50] sm:$0xff] %vm286_vm0, %v851_v28 }
 0x11e   : > { %v911_v52 = vmul.f32 %v2901_v21, %v619_v40  ;;  %v518_v1 = vmul.f32 %v505_v34, %v458_v41  ;;  %1756 = vmatprep.mubr.msk.bf16.mxu0 %vm286_vm0, %v1166_v39  ;;  %v588_v37 = vpack.c.bf16 %v2627_v18, %v2623_v44  ;;  %692 = vrot.lane.b32.xlu1 %v684_v47, %s1898_s29  ;;  %v2909_v47 = vld [vmem:[#allocation24_spill] sm:$0xff]  ;;  %v2910_v44 = vld [vmem:[#allocation29_spill] sm:$0xff] }
 0x11f   : > { %v766_v19 = vpack.c.bf16 %v2436_v4, %v758_v7  ;;  %v915_v31 = vpack.c.bf16 %v910_v53, %v2555_v5  ;;  %v768_v60 = vpack.c.bf16 %v2594_v62, %v2499_v3  ;;  %v1830_v4 = vld [vmem:[%s2849_s5 + $0x38] sm:$0xff]   ;;  %923 = vrot.lane.b32.xlu0 %v914_v57, %s1897_s19  ;;  %v456_v41 = vsel %vm455_vm1, %v451_v26, %v452_v20  ;;  %v2903_v5 = vld [vmem:[#allocation18_spill] sm:$0xff]  ;;  %v1131_v32 = vpop.permute.xlu1 %1130  ;;  %v1136_v22 = vpop.permute.xlu0 %1135  ;;  %v2911_v7 = vld [vmem:[#allocation27_spill] sm:$0xff] }
 0x120   : > { %v523_v63 = vpack.c.bf16 %v519_v55, %v518_v1  ;;  %v993_v16 = vmul.f32 %v2903_v5, %v463_v27  ;;  %v687_v51 = vpack.c.bf16 %v683_v2, %v2640_v46  ;;  %v1169_v13 = vld [vmem:[#allocation2 + $0x28] sm:$0xff]  ;;  %v916_v38 = vpack.c.bf16 %v912_v23, %v911_v52  ;;  %v2905_v62 = vld [vmem:[#allocation22_spill] sm:$0xff]  ;;  %v2907_v57 = vld [vmem:[#allocation25_spill] sm:$0xff]  ;;  %1709 = vmatpush3.bf16.msra.mxu1 %v1830_v4 }
 0x121   : > { %v992_v3 = vmul.f32 %v2904_v15, %v456_v41  ;;  %v1073_v12 = vmul.f32 %v2905_v62, %v2455_v11  ;;  %v765_v45 = vmul.f32 %v2906_v35, %v456_v41  ;;  %v1152_v58 = vmul.f32 %v1131_v32, %v620_v59  ;;  %1757 = vmatmul.mubr.msk.bf16.vlgmr.msra.gmra.mrb[8].mxu0 %vm286_vm0, %v1169_v13 }
 0x122   : > { %527 = vst.msk [vmem:[#allocation2 + $0x48] sm:$0xff] %vm286_vm0, %v523_v63  ;;  %v1153_v26 = vmul.f32 %v1136_v22, %v619_v40  ;;  %v840_v20 = vmul.f32 %v2907_v57, %v2364_v10  ;;  %v841_v29 = vmul.f32 %v2909_v47, %v2908_v48  ;;  %774 = vrot.lane.b32.xlu1 %v766_v19, %s1896_s9  ;;  %v1657_v10 = vld [vmem:[%s2850_s6 + $0x230] sm:$0xff]  ;;  %v2912_v40 = vld [vmem:[#allocation26_spill] sm:$0xff]  ;;  %v2916_v57 = vld [vmem:[#allocation9_spill] sm:$0xff] }
 0x123   : > { %v997_v30 = vpack.c.bf16 %v993_v16, %v992_v3  ;;  %v1078_v11 = vpack.c.bf16 %v2910_v44, %v1073_v12  ;;  %v769_v18 = vpack.c.bf16 %v765_v45, %v2600_v36  ;;  %1004 = vrot.lane.b32.xlu0 %v995_v61, %s1898_s29  ;;  %v512_v59 = vmul.f32 %v2911_v7, %v456_v41  ;;  %v1658_v36 = vld [vmem:[%s2850_s6 + $0x238] sm:$0xff]  ;;  %v2913_v45 = vld [vmem:[#allocation6_spill] sm:$0xff]  ;;  %v2918_v48 = vld [vmem:[#allocation11_spill] sm:$0xff] }
 0x124   : > { %v1158_v28 = vpack.c.bf16 %v1153_v26, %v1152_v58  ;;  %v848_v8 = vpack.c.bf16 %v841_v29, %v840_v20  ;;  %v513_v49 = vmul.f32 %v2912_v40, %v463_v27  ;;  %v2914_v58 = vld [vmem:[#allocation7_spill] sm:$0xff]  ;;  %v2915_v26 = vld [vmem:[#allocation8_spill] sm:$0xff]  ;;  %v2917_v20 = vld [vmem:[#allocation10_spill] sm:$0xff] }
 0x125   : > { %v2919_v47 = vld [vmem:[#allocation12_spill] sm:$0xff]  ;;  %v2920_v29 = vld [vmem:[#allocation13_spill] sm:$0xff] }
 0x126   : > { %1162 = vst.msk [vmem:[#allocation2 + $0x40] sm:$0xff] %vm286_vm0, %v1158_v28  ;;  %852 = vst.msk [vmem:[#allocation2 + $0x8] sm:$0xff] %vm286_vm0, %v848_v8  ;;  %v520_v24 = vpack.c.bf16 %v513_v49, %v512_v59  ;;  %1140 = vperm.xlu1 %1810, %v1657_v10  }
 0x127   : > { %1145 = vperm.xlu0 %1809, %v1658_v36  }
 0x128   : > { %524 = vst.msk [vmem:[#allocation2] sm:$0xff] %vm286_vm0, %v520_v24 }
 0x12a   : > { %599 = vrot.lane.b32.xlu1 %v588_v37, %s1897_s19 }
 0x12b   : > { %925 = vrot.lane.b32.xlu0 %v915_v31, %s1897_s19 }
 0x12d   : > { %v1172_v42 = vld [vmem:[#allocation2 + $0x40] sm:$0xff] }
 0x12e   : > { %1760 = vmatprep.mubr.msk.bf16.mxu0 %vm286_vm0, %v1172_v42  ;;  %696 = vrot.lane.b32.xlu1 %v686_v25, %s1898_s29 }
 0x12f   : > { %1006 = vrot.lane.b32.xlu0 %v996_v17, %s1898_s29 }
 0x132   : > { %778 = vrot.lane.b32.xlu1 %v768_v60, %s1896_s9 }
 0x133   : > { %927 = vrot.lane.b32.xlu0 %v916_v38, %s1897_s19 }
 0x136   : > { %698 = vrot.lane.b32.xlu1 %v687_v51, %s1898_s29 }
 0x137   : > { %1008 = vrot.lane.b32.xlu0 %v997_v30, %s1898_s29 }
 0x13a   : > { %780 = vrot.lane.b32.xlu1 %v769_v18, %s1896_s9 }
 0x13b   : > { %1089 = vrot.lane.b32.xlu0 %v1078_v11, %s1896_s9  ;;  %s269_s9 = sand.u32 1, %s1885_s25  }
 0x13c   : > { %s1583_s29 = sshll.u32 %s269_s9, 6  ;;  %s2803_s13 = scalar_lea.sflag [#allocation4], %s269_s9 }
 0x13d   : > { %s2742_s20 = scalar_lea.vmem [#allocation3], %s1583_s29 }
 0x13e   : > { %287 = vst.msk [vmem:[%s2742_s20] sm:$0xff] %vm286_vm0, %v2913_v45  ;;  %288 = vst.msk [vmem:[%s2742_s20 + $0x8] sm:$0xff] %vm286_vm0, %v2914_v58  ;;  %s1517_s21 = sshll.u32 %s2742_s20, 4  ;;  %s2795_s21 = int_to_ptr.vmem [resolvable:$true] %s1517_s21 }
 0x13f   : > { %289 = vst.msk [vmem:[%s2742_s20 + $0x10] sm:$0xff] %vm286_vm0, %v2915_v26  ;;  %290 = vst.msk [vmem:[%s2742_s20 + $0x18] sm:$0xff] %vm286_vm0, %v2916_v57  ;;  %p1838_p0 = scmp.lt.s32.totalorder %s2795_s21, %s1836_s15 }
 0x140   : > { %291 = vst.msk [vmem:[%s2742_s20 + $0x20] sm:$0xff] %vm286_vm0, %v2917_v20  ;;  %292 = vst.msk [vmem:[%s2742_s20 + $0x28] sm:$0xff] %vm286_vm0, %v2918_v48 }
 0x141   : > { %293 = vst.msk [vmem:[%s2742_s20 + $0x30] sm:$0xff] %vm286_vm0, %v2919_v47  ;;  %294 = vst.msk [vmem:[%s2742_s20 + $0x38] sm:$0xff] %vm286_vm0, %v2920_v29 }
 0x177   : > { %v1084_v61 = vpop.permute.xlu0 %1083 }
 0x17b   : > { %v596_v27 = vpop.permute.xlu1 %595 }
 0x17c   : > { %607 = vst.msk [vmem:[#allocation2 + $0x18] sm:$0xff] %vm605_vm3, %v596_v27 }
 0x17f   : > { %v695_v9 = vpop.permute.xlu1 %694 }
 0x180   : > { %706 = vst.msk [vmem:[#allocation2 + $0x18] sm:$0xff] %vm704_vm4, %v695_v9  ;;  %v922_v0 = vpop.permute.xlu0 %921 }
 0x181   : > { %933 = vst.msk [vmem:[#allocation2 + $0x8] sm:$0xff] %vm605_vm3, %v922_v0 }
 0x183   : > { %v777_v17 = vpop.permute.xlu1 %776 }
 0x184   : > { %788 = vst.msk [vmem:[#allocation2 + $0x18] sm:$0xff] %vm786_vm5, %v777_v17  ;;  %v1003_v34 = vpop.permute.xlu0 %1002 }
 0x185   : > { %1014 = vst.msk [vmem:[#allocation2 + $0x8] sm:$0xff] %vm704_vm4, %v1003_v34 }
 0x186   : > { %1095 = vst.msk [vmem:[#allocation2 + $0x8] sm:$0xff] %vm786_vm5, %v1084_v61 }
 0x187   : > { %v598_v39 = vpop.permute.xlu1 %597 }
 0x188   : > { %608 = vst.msk [vmem:[#allocation2 + $0x30] sm:$0xff] %vm605_vm3, %v598_v39  ;;  %v1086_v43 = vpop.permute.xlu0 %1085 }
 0x18b   : > { %v1167_v1 = vld [vmem:[#allocation2 + $0x18] sm:$0xff] }
 0x18c   : > { %v594_v46 = vpop.permute.xlu1 %593  ;;  %v1088_v50 = vpop.permute.xlu0 %1087 }
 0x18d   : > { %606 = vst.msk [vmem:[#allocation2] sm:$0xff] %vm605_vm3, %v594_v46  ;;  %v1165_v53 = vld [vmem:[#allocation2 + $0x8] sm:$0xff] }
 0x18e   : > { %1364 = vmatprep.mubr.bf16.mxu1 %v1165_v53 }
 0x190   : > { %v693_v56 = vpop.permute.xlu1 %692 }
 0x191   : > { %705 = vst.msk [vmem:[#allocation2] sm:$0xff] %vm704_vm4, %v693_v56  ;;  %v924_v2 = vpop.permute.xlu0 %923 }
 0x192   : > { %934 = vst.msk [vmem:[#allocation2 + $0x20] sm:$0xff] %vm605_vm3, %v924_v2 }
 0x194   : > { %v775_v21 = vpop.permute.xlu1 %774 }
 0x195   : > { %v1005_v52 = vpop.permute.xlu0 %1004  ;;  %787 = vst.msk [vmem:[#allocation2] sm:$0xff] %vm786_vm5, %v775_v21 }
 0x196   : > { %1015 = vst.msk [vmem:[#allocation2 + $0x20] sm:$0xff] %vm704_vm4, %v1005_v52 }
 0x197   : > { %1096 = vst.msk [vmem:[#allocation2 + $0x20] sm:$0xff] %vm786_vm5, %v1086_v43 }
 0x19c   : > { %v1164_v54 = vld [vmem:[#allocation2] sm:$0xff] }
 0x19d   : > { %1365 = vmatmul.mubr.bf16.vlgmr.msra.gmra.mrb[0].mxu1 %v1164_v54 }
 0x19e   : > { %v1168_v55 = vld [vmem:[#allocation2 + $0x20] sm:$0xff] }
 0x19f   : > { %1372 = vmatprep.mubr.bf16.mxu1 %v1168_v55 }
 0x1a5   : > { %v1141_v19 = vpop.permute.xlu1 %1140  ;;  %1373 = vmatmul.mubr.bf16.gmra.mrb[4].mxu1 %v1167_v1 }
 0x1a6   : > { %v1146_v37 = vpop.permute.xlu0 %1145  ;;  %v1154_v31 = vmul.f32 %v1141_v19, %v2578_v6 }
 0x1a7   : > { %v1155_v25 = vmul.f32 %v1146_v37, %v2469_v14 }
 0x1a9   : > { %v1159_v33 = vpack.c.bf16 %v1155_v25, %v1154_v31  ;;  %v600_v23 = vpop.permute.xlu1 %599 }
 0x1aa   : > { %v926_v60 = vpop.permute.xlu0 %925  ;;  %609 = vst.msk [vmem:[#allocation2 + $0x48] sm:$0xff] %vm605_vm3, %v600_v23 }
 0x1ab   : > { %1163 = vst.msk [vmem:[#allocation2 + $0x58] sm:$0xff] %vm286_vm0, %v1159_v33 }
 0x1ac   : > { %935 = vst.msk [vmem:[#allocation2 + $0x38] sm:$0xff] %vm605_vm3, %v926_v60 }
 0x1ad   : > { %v697_v4 = vpop.permute.xlu1 %696 }
 0x1ae   : > { %v1007_v63 = vpop.permute.xlu0 %1006  ;;  %707 = vst.msk [vmem:[#allocation2 + $0x30] sm:$0xff] %vm704_vm4, %v697_v4 }
 0x1af   : > { %1016 = vst.msk [vmem:[#allocation2 + $0x38] sm:$0xff] %vm704_vm4, %v1007_v63 }
 0x1b0   : > { %1097 = vst.msk [vmem:[#allocation2 + $0x38] sm:$0xff] %vm786_vm5, %v1088_v50 }
 0x1b1   : > { %v779_v6 = vpop.permute.xlu1 %778 }
 0x1b2   : > { %v928_v41 = vpop.permute.xlu0 %927  ;;  %789 = vst.msk [vmem:[#allocation2 + $0x30] sm:$0xff] %vm786_vm5, %v779_v6  ;;  %v1175_v14 = vld [vmem:[#allocation2 + $0x58] sm:$0xff] }
 0x1b3   : > { %936 = vst.msk [vmem:[#allocation2 + $0x50] sm:$0xff] %vm605_vm3, %v928_v41  ;;  %1761 = vmatmul.mubr.msk.bf16.gmra.mrb[12].mxu0 %vm286_vm0, %v1175_v14 }
 0x1b5   : > { %v699_v5 = vpop.permute.xlu1 %698 }
 0x1b6   : > { %v1009_v16 = vpop.permute.xlu0 %1008  ;;  %708 = vst.msk [vmem:[#allocation2 + $0x48] sm:$0xff] %vm704_vm4, %v699_v5 }
 0x1b7   : > { %1017 = vst.msk [vmem:[#allocation2 + $0x50] sm:$0xff] %vm704_vm4, %v1009_v16  ;;  %v1171_v51 = vld [vmem:[#allocation2 + $0x38] sm:$0xff] }
 0x1b8   : > { %1380 = vmatprep.mubr.bf16.mxu1 %v1171_v51 }
 0x1b9   : > { %v781_v32 = vpop.permute.xlu1 %780  ;;  %v1170_v22 = vld [vmem:[#allocation2 + $0x30] sm:$0xff] }
 0x1ba   : > { %v1090_v13 = vpop.permute.xlu0 %1089  ;;  %790 = vst.msk [vmem:[#allocation2 + $0x48] sm:$0xff] %vm786_vm5, %v781_v32  ;;  %1381 = vmatmul.mubr.bf16.gmra.mrb[8].mxu1 %v1170_v22 }
 0x1bb   : > { %1098 = vst.msk [vmem:[#allocation2 + $0x50] sm:$0xff] %vm786_vm5, %v1090_v13 }
 0x1c1   : > { %v1173_v38 = vld [vmem:[#allocation2 + $0x48] sm:$0xff] }
 0x1c2   : > { %v1174_v15 = vld [vmem:[#allocation2 + $0x50] sm:$0xff] }
 0x1c3   : > { %1388 = vmatprep.mubr.bf16.mxu1 %v1174_v15 }
 0x1c4   : > { %1389 = vmatmul.mubr.bf16.gmra.mrb[12].mxu1 %v1173_v38 }
 0x1f4   : > { %v1758_v3 = vpop.f32.mrb[8].mxu0 }
 0x1f5   : > { %v1431_v62 = vpop.f32.mrb[9].mxu0 }
 0x1f6   : > { %v1759_v12 = vpop.f32.mrb[10].mxu0 }
 0x1f7   : > { %v1434_v35 = vpop.f32.mrb[11].mxu0 }
 0x270   : > { %v1710_v30 = vpop.f32.mrb[0].mxu1 }
 0x271   : > { %v1711_v44 = vpop.f32.mrb[1].mxu1 }
 0x272   : > { %v1712_v11 = vadd.f32 %v1711_v44, %v1710_v30  ;;  %v1713_v18 = vpop.f32.mrb[2].mxu1 }
 0x273   : > { %v1714_v28 = vpop.f32.mrb[3].mxu1 }
 0x274   : > { %v1432_v10 = vadd.f32 %v1712_v11, %v1431_v62  ;;  %v1715_v8 = vadd.f32 %v1714_v28, %v1713_v18 }
 0x276   : > { %v1435_v7 = vadd.f32 %v1715_v8, %v1434_v35  ;;  %1470 = vrot.lane.b32.xlu0 %v1432_v10, %s1897_s19 }
 0x278   : > { %1472 = vrot.lane.b32.xlu1 %v1435_v7, %s1897_s19  ;;  %v1716_v59 = vpop.f32.mrb[4].mxu1 }
 0x279   : > { %v1717_v40 = vpop.f32.mrb[5].mxu1 }
 0x27a   : > { %v1718_v49 = vadd.f32 %v1717_v40, %v1716_v59  ;;  %v1719_v36 = vpop.f32.mrb[6].mxu1 }
 0x27b   : > { %v1720_v24 = vpop.f32.mrb[7].mxu1 }
 0x27c   : > { %v1440_v42 = vadd.f32 %v1758_v3, %v1718_v49  ;;  %v1721_v61 = vadd.f32 %v1720_v24, %v1719_v36 }
 0x27e   : > { %v1443_v27 = vadd.f32 %v1759_v12, %v1721_v61  ;;  %1474 = vrot.lane.b32.xlu0 %v1440_v42, %s1897_s19 }
 0x280   : > { %1476 = vrot.lane.b32.xlu1 %v1443_v27, %s1897_s19 }
 0x286   : > { %v1762_v9 = vpop.f32.mrb[12].mxu0 }
 0x287   : > { %v1447_v0 = vpop.f32.mrb[13].mxu0 }
 0x288   : > { %v1763_v17 = vpop.f32.mrb[14].mxu0 }
 0x289   : > { %v1450_v34 = vpop.f32.mrb[15].mxu0 }
 0x28d   : > { %v1722_v39 = vpop.f32.mrb[8].mxu1 }
 0x28e   : > { %v1723_v43 = vpop.f32.mrb[9].mxu1 }
 0x28f   : > { %v1724_v46 = vadd.f32 %v1723_v43, %v1722_v39  ;;  %v1725_v50 = vpop.f32.mrb[10].mxu1 }
 0x290   : > { %v1726_v53 = vpop.f32.mrb[11].mxu1 }
 0x291   : > { %v1448_v56 = vadd.f32 %v1724_v46, %v1447_v0  ;;  %v1727_v2 = vadd.f32 %v1726_v53, %v1725_v50 }
 0x293   : > { %v1451_v21 = vadd.f32 %v1727_v2, %v1450_v34  ;;  %1478 = vrot.lane.b32.xlu0 %v1448_v56, %s1897_s19 }
 0x295   : > { %1480 = vrot.lane.b32.xlu1 %v1451_v21, %s1897_s19 }
 0x297   : > { %v1728_v52 = vpop.f32.mrb[12].mxu1 }
 0x298   : > { %v1729_v54 = vpop.f32.mrb[13].mxu1 }
 0x299   : > { %v1730_v55 = vadd.f32 %v1729_v54, %v1728_v52  ;;  %v1731_v1 = vpop.f32.mrb[14].mxu1 }
 0x29a   : > { %v1732_v19 = vpop.f32.mrb[15].mxu1 }
 0x29b   : > { %v1456_v37 = vadd.f32 %v1762_v9, %v1730_v55  ;;  %v1733_v31 = vadd.f32 %v1732_v19, %v1731_v1 }
 0x29d   : > { %v1459_v25 = vadd.f32 %v1763_v17, %v1733_v31  ;;  %1482 = vrot.lane.b32.xlu0 %v1456_v37, %s1897_s19 }
 0x29f   : > { %1484 = vrot.lane.b32.xlu1 %v1459_v25, %s1897_s19  ;;  %s1687_s19 = sshll.u32 %s1963_s28, 10  ;;  %s1831_s28 = scalar_lea.vmem %s2795_s21, 1024 }
 0x2a0   : > { %s2793_s8 = scalar_lea.hbm %s2851_s7, %s1687_s19  ;;  %p1832_p11 = scmp.ne.s32.totalorder %s2795_s21, %s1831_s28 }
 0x2a1   : > { %p1839_p1 = scmp.lt.s32.totalorder %s1837_s16, %s1831_s28 }
 0x2a2   : > { %p1833_p12 = pnand %p1832_p11, %p1980_p5 }
 0x2a3   : > { %p1840_p2 = por %p1839_p1, %p1838_p0 }
 0x2a4   : > { %p1834_p13 = pneg %p1833_p12 }
 0x2a6   : > { %p1841_p3 = pnand %p1840_p2, %p1834_p13 }
 0x2e8   : > { %v1471_v33 = vpop.permute.xlu0 %1470 }
 0x2e9   : > { %1495 = vst.msk [vmem:[%s2742_s20] sm:$0xff] %vm1494_vm6, %v1471_v33 }
 0x2ea   : > { %v1473_v23 = vpop.permute.xlu1 %1472 }
 0x2eb   : > { %1496 = vst.msk [vmem:[%s2742_s20 + $0x8] sm:$0xff] %vm1494_vm6, %v1473_v23 }
 0x2f0   : > { %v1475_v60 = vpop.permute.xlu0 %1474 }
 0x2f1   : > { %1497 = vst.msk [vmem:[%s2742_s20 + $0x10] sm:$0xff] %vm1494_vm6, %v1475_v60 }
 0x2f2   : > { %v1477_v4 = vpop.permute.xlu1 %1476 }
 0x2f3   : > { %1498 = vst.msk [vmem:[%s2742_s20 + $0x18] sm:$0xff] %vm1494_vm6, %v1477_v4 }
 0x305   : > { %v1479_v63 = vpop.permute.xlu0 %1478 }
 0x306   : > { %1499 = vst.msk [vmem:[%s2742_s20 + $0x20] sm:$0xff] %vm1494_vm6, %v1479_v63 }
 0x307   : > { %v1481_v6 = vpop.permute.xlu1 %1480 }
 0x308   : > { %1500 = vst.msk [vmem:[%s2742_s20 + $0x28] sm:$0xff] %vm1494_vm6, %v1481_v6 }
 0x30f   : > { %v1483_v41 = vpop.permute.xlu0 %1482 }
 0x310   : > { %1501 = vst.msk [vmem:[%s2742_s20 + $0x30] sm:$0xff] %vm1494_vm6, %v1483_v41 }
 0x311   : > { %v1485_v14 = vpop.permute.xlu1 %1484 }
 0x312   : > { %1502 = vst.msk [vmem:[%s2742_s20 + $0x38] sm:$0xff] %vm1494_vm6, %v1485_v14 }
 0x313   : > { %1844 = shalt.err (!%p1841_p3)
}
 0x314   : > { %s1845_s17 = scalar_lea.hbm %s2793_s8, 1024  ;;  %s1849_s29 = scalar_lea.hbm %s2851_s7, 2048 }
 0x315   : > { %p1846_p4 = scmp.ne.s32.totalorder %s2793_s8, %s1845_s17  ;;  %p1850_p9 = scmp.lt.u32.totalorder %s2793_s8, %s2851_s7 }
 0x316   : > { %p1851_p10 = scmp.lt.u32.totalorder %s1849_s29, %s1845_s17  ;;  %p1853_p12 = scmp.lt.u32.totalorder %s1845_s17, %s2793_s8 }
 0x317   : > { %p1847_p7 = pnand %p1846_p4, %p1980_p5 }
 0x318   : > { %p1852_p11 = por %p1851_p10, %p1850_p9 }
 0x319   : > { %p1848_p8 = pneg %p1847_p7 }
 0x31a   : > { %p1854_p13 = por %p1853_p12, %p1852_p11 }
 0x31c   : > { %p1855_p0 = pnand %p1854_p13, %p1848_p8 }
 0x31e   : > { %1858 = shalt.err (!%p1855_p0)
}
 0x31f   : > { %s1900_s22 = smov 128   ;;  %s1901_s23 = smov 8  }
 0x320   : > { %1764 = dma.vmem_to_hbm [thread:$0]  (%p1980_p5), %s2795_s21, 1024, %s2793_s8, %s2803_s13, %s1900_s22, %s1900_s22, %s1901_s23  }
 0x321 PF: > { %p1770_p1 = scmp.ge.s32.totalorder %s1893_s27, 2  ;;  %s1532_s28 = sand.u32 1, %s1881_s24  }
 0x322   : > { %s1533_s14 = scalar_lea.sflag [#allocation4], %s1532_s28 }
 0x323   : > { %p1767_p2 = pnand %p1770_p1, %p1984_p6 }
 0x325   : > { %1876 = dma.done.wait (!%p1767_p2), %s1533_s14, 1024  }
 0x326   : > { %1878 = vsyncadd (!%p1767_p2), %s1533_s14, 4294966272  ;;  %p17_p3 = scmp.ge.s32.totalorder %s1967_s30, 4   ;;  %s2921_s24 = smov %s1885_s25 }
 0x327   : > { %s2922_s25 = smov %s1889_s26  ;;  %s2923_s26 = smov %s1978_s10 }
 0x328   : > { %s2924_s27 = smov %s1967_s30  ;;  %19 = sbr.rel (!%p17_p3) target bundleno = 3 (0x3), region = 91 }
 0x32f   :  { %1538 = vsyncpa [#allocation4], 1 }
 0x330   :  { %1540 = vsyncpa [#allocation4 + $0x1], 1 }

</bundles_post_ra>
